<compile_context>
chip_gen: v6e
topology: v6e:2x2x1
jax: 0.10.0
libtpu: 0.0.40
codegen_flags: <defaults>
</compile_context>

<pallas_src>
from functools import partial

import numpy as np
import jax
import jax.numpy as jnp
from jax.experimental import pallas as pl
from jax.experimental.pallas import tpu as pltpu  # noqa: F401  (kept for TPU-specific tuning hooks)

# ---- small, module-consistent shapes (scaled down) ----
GRID_C, GRID_H, GRID_W = 4, 8, 8       # GRID_SIZE = (C, H, W)
NUM_GRIDS  = 3                         # KarelTaskEncoder(num_grids=3)
CHANNELS   = 8                         # grid-encoder embedding_size ("channels")
E          = 64                        # LSTM / embedding width ("e")
NUM_LAYERS = 2
NUM_DELTAS = 15                        # len(STATE_DELTAS); output vocab = NUM_DELTAS + 1
OUT_DIM    = NUM_DELTAS + 1
BATCH      = 2
MAX_LENGTH = 3
LANES      = 128                       # TPU lane width (padded output vocab / ops rows)


# ---------------- fused rollout kernel (single invocation, no grid) ----------------

def _rollout_kernel(x_ref, emb_ref, w1_ref, b1_ref, w2_ref, b2_ref,
                    gew_ref, geb_ref, wih_ref, whh_ref, b_ref, ow_ref, ob_ref,
                    ops_ref, state_ref, *, max_length):
    T = x_ref.shape[0]          # module batch == LSTM sequence length (unsqueeze(1) quirk)
    E_ = emb_ref.shape[1]
    L = wih_ref.shape[0]
    LN = ow_ref.shape[1]        # padded output vocab / lane width (128)
    f32, bf16 = jnp.float32, jnp.bfloat16

    # ---- grid encoder: run ONCE (rollout-invariant: `arrays` is never reassigned).
    #      bf16 MXU operands, f32 accumulation, f32 bias/ReLU. ----
    f1 = jnp.maximum(
        jnp.dot(x_ref[...], w1_ref[...], preferred_element_type=f32) + b1_ref[...], 0.0)
    f2 = jnp.maximum(
        jnp.dot(f1.astype(bf16), w2_ref[...], preferred_element_type=f32) + b2_ref[...], 0.0)
    remb = (jnp.dot(f2.astype(bf16), gew_ref[...], preferred_element_type=f32)
            + geb_ref[...] + emb_ref[...])                                 # [T, E] f32

    # Layer-0 input projection hoisted out of the rollout loop (remb is invariant).
    # NOTE: revert both hoists if run_deltas-style grid edits are ever done on device.
    gx0 = (jnp.dot(remb.astype(bf16), wih_ref[0], preferred_element_type=f32)
           + b_ref[0])                                                     # [T, 4E] f32

    h = [jnp.zeros((1, E_), f32) for _ in range(L)]
    c = [jnp.zeros((1, E_), f32) for _ in range(L)]

    lanes = jax.lax.broadcasted_iota(jnp.int32, (1, LN), 1)
    row_y = jax.lax.broadcasted_iota(jnp.int32, (T, E_), 0)
    done = jnp.zeros((1, LN), jnp.int32)
    step_rows = []

    for _s in range(max_length):                      # static unroll of the rollout
        y = remb                                      # input to layer 0 (unused, gx0 hoisted)
        for l in range(L):
            # fused i|f|g|o input projection: ONE N=4E matmul per (layer, rollout step)
            if l == 0:
                gx = gx0
            else:
                gx = (jnp.dot(y.astype(bf16), wih_ref[l], preferred_element_type=f32)
                      + b_ref[l])                                          # [T, 4E]
            hl, cl = h[l], c[l]
            y = jnp.zeros((T, E_), f32)
            for t in range(T):
                # fused recurrence: ONE N=4E matmul per timestep (M=1, bf16 MXU, f32 acc)
                gates = gx[t:t + 1, :] + jnp.dot(hl.astype(bf16), whh_ref[l],
                                                 preferred_element_type=f32)   # [1, 4E]
                i_g = jax.nn.sigmoid(gates[:, 0 * E_:1 * E_])   # PyTorch gate order i,f,g,o
                f_g = jax.nn.sigmoid(gates[:, 1 * E_:2 * E_])
                g_g = jnp.tanh(gates[:, 2 * E_:3 * E_])
                o_g = jax.nn.sigmoid(gates[:, 3 * E_:4 * E_])
                cl = f_g * cl + i_g * g_g
                hl = o_g * jnp.tanh(cl)
                y = jnp.where(row_y == t, hl, y)      # keep rows in vregs (no masked stores)
            h[l], c[l] = hl, cl

        # ---- out head (padded to 128 lanes) + first-max argmax over the delta vocab ----
        logits = (jnp.dot(y.astype(bf16), ow_ref[...], preferred_element_type=f32)
                  + ob_ref[...])                                           # [T, 128] f32
        max_v = jnp.max(logits, axis=-1, keepdims=True)
        col = jax.lax.broadcasted_iota(jnp.int32, logits.shape, 1)
        idx = jnp.min(jnp.where(logits == max_v, col, LN), axis=-1, keepdims=True)  # [T, 1]

        # pack this step's ops into one lane-dense row (lane i <- op of sequence position i)
        row = jnp.zeros((1, LN), jnp.int32)
        for i in range(T):
            row = jnp.where(lanes == i, idx[i:i + 1, :], row)
        step_rows.append(row)
        # device-side done bookkeeping: done[i] |= (op[i] == 0)
        done = jnp.maximum(done, jnp.logical_and(row == 0, lanes < T).astype(jnp.int32))

    # ---- single lane-dense writeback: ops at rows 0..S-1, done at row S, rest zero ----
    srow = jax.lax.broadcasted_iota(jnp.int32, ops_ref.shape, 0)
    table = jnp.zeros(ops_ref.shape, jnp.int32)
    for s, row in enumerate(step_rows):
        table = jnp.where(srow == s, row, table)
    table = jnp.where(srow == max_length, done, table)
    ops_ref[...] = table                              # one unmasked (8,128) store

    # final LSTM state: rows 0..L-1 = h, rows L..2L-1 = c (lane-padded slab)
    state_ref[...] = jnp.zeros_like(state_ref)
    for l in range(L):
        state_ref[l:l + 1, 0:E_] = h[l]
        state_ref[L + l:L + l + 1, 0:E_] = c[l]


# ---------------- jitted device portion (one dispatch, one kernel) ----------------

@partial(jax.jit, static_argnames=("max_length",))
def _forward_device(packed, embeddings, inputs, outputs, max_length):
    N = inputs.shape[0]
    arrays = inputs  # reference forward never reassigns `arrays`
    x_flat = jnp.concatenate([arrays, inputs, outputs], axis=-1).reshape(N, -1)
    x_flat = x_flat.astype(jnp.bfloat16)              # MXU LHS in bf16 (values are 0/1, exact)

    L = packed["wih_f"].shape[0]
    ops_rows = ((max_length + 1 + 7) // 8) * 8        # ops rows 0..S-1, done row at index S
    state_rows = max(8, ((2 * L + 7) // 8) * 8)

    kernel = partial(_rollout_kernel, max_length=max_length)
    ops_tbl, state = pl.pallas_call(
        kernel,
        out_shape=(jax.ShapeDtypeStruct((ops_rows, LANES), jnp.int32),
                   jax.ShapeDtypeStruct((state_rows, LANES), jnp.float32)),
        # No grid: single invocation, whole arrays staged into VMEM once (everything is
        # tiny: ~1.6 MiB of bf16 weights), whole rollout unrolled inside the kernel.
    )(x_flat, embeddings,
      packed["w1d"], packed["b1t"], packed["w2d"], packed["b2t"],
      packed["ge_w"], packed["ge_b"],
      packed["wih_f"], packed["whh_f"], packed["b_f"],
      packed["out_w_pad"], packed["out_b_pad"])
    return arrays, ops_tbl, state


# ---------------- host-side parameter packing ----------------

def _conv3x3_to_dense(w, H, W):
    """w: [3,3,Cin,Cout] -> dense [H*W*Cin, H*W*Cout] equal to Conv2d(3x3, padding=1)
    acting on NHWC-flattened vectors (index (y*W + x)*C + c).

    NOTE (v7x scaling): this lowering is quadratic in grid area (fine at 8x8: ~0.75+0.5 MiB
    bf16). For realistic Karel grids (16x16+) switch to 9 per-tap matmuls / on-the-fly
    im2col to stay inside v7x's 64 MiB VMEM."""
    Cin, Cout = w.shape[2], w.shape[3]
    dense = np.zeros((H * W * Cin, H * W * Cout), np.float32)
    for y in range(H):
        for x in range(W):
            dst = (y * W + x) * Cout
            for dy in range(3):
                for dx in range(3):
                    yy, xx = y + dy - 1, x + dx - 1
                    if 0 <= yy < H and 0 <= xx < W:
                        src = (yy * W + xx) * Cin
                        dense[src:src + Cin, dst:dst + Cout] = w[dy, dx]
    return dense


def make_params(key):
    ks = jax.random.split(key, 12)
    return {
        "conv1_w": 0.10 * jax.random.normal(ks[0], (3, 3, NUM_GRIDS * GRID_C, CHANNELS), jnp.float32),
        "conv1_b": 0.10 * jax.random.normal(ks[1], (CHANNELS,), jnp.float32),
        "conv2_w": 0.10 * jax.random.normal(ks[2], (3, 3, CHANNELS, CHANNELS), jnp.float32),
        "conv2_b": 0.10 * jax.random.normal(ks[3], (CHANNELS,), jnp.float32),
        "ge_w":    0.05 * jax.random.normal(ks[4], (GRID_H * GRID_W * CHANNELS, E), jnp.float32),
        "ge_b":    0.05 * jax.random.normal(ks[5], (E,), jnp.float32),
        "wih":     0.10 * jax.random.normal(ks[6], (NUM_LAYERS, 4 * E, E), jnp.float32),
        "whh":     0.10 * jax.random.normal(ks[7], (NUM_LAYERS, 4 * E, E), jnp.float32),
        "bih":     0.10 * jax.random.normal(ks[8], (NUM_LAYERS, 4 * E), jnp.float32),
        "bhh":     0.10 * jax.random.normal(ks[9], (NUM_LAYERS, 4 * E), jnp.float32),
        "out_w":   0.10 * jax.random.normal(ks[10], (OUT_DIM, E), jnp.float32),
        "out_b":   0.10 * jax.random.normal(ks[11], (OUT_DIM,), jnp.float32),
    }


def pack_params(raw):
    r = {k: np.asarray(v, np.float32) for k, v in raw.items()}
    H, W = GRID_H, GRID_W
    p = {}
    # conv layers as dense lane-aligned matmuls over the NHWC flattening (bf16 MXU weights)
    p["w1d"] = jnp.asarray(_conv3x3_to_dense(r["conv1_w"], H, W), jnp.bfloat16)   # [768, 512]
    p["b1t"] = jnp.asarray(np.tile(r["conv1_b"], H * W)[None, :], jnp.float32)    # [1, 512]
    p["w2d"] = jnp.asarray(_conv3x3_to_dense(r["conv2_w"], H, W), jnp.bfloat16)   # [512, 512]
    p["b2t"] = jnp.asarray(np.tile(r["conv2_b"], H * W)[None, :], jnp.float32)
    p["ge_w"] = jnp.asarray(r["ge_w"], jnp.bfloat16)                              # [512, E]
    p["ge_b"] = jnp.asarray(r["ge_b"][None, :], jnp.float32)                      # [1, E]
    # LSTM gates fused along lanes: [L, E, 4E], PyTorch gate order i|f|g|o preserved.
    wih_f = np.stack([r["wih"][l].T for l in range(NUM_LAYERS)])                  # [L, E, 4E]
    whh_f = np.stack([r["whh"][l].T for l in range(NUM_LAYERS)])                  # [L, E, 4E]
    b_f = (r["bih"] + r["bhh"])[:, None, :]                                       # [L, 1, 4E]
    p["wih_f"] = jnp.asarray(wih_f, jnp.bfloat16)
    p["whh_f"] = jnp.asarray(whh_f, jnp.bfloat16)
    p["b_f"] = jnp.asarray(b_f, jnp.float32)
    # out head padded to 128 lanes; pad bias = -1e30 kept in the f32 post-accumulate add
    ow = np.zeros((E, LANES), np.float32); ow[:, :OUT_DIM] = r["out_w"].T
    ob = np.full((1, LANES), -1e30, np.float32); ob[0, :OUT_DIM] = r["out_b"]
    p["out_w_pad"] = jnp.asarray(ow, jnp.bfloat16)
    p["out_b_pad"] = jnp.asarray(ob, jnp.float32)
    return p


# ---------------- forward wrapper ----------------

def delta_lstm_forward(packed, embeddings, inputs, outputs, max_length=MAX_LENGTH):
    """Mirrors DeltaLSTM.forward; inputs/outputs are [N,H,W,C] float grids (NHWC).

    The entire rollout runs inside one jitted dispatch / one pallas_call; the only
    device->host transfer happens once, after the rollout."""
    N = inputs.shape[0]
    E_ = embeddings.shape[1]
    L = packed["wih_f"].shape[0]

    arrays, ops_tbl, state = _forward_device(packed, embeddings, inputs, outputs,
                                             max_length=max_length)

    # Single packed device->host transfer.
    ops_host, state_host = jax.device_get((ops_tbl, state))
    ops_np = np.asarray(ops_host)[:max_length, :N]                   # [steps, N]
    done_np = np.asarray(ops_host)[max_length, :N].astype(bool)
    h = np.asarray(state_host)[0:L, :E_]
    c = np.asarray(state_host)[L:2 * L, :E_]

    # Replay the reference's done[] / early-break bookkeeping on host (reporting only;
    # the returned `arrays` do not depend on it).
    done_cum = np.cumsum(ops_np == 0, axis=0) > 0
    all_done = done_cum.all(axis=1)
    last_step = int(np.argmax(all_done)) if all_done.any() else max_length - 1
    last_ops = ops_np[last_step]

    # TODO(synk): run_deltas(self.forwards_map[op], array) is a symbolic Karel grid edit
    # (STATE_DELTAS) with no numeric/Pallas equivalent; grids are left unchanged, which
    # matches the reference forward (it never reassigns `arrays`).
    return arrays, last_ops, ops_np, done_np, (h, c)


# ---------------- main ----------------

if __name__ == "__main__":
    key = jax.random.PRNGKey(0)
    kp, ke, ki, ko = jax.random.split(key, 4)

    raw_params = make_params(kp)
    packed = pack_params(raw_params)

    embeddings = jax.random.normal(ke, (BATCH, E), jnp.float32)
    inputs = (jax.random.uniform(ki, (BATCH, GRID_H, GRID_W, GRID_C)) < 0.3).astype(jnp.float32)
    outputs = (jax.random.uniform(ko, (BATCH, GRID_H, GRID_W, GRID_C)) < 0.3).astype(jnp.float32)

    arrays, last_ops, ops_steps, done, (h, c) = delta_lstm_forward(
        packed, embeddings, inputs, outputs)
    jax.block_until_ready(arrays)
    print("KERNEL_OK")
</pallas_src>

<mosaic_0001>
module attributes {stable_mosaic.version = 11 : i64} {
  func.func @_rollout_kernel(%arg0: memref<2x768xbf16, #tpu.memory_space<vmem>>, %arg1: memref<2x64xf32, #tpu.memory_space<vmem>>, %arg2: memref<768x512xbf16, #tpu.memory_space<vmem>>, %arg3: memref<1x512xf32, #tpu.memory_space<vmem>>, %arg4: memref<512x512xbf16, #tpu.memory_space<vmem>>, %arg5: memref<1x512xf32, #tpu.memory_space<vmem>>, %arg6: memref<512x64xbf16, #tpu.memory_space<vmem>>, %arg7: memref<1x64xf32, #tpu.memory_space<vmem>>, %arg8: memref<2x64x256xbf16, #tpu.memory_space<vmem>>, %arg9: memref<2x64x256xbf16, #tpu.memory_space<vmem>>, %arg10: memref<2x1x256xf32, #tpu.memory_space<vmem>>, %arg11: memref<64x128xbf16, #tpu.memory_space<vmem>>, %arg12: memref<1x128xf32, #tpu.memory_space<vmem>>, %arg13: memref<8x128xi32, #tpu.memory_space<vmem>>, %arg14: memref<8x128xf32, #tpu.memory_space<vmem>>) attributes {dimension_semantics = [], scalar_prefetch = 0 : i64, scratch_operands = 0 : i64, tpu.core_type = #tpu.core_type<tc>} {
    %c0 = arith.constant 0 : index
    %c0_0 = arith.constant 0 : index
    %0 = vector.load %arg0[%c0, %c0_0] : memref<2x768xbf16, #tpu.memory_space<vmem>>, vector<2x768xbf16>
    %c0_1 = arith.constant 0 : index
    %c0_2 = arith.constant 0 : index
    %1 = vector.load %arg2[%c0_1, %c0_2] : memref<768x512xbf16, #tpu.memory_space<vmem>>, vector<768x512xbf16>
    %cst = arith.constant dense<0.000000e+00> : vector<2x512xf32>
    %2 = tpu.matmul %0, %1, %cst {dimension_numbers = #tpu.dot_dimension_numbers<[1], [0], [0], [1], [0, 0, 1, 1], [], []>} : vector<2x768xbf16>, vector<768x512xbf16>, vector<2x512xf32> -> vector<2x512xf32>
    %c0_3 = arith.constant 0 : index
    %c0_4 = arith.constant 0 : index
    %3 = vector.load %arg3[%c0_3, %c0_4] : memref<1x512xf32, #tpu.memory_space<vmem>>, vector<1x512xf32>
    %4 = vector.broadcast %3 : vector<1x512xf32> to vector<2x512xf32>
    %5 = arith.addf %2, %4 : vector<2x512xf32>
    %cst_5 = arith.constant 0.000000e+00 : f32
    %6 = vector.broadcast %cst_5 : f32 to vector<2x512xf32>
    %7 = arith.maximumf %5, %6 : vector<2x512xf32>
    %8 = arith.truncf %7 : vector<2x512xf32> to vector<2x512xbf16>
    %c0_6 = arith.constant 0 : index
    %c0_7 = arith.constant 0 : index
    %9 = vector.load %arg4[%c0_6, %c0_7] : memref<512x512xbf16, #tpu.memory_space<vmem>>, vector<512x512xbf16>
    %cst_8 = arith.constant dense<0.000000e+00> : vector<2x512xf32>
    %10 = tpu.matmul %8, %9, %cst_8 {dimension_numbers = #tpu.dot_dimension_numbers<[1], [0], [0], [1], [0, 0, 1, 1], [], []>} : vector<2x512xbf16>, vector<512x512xbf16>, vector<2x512xf32> -> vector<2x512xf32>
    %c0_9 = arith.constant 0 : index
    %c0_10 = arith.constant 0 : index
    %11 = vector.load %arg5[%c0_9, %c0_10] : memref<1x512xf32, #tpu.memory_space<vmem>>, vector<1x512xf32>
    %12 = vector.broadcast %11 : vector<1x512xf32> to vector<2x512xf32>
    %13 = arith.addf %10, %12 : vector<2x512xf32>
    %cst_11 = arith.constant 0.000000e+00 : f32
    %14 = vector.broadcast %cst_11 : f32 to vector<2x512xf32>
    %15 = arith.maximumf %13, %14 : vector<2x512xf32>
    %16 = arith.truncf %15 : vector<2x512xf32> to vector<2x512xbf16>
    %c0_12 = arith.constant 0 : index
    %c0_13 = arith.constant 0 : index
    %17 = vector.load %arg6[%c0_12, %c0_13] : memref<512x64xbf16, #tpu.memory_space<vmem>>, vector<512x64xbf16>
    %cst_14 = arith.constant dense<0.000000e+00> : vector<2x64xf32>
    %18 = tpu.matmul %16, %17, %cst_14 {dimension_numbers = #tpu.dot_dimension_numbers<[1], [0], [0], [1], [0, 0, 1, 1], [], []>} : vector<2x512xbf16>, vector<512x64xbf16>, vector<2x64xf32> -> vector<2x64xf32>
    %c0_15 = arith.constant 0 : index
    %c0_16 = arith.constant 0 : index
    %19 = vector.load %arg7[%c0_15, %c0_16] : memref<1x64xf32, #tpu.memory_space<vmem>>, vector<1x64xf32>
    %20 = vector.broadcast %19 : vector<1x64xf32> to vector<2x64xf32>
    %21 = arith.addf %18, %20 : vector<2x64xf32>
    %c0_17 = arith.constant 0 : index
    %c0_18 = arith.constant 0 : index
    %22 = vector.load %arg1[%c0_17, %c0_18] : memref<2x64xf32, #tpu.memory_space<vmem>>, vector<2x64xf32>
    %23 = arith.addf %21, %22 : vector<2x64xf32>
    %24 = arith.truncf %23 : vector<2x64xf32> to vector<2x64xbf16>
    %c0_19 = arith.constant 0 : index
    %c0_20 = arith.constant 0 : index
    %c0_21 = arith.constant 0 : index
    %25 = vector.load %arg8[%c0_19, %c0_20, %c0_21] : memref<2x64x256xbf16, #tpu.memory_space<vmem>>, vector<1x64x256xbf16>
    %26 = vector.shape_cast %25 : vector<1x64x256xbf16> to vector<64x256xbf16>
    %cst_22 = arith.constant dense<0.000000e+00> : vector<2x256xf32>
    %27 = tpu.matmul %24, %26, %cst_22 {dimension_numbers = #tpu.dot_dimension_numbers<[1], [0], [0], [1], [0, 0, 1, 1], [], []>} : vector<2x64xbf16>, vector<64x256xbf16>, vector<2x256xf32> -> vector<2x256xf32>
    %c0_23 = arith.constant 0 : index
    %c0_24 = arith.constant 0 : index
    %c0_25 = arith.constant 0 : index
    %28 = vector.load %arg10[%c0_23, %c0_24, %c0_25] : memref<2x1x256xf32, #tpu.memory_space<vmem>>, vector<1x1x256xf32>
    %29 = vector.shape_cast %28 : vector<1x1x256xf32> to vector<1x256xf32>
    %30 = vector.broadcast %29 : vector<1x256xf32> to vector<2x256xf32>
    %31 = arith.addf %27, %30 : vector<2x256xf32>
    %cst_26 = arith.constant 0.000000e+00 : f32
    %32 = vector.broadcast %cst_26 : f32 to vector<1x64xf32>
    %cst_27 = arith.constant 0.000000e+00 : f32
    %33 = vector.broadcast %cst_27 : f32 to vector<1x64xf32>
    %cst_28 = arith.constant 0.000000e+00 : f32
    %34 = vector.broadcast %cst_28 : f32 to vector<1x64xf32>
    %cst_29 = arith.constant 0.000000e+00 : f32
    %35 = vector.broadcast %cst_29 : f32 to vector<1x64xf32>
    %36 = tpu.iota {dimensions = array<i32: 1>} : vector<1x128xi32>
    %37 = tpu.iota {dimensions = array<i32: 0>} : vector<2x64xi32>
    %c0_i32 = arith.constant 0 : i32
    %38 = vector.broadcast %c0_i32 : i32 to vector<1x128xi32>
    %cst_30 = arith.constant 0.000000e+00 : f32
    %39 = vector.broadcast %cst_30 : f32 to vector<2x64xf32>
    %40 = vector.extract_strided_slice %31 {offsets = [0, 0], sizes = [1, 256], strides = [1, 1]} : vector<2x256xf32> to vector<1x256xf32>
    %41 = arith.truncf %32 : vector<1x64xf32> to vector<1x64xbf16>
    %c0_31 = arith.constant 0 : index
    %c0_32 = arith.constant 0 : index
    %c0_33 = arith.constant 0 : index
    %42 = vector.load %arg9[%c0_31, %c0_32, %c0_33] : memref<2x64x256xbf16, #tpu.memory_space<vmem>>, vector<1x64x256xbf16>
    %43 = vector.shape_cast %42 : vector<1x64x256xbf16> to vector<64x256xbf16>
    %cst_34 = arith.constant dense<0.000000e+00> : vector<1x256xf32>
    %44 = tpu.matmul %41, %43, %cst_34 {dimension_numbers = #tpu.dot_dimension_numbers<[1], [0], [0], [1], [0, 0, 1, 1], [], []>} : vector<1x64xbf16>, vector<64x256xbf16>, vector<1x256xf32> -> vector<1x256xf32>
    %45 = arith.addf %40, %44 : vector<1x256xf32>
    %46 = vector.extract_strided_slice %45 {offsets = [0, 0], sizes = [1, 64], strides = [1, 1]} : vector<1x256xf32> to vector<1x64xf32>
    %47 = arith.negf %46 : vector<1x64xf32>
    %48 = math.exp %47 : vector<1x64xf32>
    %cst_35 = arith.constant 1.000000e+00 : f32
    %49 = vector.broadcast %cst_35 : f32 to vector<1x64xf32>
    %50 = arith.addf %49, %48 : vector<1x64xf32>
    %51 = arith.divf %49, %50 : vector<1x64xf32>
    %52 = vector.extract_strided_slice %45 {offsets = [0, 64], sizes = [1, 64], strides = [1, 1]} : vector<1x256xf32> to vector<1x64xf32>
    %53 = arith.negf %52 : vector<1x64xf32>
    %54 = math.exp %53 : vector<1x64xf32>
    %cst_36 = arith.constant 1.000000e+00 : f32
    %55 = vector.broadcast %cst_36 : f32 to vector<1x64xf32>
    %56 = arith.addf %55, %54 : vector<1x64xf32>
    %57 = arith.divf %55, %56 : vector<1x64xf32>
    %58 = vector.extract_strided_slice %45 {offsets = [0, 128], sizes = [1, 64], strides = [1, 1]} : vector<1x256xf32> to vector<1x64xf32>
    %59 = math.tanh %58 : vector<1x64xf32>
    %60 = vector.extract_strided_slice %45 {offsets = [0, 192], sizes = [1, 64], strides = [1, 1]} : vector<1x256xf32> to vector<1x64xf32>
    %61 = arith.negf %60 : vector<1x64xf32>
    %62 = math.exp %61 : vector<1x64xf32>
    %cst_37 = arith.constant 1.000000e+00 : f32
    %63 = vector.broadcast %cst_37 : f32 to vector<1x64xf32>
    %64 = arith.addf %63, %62 : vector<1x64xf32>
    %65 = arith.divf %63, %64 : vector<1x64xf32>
    %66 = arith.mulf %57, %34 : vector<1x64xf32>
    %67 = arith.mulf %51, %59 : vector<1x64xf32>
    %68 = arith.addf %66, %67 : vector<1x64xf32>
    %69 = math.tanh %68 : vector<1x64xf32>
    %70 = arith.mulf %65, %69 : vector<1x64xf32>
    %c0_i32_38 = arith.constant 0 : i32
    %71 = vector.broadcast %c0_i32_38 : i32 to vector<2x64xi32>
    %72 = arith.cmpi eq, %37, %71 : vector<2x64xi32>
    %73 = vector.shape_cast %70 : vector<1x64xf32> to vector<1x64xf32>
    %74 = vector.broadcast %73 : vector<1x64xf32> to vector<2x64xf32>
    %75 = arith.select %72, %74, %39 : vector<2x64xi1>, vector<2x64xf32>
    %76 = vector.extract_strided_slice %31 {offsets = [1, 0], sizes = [1, 256], strides = [1, 1]} : vector<2x256xf32> to vector<1x256xf32>
    %77 = arith.truncf %70 : vector<1x64xf32> to vector<1x64xbf16>
    %c0_39 = arith.constant 0 : index
    %c0_40 = arith.constant 0 : index
    %c0_41 = arith.constant 0 : index
    %78 = vector.load %arg9[%c0_39, %c0_40, %c0_41] : memref<2x64x256xbf16, #tpu.memory_space<vmem>>, vector<1x64x256xbf16>
    %79 = vector.shape_cast %78 : vector<1x64x256xbf16> to vector<64x256xbf16>
    %cst_42 = arith.constant dense<0.000000e+00> : vector<1x256xf32>
    %80 = tpu.matmul %77, %79, %cst_42 {dimension_numbers = #tpu.dot_dimension_numbers<[1], [0], [0], [1], [0, 0, 1, 1], [], []>} : vector<1x64xbf16>, vector<64x256xbf16>, vector<1x256xf32> -> vector<1x256xf32>
    %81 = arith.addf %76, %80 : vector<1x256xf32>
    %82 = vector.extract_strided_slice %81 {offsets = [0, 0], sizes = [1, 64], strides = [1, 1]} : vector<1x256xf32> to vector<1x64xf32>
    %83 = arith.negf %82 : vector<1x64xf32>
    %84 = math.exp %83 : vector<1x64xf32>
    %cst_43 = arith.constant 1.000000e+00 : f32
    %85 = vector.broadcast %cst_43 : f32 to vector<1x64xf32>
    %86 = arith.addf %85, %84 : vector<1x64xf32>
    %87 = arith.divf %85, %86 : vector<1x64xf32>
    %88 = vector.extract_strided_slice %81 {offsets = [0, 64], sizes = [1, 64], strides = [1, 1]} : vector<1x256xf32> to vector<1x64xf32>
    %89 = arith.negf %88 : vector<1x64xf32>
    %90 = math.exp %89 : vector<1x64xf32>
    %cst_44 = arith.constant 1.000000e+00 : f32
    %91 = vector.broadcast %cst_44 : f32 to vector<1x64xf32>
    %92 = arith.addf %91, %90 : vector<1x64xf32>
    %93 = arith.divf %91, %92 : vector<1x64xf32>
    %94 = vector.extract_strided_slice %81 {offsets = [0, 128], sizes = [1, 64], strides = [1, 1]} : vector<1x256xf32> to vector<1x64xf32>
    %95 = math.tanh %94 : vector<1x64xf32>
    %96 = vector.extract_strided_slice %81 {offsets = [0, 192], sizes = [1, 64], strides = [1, 1]} : vector<1x256xf32> to vector<1x64xf32>
    %97 = arith.negf %96 : vector<1x64xf32>
    %98 = math.exp %97 : vector<1x64xf32>
    %cst_45 = arith.constant 1.000000e+00 : f32
    %99 = vector.broadcast %cst_45 : f32 to vector<1x64xf32>
    %100 = arith.addf %99, %98 : vector<1x64xf32>
    %101 = arith.divf %99, %100 : vector<1x64xf32>
    %102 = arith.mulf %93, %68 : vector<1x64xf32>
    %103 = arith.mulf %87, %95 : vector<1x64xf32>
    %104 = arith.addf %102, %103 : vector<1x64xf32>
    %105 = math.tanh %104 : vector<1x64xf32>
    %106 = arith.mulf %101, %105 : vector<1x64xf32>
    %c1_i32 = arith.constant 1 : i32
    %107 = vector.broadcast %c1_i32 : i32 to vector<2x64xi32>
    %108 = arith.cmpi eq, %37, %107 : vector<2x64xi32>
    %109 = vector.shape_cast %106 : vector<1x64xf32> to vector<1x64xf32>
    %110 = vector.broadcast %109 : vector<1x64xf32> to vector<2x64xf32>
    %111 = arith.select %108, %110, %75 : vector<2x64xi1>, vector<2x64xf32>
    %112 = arith.truncf %111 : vector<2x64xf32> to vector<2x64xbf16>
    %c1 = arith.constant 1 : index
    %c0_46 = arith.constant 0 : index
    %c0_47 = arith.constant 0 : index
    %113 = vector.load %arg8[%c1, %c0_46, %c0_47] : memref<2x64x256xbf16, #tpu.memory_space<vmem>>, vector<1x64x256xbf16>
    %114 = vector.shape_cast %113 : vector<1x64x256xbf16> to vector<64x256xbf16>
    %cst_48 = arith.constant dense<0.000000e+00> : vector<2x256xf32>
    %115 = tpu.matmul %112, %114, %cst_48 {dimension_numbers = #tpu.dot_dimension_numbers<[1], [0], [0], [1], [0, 0, 1, 1], [], []>} : vector<2x64xbf16>, vector<64x256xbf16>, vector<2x256xf32> -> vector<2x256xf32>
    %c1_49 = arith.constant 1 : index
    %c0_50 = arith.constant 0 : index
    %c0_51 = arith.constant 0 : index
    %116 = vector.load %arg10[%c1_49, %c0_50, %c0_51] : memref<2x1x256xf32, #tpu.memory_space<vmem>>, vector<1x1x256xf32>
    %117 = vector.shape_cast %116 : vector<1x1x256xf32> to vector<1x256xf32>
    %118 = vector.broadcast %117 : vector<1x256xf32> to vector<2x256xf32>
    %119 = arith.addf %115, %118 : vector<2x256xf32>
    %cst_52 = arith.constant 0.000000e+00 : f32
    %120 = vector.broadcast %cst_52 : f32 to vector<2x64xf32>
    %121 = vector.extract_strided_slice %119 {offsets = [0, 0], sizes = [1, 256], strides = [1, 1]} : vector<2x256xf32> to vector<1x256xf32>
    %122 = arith.truncf %33 : vector<1x64xf32> to vector<1x64xbf16>
    %c1_53 = arith.constant 1 : index
    %c0_54 = arith.constant 0 : index
    %c0_55 = arith.constant 0 : index
    %123 = vector.load %arg9[%c1_53, %c0_54, %c0_55] : memref<2x64x256xbf16, #tpu.memory_space<vmem>>, vector<1x64x256xbf16>
    %124 = vector.shape_cast %123 : vector<1x64x256xbf16> to vector<64x256xbf16>
    %cst_56 = arith.constant dense<0.000000e+00> : vector<1x256xf32>
    %125 = tpu.matmul %122, %124, %cst_56 {dimension_numbers = #tpu.dot_dimension_numbers<[1], [0], [0], [1], [0, 0, 1, 1], [], []>} : vector<1x64xbf16>, vector<64x256xbf16>, vector<1x256xf32> -> vector<1x256xf32>
    %126 = arith.addf %121, %125 : vector<1x256xf32>
    %127 = vector.extract_strided_slice %126 {offsets = [0, 0], sizes = [1, 64], strides = [1, 1]} : vector<1x256xf32> to vector<1x64xf32>
    %128 = arith.negf %127 : vector<1x64xf32>
    %129 = math.exp %128 : vector<1x64xf32>
    %cst_57 = arith.constant 1.000000e+00 : f32
    %130 = vector.broadcast %cst_57 : f32 to vector<1x64xf32>
    %131 = arith.addf %130, %129 : vector<1x64xf32>
    %132 = arith.divf %130, %131 : vector<1x64xf32>
    %133 = vector.extract_strided_slice %126 {offsets = [0, 64], sizes = [1, 64], strides = [1, 1]} : vector<1x256xf32> to vector<1x64xf32>
    %134 = arith.negf %133 : vector<1x64xf32>
    %135 = math.exp %134 : vector<1x64xf32>
    %cst_58 = arith.constant 1.000000e+00 : f32
    %136 = vector.broadcast %cst_58 : f32 to vector<1x64xf32>
    %137 = arith.addf %136, %135 : vector<1x64xf32>
    %138 = arith.divf %136, %137 : vector<1x64xf32>
    %139 = vector.extract_strided_slice %126 {offsets = [0, 128], sizes = [1, 64], strides = [1, 1]} : vector<1x256xf32> to vector<1x64xf32>
    %140 = math.tanh %139 : vector<1x64xf32>
    %141 = vector.extract_strided_slice %126 {offsets = [0, 192], sizes = [1, 64], strides = [1, 1]} : vector<1x256xf32> to vector<1x64xf32>
    %142 = arith.negf %141 : vector<1x64xf32>
    %143 = math.exp %142 : vector<1x64xf32>
    %cst_59 = arith.constant 1.000000e+00 : f32
    %144 = vector.broadcast %cst_59 : f32 to vector<1x64xf32>
    %145 = arith.addf %144, %143 : vector<1x64xf32>
    %146 = arith.divf %144, %145 : vector<1x64xf32>
    %147 = arith.mulf %138, %35 : vector<1x64xf32>
    %148 = arith.mulf %132, %140 : vector<1x64xf32>
    %149 = arith.addf %147, %148 : vector<1x64xf32>
    %150 = math.tanh %149 : vector<1x64xf32>
    %151 = arith.mulf %146, %150 : vector<1x64xf32>
    %c0_i32_60 = arith.constant 0 : i32
    %152 = vector.broadcast %c0_i32_60 : i32 to vector<2x64xi32>
    %153 = arith.cmpi eq, %37, %152 : vector<2x64xi32>
    %154 = vector.shape_cast %151 : vector<1x64xf32> to vector<1x64xf32>
    %155 = vector.broadcast %154 : vector<1x64xf32> to vector<2x64xf32>
    %156 = arith.select %153, %155, %120 : vector<2x64xi1>, vector<2x64xf32>
    %157 = vector.extract_strided_slice %119 {offsets = [1, 0], sizes = [1, 256], strides = [1, 1]} : vector<2x256xf32> to vector<1x256xf32>
    %158 = arith.truncf %151 : vector<1x64xf32> to vector<1x64xbf16>
    %c1_61 = arith.constant 1 : index
    %c0_62 = arith.constant 0 : index
    %c0_63 = arith.constant 0 : index
    %159 = vector.load %arg9[%c1_61, %c0_62, %c0_63] : memref<2x64x256xbf16, #tpu.memory_space<vmem>>, vector<1x64x256xbf16>
    %160 = vector.shape_cast %159 : vector<1x64x256xbf16> to vector<64x256xbf16>
    %cst_64 = arith.constant dense<0.000000e+00> : vector<1x256xf32>
    %161 = tpu.matmul %158, %160, %cst_64 {dimension_numbers = #tpu.dot_dimension_numbers<[1], [0], [0], [1], [0, 0, 1, 1], [], []>} : vector<1x64xbf16>, vector<64x256xbf16>, vector<1x256xf32> -> vector<1x256xf32>
    %162 = arith.addf %157, %161 : vector<1x256xf32>
    %163 = vector.extract_strided_slice %162 {offsets = [0, 0], sizes = [1, 64], strides = [1, 1]} : vector<1x256xf32> to vector<1x64xf32>
    %164 = arith.negf %163 : vector<1x64xf32>
    %165 = math.exp %164 : vector<1x64xf32>
    %cst_65 = arith.constant 1.000000e+00 : f32
    %166 = vector.broadcast %cst_65 : f32 to vector<1x64xf32>
    %167 = arith.addf %166, %165 : vector<1x64xf32>
    %168 = arith.divf %166, %167 : vector<1x64xf32>
    %169 = vector.extract_strided_slice %162 {offsets = [0, 64], sizes = [1, 64], strides = [1, 1]} : vector<1x256xf32> to vector<1x64xf32>
    %170 = arith.negf %169 : vector<1x64xf32>
    %171 = math.exp %170 : vector<1x64xf32>
    %cst_66 = arith.constant 1.000000e+00 : f32
    %172 = vector.broadcast %cst_66 : f32 to vector<1x64xf32>
    %173 = arith.addf %172, %171 : vector<1x64xf32>
    %174 = arith.divf %172, %173 : vector<1x64xf32>
    %175 = vector.extract_strided_slice %162 {offsets = [0, 128], sizes = [1, 64], strides = [1, 1]} : vector<1x256xf32> to vector<1x64xf32>
    %176 = math.tanh %175 : vector<1x64xf32>
    %177 = vector.extract_strided_slice %162 {offsets = [0, 192], sizes = [1, 64], strides = [1, 1]} : vector<1x256xf32> to vector<1x64xf32>
    %178 = arith.negf %177 : vector<1x64xf32>
    %179 = math.exp %178 : vector<1x64xf32>
    %cst_67 = arith.constant 1.000000e+00 : f32
    %180 = vector.broadcast %cst_67 : f32 to vector<1x64xf32>
    %181 = arith.addf %180, %179 : vector<1x64xf32>
    %182 = arith.divf %180, %181 : vector<1x64xf32>
    %183 = arith.mulf %174, %149 : vector<1x64xf32>
    %184 = arith.mulf %168, %176 : vector<1x64xf32>
    %185 = arith.addf %183, %184 : vector<1x64xf32>
    %186 = math.tanh %185 : vector<1x64xf32>
    %187 = arith.mulf %182, %186 : vector<1x64xf32>
    %c1_i32_68 = arith.constant 1 : i32
    %188 = vector.broadcast %c1_i32_68 : i32 to vector<2x64xi32>
    %189 = arith.cmpi eq, %37, %188 : vector<2x64xi32>
    %190 = vector.shape_cast %187 : vector<1x64xf32> to vector<1x64xf32>
    %191 = vector.broadcast %190 : vector<1x64xf32> to vector<2x64xf32>
    %192 = arith.select %189, %191, %156 : vector<2x64xi1>, vector<2x64xf32>
    %193 = arith.truncf %192 : vector<2x64xf32> to vector<2x64xbf16>
    %c0_69 = arith.constant 0 : index
    %c0_70 = arith.constant 0 : index
    %194 = vector.load %arg11[%c0_69, %c0_70] : memref<64x128xbf16, #tpu.memory_space<vmem>>, vector<64x128xbf16>
    %cst_71 = arith.constant dense<0.000000e+00> : vector<2x128xf32>
    %195 = tpu.matmul %193, %194, %cst_71 {dimension_numbers = #tpu.dot_dimension_numbers<[1], [0], [0], [1], [0, 0, 1, 1], [], []>} : vector<2x64xbf16>, vector<64x128xbf16>, vector<2x128xf32> -> vector<2x128xf32>
    %c0_72 = arith.constant 0 : index
    %c0_73 = arith.constant 0 : index
    %196 = vector.load %arg12[%c0_72, %c0_73] : memref<1x128xf32, #tpu.memory_space<vmem>>, vector<1x128xf32>
    %197 = vector.broadcast %196 : vector<1x128xf32> to vector<2x128xf32>
    %198 = arith.addf %195, %197 : vector<2x128xf32>
    %cst_74 = arith.constant dense<0xFF800000> : vector<2xf32>
    %199 = vector.multi_reduction <maximumf>, %198, %cst_74 [1] : vector<2x128xf32> to vector<2xf32>
    %200 = vector.shape_cast %199 : vector<2xf32> to vector<2x1xf32>
    %201 = tpu.iota {dimensions = array<i32: 1>} : vector<2x128xi32>
    %202 = vector.broadcast %200 : vector<2x1xf32> to vector<2x128xf32>
    %203 = arith.cmpf oeq, %198, %202 : vector<2x128xf32>
    %c128_i32 = arith.constant 128 : i32
    %204 = vector.broadcast %c128_i32 : i32 to vector<2x128xi32>
    %205 = arith.select %203, %201, %204 : vector<2x128xi1>, vector<2x128xi32>
    %cst_75 = arith.constant dense<2147483647> : vector<2xi32>
    %206 = vector.multi_reduction <minsi>, %205, %cst_75 [1] : vector<2x128xi32> to vector<2xi32>
    %207 = vector.shape_cast %206 : vector<2xi32> to vector<2x1xi32>
    %c0_i32_76 = arith.constant 0 : i32
    %208 = vector.broadcast %c0_i32_76 : i32 to vector<1x128xi32>
    %c0_i32_77 = arith.constant 0 : i32
    %209 = vector.broadcast %c0_i32_77 : i32 to vector<1x128xi32>
    %210 = arith.cmpi eq, %36, %209 : vector<1x128xi32>
    %211 = vector.extract_strided_slice %207 {offsets = [0, 0], sizes = [1, 1], strides = [1, 1]} : vector<2x1xi32> to vector<1x1xi32>
    %212 = vector.shape_cast %211 : vector<1x1xi32> to vector<1x1xi32>
    %213 = vector.broadcast %212 : vector<1x1xi32> to vector<1x128xi32>
    %214 = arith.select %210, %213, %208 : vector<1x128xi1>, vector<1x128xi32>
    %c1_i32_78 = arith.constant 1 : i32
    %215 = vector.broadcast %c1_i32_78 : i32 to vector<1x128xi32>
    %216 = arith.cmpi eq, %36, %215 : vector<1x128xi32>
    %217 = vector.extract_strided_slice %207 {offsets = [1, 0], sizes = [1, 1], strides = [1, 1]} : vector<2x1xi32> to vector<1x1xi32>
    %218 = vector.shape_cast %217 : vector<1x1xi32> to vector<1x1xi32>
    %219 = vector.broadcast %218 : vector<1x1xi32> to vector<1x128xi32>
    %220 = arith.select %216, %219, %214 : vector<1x128xi1>, vector<1x128xi32>
    %c0_i32_79 = arith.constant 0 : i32
    %221 = vector.broadcast %c0_i32_79 : i32 to vector<1x128xi32>
    %222 = arith.cmpi eq, %220, %221 : vector<1x128xi32>
    %c2_i32 = arith.constant 2 : i32
    %223 = vector.broadcast %c2_i32 : i32 to vector<1x128xi32>
    %224 = arith.cmpi slt, %36, %223 : vector<1x128xi32>
    %225 = arith.andi %222, %224 : vector<1x128xi1>
    %226 = arith.extui %225 : vector<1x128xi1> to vector<1x128xi32>
    %227 = arith.maxsi %38, %226 : vector<1x128xi32>
    %cst_80 = arith.constant 0.000000e+00 : f32
    %228 = vector.broadcast %cst_80 : f32 to vector<2x64xf32>
    %229 = vector.extract_strided_slice %31 {offsets = [0, 0], sizes = [1, 256], strides = [1, 1]} : vector<2x256xf32> to vector<1x256xf32>
    %230 = arith.truncf %106 : vector<1x64xf32> to vector<1x64xbf16>
    %c0_81 = arith.constant 0 : index
    %c0_82 = arith.constant 0 : index
    %c0_83 = arith.constant 0 : index
    %231 = vector.load %arg9[%c0_81, %c0_82, %c0_83] : memref<2x64x256xbf16, #tpu.memory_space<vmem>>, vector<1x64x256xbf16>
    %232 = vector.shape_cast %231 : vector<1x64x256xbf16> to vector<64x256xbf16>
    %cst_84 = arith.constant dense<0.000000e+00> : vector<1x256xf32>
    %233 = tpu.matmul %230, %232, %cst_84 {dimension_numbers = #tpu.dot_dimension_numbers<[1], [0], [0], [1], [0, 0, 1, 1], [], []>} : vector<1x64xbf16>, vector<64x256xbf16>, vector<1x256xf32> -> vector<1x256xf32>
    %234 = arith.addf %229, %233 : vector<1x256xf32>
    %235 = vector.extract_strided_slice %234 {offsets = [0, 0], sizes = [1, 64], strides = [1, 1]} : vector<1x256xf32> to vector<1x64xf32>
    %236 = arith.negf %235 : vector<1x64xf32>
    %237 = math.exp %236 : vector<1x64xf32>
    %cst_85 = arith.constant 1.000000e+00 : f32
    %238 = vector.broadcast %cst_85 : f32 to vector<1x64xf32>
    %239 = arith.addf %238, %237 : vector<1x64xf32>
    %240 = arith.divf %238, %239 : vector<1x64xf32>
    %241 = vector.extract_strided_slice %234 {offsets = [0, 64], sizes = [1, 64], strides = [1, 1]} : vector<1x256xf32> to vector<1x64xf32>
    %242 = arith.negf %241 : vector<1x64xf32>
    %243 = math.exp %242 : vector<1x64xf32>
    %cst_86 = arith.constant 1.000000e+00 : f32
    %244 = vector.broadcast %cst_86 : f32 to vector<1x64xf32>
    %245 = arith.addf %244, %243 : vector<1x64xf32>
    %246 = arith.divf %244, %245 : vector<1x64xf32>
    %247 = vector.extract_strided_slice %234 {offsets = [0, 128], sizes = [1, 64], strides = [1, 1]} : vector<1x256xf32> to vector<1x64xf32>
    %248 = math.tanh %247 : vector<1x64xf32>
    %249 = vector.extract_strided_slice %234 {offsets = [0, 192], sizes = [1, 64], strides = [1, 1]} : vector<1x256xf32> to vector<1x64xf32>
    %250 = arith.negf %249 : vector<1x64xf32>
    %251 = math.exp %250 : vector<1x64xf32>
    %cst_87 = arith.constant 1.000000e+00 : f32
    %252 = vector.broadcast %cst_87 : f32 to vector<1x64xf32>
    %253 = arith.addf %252, %251 : vector<1x64xf32>
    %254 = arith.divf %252, %253 : vector<1x64xf32>
    %255 = arith.mulf %246, %104 : vector<1x64xf32>
    %256 = arith.mulf %240, %248 : vector<1x64xf32>
    %257 = arith.addf %255, %256 : vector<1x64xf32>
    %258 = math.tanh %257 : vector<1x64xf32>
    %259 = arith.mulf %254, %258 : vector<1x64xf32>
    %c0_i32_88 = arith.constant 0 : i32
    %260 = vector.broadcast %c0_i32_88 : i32 to vector<2x64xi32>
    %261 = arith.cmpi eq, %37, %260 : vector<2x64xi32>
    %262 = vector.shape_cast %259 : vector<1x64xf32> to vector<1x64xf32>
    %263 = vector.broadcast %262 : vector<1x64xf32> to vector<2x64xf32>
    %264 = arith.select %261, %263, %228 : vector<2x64xi1>, vector<2x64xf32>
    %265 = vector.extract_strided_slice %31 {offsets = [1, 0], sizes = [1, 256], strides = [1, 1]} : vector<2x256xf32> to vector<1x256xf32>
    %266 = arith.truncf %259 : vector<1x64xf32> to vector<1x64xbf16>
    %c0_89 = arith.constant 0 : index
    %c0_90 = arith.constant 0 : index
    %c0_91 = arith.constant 0 : index
    %267 = vector.load %arg9[%c0_89, %c0_90, %c0_91] : memref<2x64x256xbf16, #tpu.memory_space<vmem>>, vector<1x64x256xbf16>
    %268 = vector.shape_cast %267 : vector<1x64x256xbf16> to vector<64x256xbf16>
    %cst_92 = arith.constant dense<0.000000e+00> : vector<1x256xf32>
    %269 = tpu.matmul %266, %268, %cst_92 {dimension_numbers = #tpu.dot_dimension_numbers<[1], [0], [0], [1], [0, 0, 1, 1], [], []>} : vector<1x64xbf16>, vector<64x256xbf16>, vector<1x256xf32> -> vector<1x256xf32>
    %270 = arith.addf %265, %269 : vector<1x256xf32>
    %271 = vector.extract_strided_slice %270 {offsets = [0, 0], sizes = [1, 64], strides = [1, 1]} : vector<1x256xf32> to vector<1x64xf32>
    %272 = arith.negf %271 : vector<1x64xf32>
    %273 = math.exp %272 : vector<1x64xf32>
    %cst_93 = arith.constant 1.000000e+00 : f32
    %274 = vector.broadcast %cst_93 : f32 to vector<1x64xf32>
    %275 = arith.addf %274, %273 : vector<1x64xf32>
    %276 = arith.divf %274, %275 : vector<1x64xf32>
    %277 = vector.extract_strided_slice %270 {offsets = [0, 64], sizes = [1, 64], strides = [1, 1]} : vector<1x256xf32> to vector<1x64xf32>
    %278 = arith.negf %277 : vector<1x64xf32>
    %279 = math.exp %278 : vector<1x64xf32>
    %cst_94 = arith.constant 1.000000e+00 : f32
    %280 = vector.broadcast %cst_94 : f32 to vector<1x64xf32>
    %281 = arith.addf %280, %279 : vector<1x64xf32>
    %282 = arith.divf %280, %281 : vector<1x64xf32>
    %283 = vector.extract_strided_slice %270 {offsets = [0, 128], sizes = [1, 64], strides = [1, 1]} : vector<1x256xf32> to vector<1x64xf32>
    %284 = math.tanh %283 : vector<1x64xf32>
    %285 = vector.extract_strided_slice %270 {offsets = [0, 192], sizes = [1, 64], strides = [1, 1]} : vector<1x256xf32> to vector<1x64xf32>
    %286 = arith.negf %285 : vector<1x64xf32>
    %287 = math.exp %286 : vector<1x64xf32>
    %cst_95 = arith.constant 1.000000e+00 : f32
    %288 = vector.broadcast %cst_95 : f32 to vector<1x64xf32>
    %289 = arith.addf %288, %287 : vector<1x64xf32>
    %290 = arith.divf %288, %289 : vector<1x64xf32>
    %291 = arith.mulf %282, %257 : vector<1x64xf32>
    %292 = arith.mulf %276, %284 : vector<1x64xf32>
    %293 = arith.addf %291, %292 : vector<1x64xf32>
    %294 = math.tanh %293 : vector<1x64xf32>
    %295 = arith.mulf %290, %294 : vector<1x64xf32>
    %c1_i32_96 = arith.constant 1 : i32
    %296 = vector.broadcast %c1_i32_96 : i32 to vector<2x64xi32>
    %297 = arith.cmpi eq, %37, %296 : vector<2x64xi32>
    %298 = vector.shape_cast %295 : vector<1x64xf32> to vector<1x64xf32>
    %299 = vector.broadcast %298 : vector<1x64xf32> to vector<2x64xf32>
    %300 = arith.select %297, %299, %264 : vector<2x64xi1>, vector<2x64xf32>
    %301 = arith.truncf %300 : vector<2x64xf32> to vector<2x64xbf16>
    %c1_97 = arith.constant 1 : index
    %c0_98 = arith.constant 0 : index
    %c0_99 = arith.constant 0 : index
    %302 = vector.load %arg8[%c1_97, %c0_98, %c0_99] : memref<2x64x256xbf16, #tpu.memory_space<vmem>>, vector<1x64x256xbf16>
    %303 = vector.shape_cast %302 : vector<1x64x256xbf16> to vector<64x256xbf16>
    %cst_100 = arith.constant dense<0.000000e+00> : vector<2x256xf32>
    %304 = tpu.matmul %301, %303, %cst_100 {dimension_numbers = #tpu.dot_dimension_numbers<[1], [0], [0], [1], [0, 0, 1, 1], [], []>} : vector<2x64xbf16>, vector<64x256xbf16>, vector<2x256xf32> -> vector<2x256xf32>
    %c1_101 = arith.constant 1 : index
    %c0_102 = arith.constant 0 : index
    %c0_103 = arith.constant 0 : index
    %305 = vector.load %arg10[%c1_101, %c0_102, %c0_103] : memref<2x1x256xf32, #tpu.memory_space<vmem>>, vector<1x1x256xf32>
    %306 = vector.shape_cast %305 : vector<1x1x256xf32> to vector<1x256xf32>
    %307 = vector.broadcast %306 : vector<1x256xf32> to vector<2x256xf32>
    %308 = arith.addf %304, %307 : vector<2x256xf32>
    %cst_104 = arith.constant 0.000000e+00 : f32
    %309 = vector.broadcast %cst_104 : f32 to vector<2x64xf32>
    %310 = vector.extract_strided_slice %308 {offsets = [0, 0], sizes = [1, 256], strides = [1, 1]} : vector<2x256xf32> to vector<1x256xf32>
    %311 = arith.truncf %187 : vector<1x64xf32> to vector<1x64xbf16>
    %c1_105 = arith.constant 1 : index
    %c0_106 = arith.constant 0 : index
    %c0_107 = arith.constant 0 : index
    %312 = vector.load %arg9[%c1_105, %c0_106, %c0_107] : memref<2x64x256xbf16, #tpu.memory_space<vmem>>, vector<1x64x256xbf16>
    %313 = vector.shape_cast %312 : vector<1x64x256xbf16> to vector<64x256xbf16>
    %cst_108 = arith.constant dense<0.000000e+00> : vector<1x256xf32>
    %314 = tpu.matmul %311, %313, %cst_108 {dimension_numbers = #tpu.dot_dimension_numbers<[1], [0], [0], [1], [0, 0, 1, 1], [], []>} : vector<1x64xbf16>, vector<64x256xbf16>, vector<1x256xf32> -> vector<1x256xf32>
    %315 = arith.addf %310, %314 : vector<1x256xf32>
    %316 = vector.extract_strided_slice %315 {offsets = [0, 0], sizes = [1, 64], strides = [1, 1]} : vector<1x256xf32> to vector<1x64xf32>
    %317 = arith.negf %316 : vector<1x64xf32>
    %318 = math.exp %317 : vector<1x64xf32>
    %cst_109 = arith.constant 1.000000e+00 : f32
    %319 = vector.broadcast %cst_109 : f32 to vector<1x64xf32>
    %320 = arith.addf %319, %318 : vector<1x64xf32>
    %321 = arith.divf %319, %320 : vector<1x64xf32>
    %322 = vector.extract_strided_slice %315 {offsets = [0, 64], sizes = [1, 64], strides = [1, 1]} : vector<1x256xf32> to vector<1x64xf32>
    %323 = arith.negf %322 : vector<1x64xf32>
    %324 = math.exp %323 : vector<1x64xf32>
    %cst_110 = arith.constant 1.000000e+00 : f32
    %325 = vector.broadcast %cst_110 : f32 to vector<1x64xf32>
    %326 = arith.addf %325, %324 : vector<1x64xf32>
    %327 = arith.divf %325, %326 : vector<1x64xf32>
    %328 = vector.extract_strided_slice %315 {offsets = [0, 128], sizes = [1, 64], strides = [1, 1]} : vector<1x256xf32> to vector<1x64xf32>
    %329 = math.tanh %328 : vector<1x64xf32>
    %330 = vector.extract_strided_slice %315 {offsets = [0, 192], sizes = [1, 64], strides = [1, 1]} : vector<1x256xf32> to vector<1x64xf32>
    %331 = arith.negf %330 : vector<1x64xf32>
    %332 = math.exp %331 : vector<1x64xf32>
    %cst_111 = arith.constant 1.000000e+00 : f32
    %333 = vector.broadcast %cst_111 : f32 to vector<1x64xf32>
    %334 = arith.addf %333, %332 : vector<1x64xf32>
    %335 = arith.divf %333, %334 : vector<1x64xf32>
    %336 = arith.mulf %327, %185 : vector<1x64xf32>
    %337 = arith.mulf %321, %329 : vector<1x64xf32>
    %338 = arith.addf %336, %337 : vector<1x64xf32>
    %339 = math.tanh %338 : vector<1x64xf32>
    %340 = arith.mulf %335, %339 : vector<1x64xf32>
    %c0_i32_112 = arith.constant 0 : i32
    %341 = vector.broadcast %c0_i32_112 : i32 to vector<2x64xi32>
    %342 = arith.cmpi eq, %37, %341 : vector<2x64xi32>
    %343 = vector.shape_cast %340 : vector<1x64xf32> to vector<1x64xf32>
    %344 = vector.broadcast %343 : vector<1x64xf32> to vector<2x64xf32>
    %345 = arith.select %342, %344, %309 : vector<2x64xi1>, vector<2x64xf32>
    %346 = vector.extract_strided_slice %308 {offsets = [1, 0], sizes = [1, 256], strides = [1, 1]} : vector<2x256xf32> to vector<1x256xf32>
    %347 = arith.truncf %340 : vector<1x64xf32> to vector<1x64xbf16>
    %c1_113 = arith.constant 1 : index
    %c0_114 = arith.constant 0 : index
    %c0_115 = arith.constant 0 : index
    %348 = vector.load %arg9[%c1_113, %c0_114, %c0_115] : memref<2x64x256xbf16, #tpu.memory_space<vmem>>, vector<1x64x256xbf16>
    %349 = vector.shape_cast %348 : vector<1x64x256xbf16> to vector<64x256xbf16>
    %cst_116 = arith.constant dense<0.000000e+00> : vector<1x256xf32>
    %350 = tpu.matmul %347, %349, %cst_116 {dimension_numbers = #tpu.dot_dimension_numbers<[1], [0], [0], [1], [0, 0, 1, 1], [], []>} : vector<1x64xbf16>, vector<64x256xbf16>, vector<1x256xf32> -> vector<1x256xf32>
    %351 = arith.addf %346, %350 : vector<1x256xf32>
    %352 = vector.extract_strided_slice %351 {offsets = [0, 0], sizes = [1, 64], strides = [1, 1]} : vector<1x256xf32> to vector<1x64xf32>
    %353 = arith.negf %352 : vector<1x64xf32>
    %354 = math.exp %353 : vector<1x64xf32>
    %cst_117 = arith.constant 1.000000e+00 : f32
    %355 = vector.broadcast %cst_117 : f32 to vector<1x64xf32>
    %356 = arith.addf %355, %354 : vector<1x64xf32>
    %357 = arith.divf %355, %356 : vector<1x64xf32>
    %358 = vector.extract_strided_slice %351 {offsets = [0, 64], sizes = [1, 64], strides = [1, 1]} : vector<1x256xf32> to vector<1x64xf32>
    %359 = arith.negf %358 : vector<1x64xf32>
    %360 = math.exp %359 : vector<1x64xf32>
    %cst_118 = arith.constant 1.000000e+00 : f32
    %361 = vector.broadcast %cst_118 : f32 to vector<1x64xf32>
    %362 = arith.addf %361, %360 : vector<1x64xf32>
    %363 = arith.divf %361, %362 : vector<1x64xf32>
    %364 = vector.extract_strided_slice %351 {offsets = [0, 128], sizes = [1, 64], strides = [1, 1]} : vector<1x256xf32> to vector<1x64xf32>
    %365 = math.tanh %364 : vector<1x64xf32>
    %366 = vector.extract_strided_slice %351 {offsets = [0, 192], sizes = [1, 64], strides = [1, 1]} : vector<1x256xf32> to vector<1x64xf32>
    %367 = arith.negf %366 : vector<1x64xf32>
    %368 = math.exp %367 : vector<1x64xf32>
    %cst_119 = arith.constant 1.000000e+00 : f32
    %369 = vector.broadcast %cst_119 : f32 to vector<1x64xf32>
    %370 = arith.addf %369, %368 : vector<1x64xf32>
    %371 = arith.divf %369, %370 : vector<1x64xf32>
    %372 = arith.mulf %363, %338 : vector<1x64xf32>
    %373 = arith.mulf %357, %365 : vector<1x64xf32>
    %374 = arith.addf %372, %373 : vector<1x64xf32>
    %375 = math.tanh %374 : vector<1x64xf32>
    %376 = arith.mulf %371, %375 : vector<1x64xf32>
    %c1_i32_120 = arith.constant 1 : i32
    %377 = vector.broadcast %c1_i32_120 : i32 to vector<2x64xi32>
    %378 = arith.cmpi eq, %37, %377 : vector<2x64xi32>
    %379 = vector.shape_cast %376 : vector<1x64xf32> to vector<1x64xf32>
    %380 = vector.broadcast %379 : vector<1x64xf32> to vector<2x64xf32>
    %381 = arith.select %378, %380, %345 : vector<2x64xi1>, vector<2x64xf32>
    %382 = arith.truncf %381 : vector<2x64xf32> to vector<2x64xbf16>
    %c0_121 = arith.constant 0 : index
    %c0_122 = arith.constant 0 : index
    %383 = vector.load %arg11[%c0_121, %c0_122] : memref<64x128xbf16, #tpu.memory_space<vmem>>, vector<64x128xbf16>
    %cst_123 = arith.constant dense<0.000000e+00> : vector<2x128xf32>
    %384 = tpu.matmul %382, %383, %cst_123 {dimension_numbers = #tpu.dot_dimension_numbers<[1], [0], [0], [1], [0, 0, 1, 1], [], []>} : vector<2x64xbf16>, vector<64x128xbf16>, vector<2x128xf32> -> vector<2x128xf32>
    %c0_124 = arith.constant 0 : index
    %c0_125 = arith.constant 0 : index
    %385 = vector.load %arg12[%c0_124, %c0_125] : memref<1x128xf32, #tpu.memory_space<vmem>>, vector<1x128xf32>
    %386 = vector.broadcast %385 : vector<1x128xf32> to vector<2x128xf32>
    %387 = arith.addf %384, %386 : vector<2x128xf32>
    %cst_126 = arith.constant dense<0xFF800000> : vector<2xf32>
    %388 = vector.multi_reduction <maximumf>, %387, %cst_126 [1] : vector<2x128xf32> to vector<2xf32>
    %389 = vector.shape_cast %388 : vector<2xf32> to vector<2x1xf32>
    %390 = tpu.iota {dimensions = array<i32: 1>} : vector<2x128xi32>
    %391 = vector.broadcast %389 : vector<2x1xf32> to vector<2x128xf32>
    %392 = arith.cmpf oeq, %387, %391 : vector<2x128xf32>
    %c128_i32_127 = arith.constant 128 : i32
    %393 = vector.broadcast %c128_i32_127 : i32 to vector<2x128xi32>
    %394 = arith.select %392, %390, %393 : vector<2x128xi1>, vector<2x128xi32>
    %cst_128 = arith.constant dense<2147483647> : vector<2xi32>
    %395 = vector.multi_reduction <minsi>, %394, %cst_128 [1] : vector<2x128xi32> to vector<2xi32>
    %396 = vector.shape_cast %395 : vector<2xi32> to vector<2x1xi32>
    %c0_i32_129 = arith.constant 0 : i32
    %397 = vector.broadcast %c0_i32_129 : i32 to vector<1x128xi32>
    %c0_i32_130 = arith.constant 0 : i32
    %398 = vector.broadcast %c0_i32_130 : i32 to vector<1x128xi32>
    %399 = arith.cmpi eq, %36, %398 : vector<1x128xi32>
    %400 = vector.extract_strided_slice %396 {offsets = [0, 0], sizes = [1, 1], strides = [1, 1]} : vector<2x1xi32> to vector<1x1xi32>
    %401 = vector.shape_cast %400 : vector<1x1xi32> to vector<1x1xi32>
    %402 = vector.broadcast %401 : vector<1x1xi32> to vector<1x128xi32>
    %403 = arith.select %399, %402, %397 : vector<1x128xi1>, vector<1x128xi32>
    %c1_i32_131 = arith.constant 1 : i32
    %404 = vector.broadcast %c1_i32_131 : i32 to vector<1x128xi32>
    %405 = arith.cmpi eq, %36, %404 : vector<1x128xi32>
    %406 = vector.extract_strided_slice %396 {offsets = [1, 0], sizes = [1, 1], strides = [1, 1]} : vector<2x1xi32> to vector<1x1xi32>
    %407 = vector.shape_cast %406 : vector<1x1xi32> to vector<1x1xi32>
    %408 = vector.broadcast %407 : vector<1x1xi32> to vector<1x128xi32>
    %409 = arith.select %405, %408, %403 : vector<1x128xi1>, vector<1x128xi32>
    %c0_i32_132 = arith.constant 0 : i32
    %410 = vector.broadcast %c0_i32_132 : i32 to vector<1x128xi32>
    %411 = arith.cmpi eq, %409, %410 : vector<1x128xi32>
    %c2_i32_133 = arith.constant 2 : i32
    %412 = vector.broadcast %c2_i32_133 : i32 to vector<1x128xi32>
    %413 = arith.cmpi slt, %36, %412 : vector<1x128xi32>
    %414 = arith.andi %411, %413 : vector<1x128xi1>
    %415 = arith.extui %414 : vector<1x128xi1> to vector<1x128xi32>
    %416 = arith.maxsi %227, %415 : vector<1x128xi32>
    %cst_134 = arith.constant 0.000000e+00 : f32
    %417 = vector.broadcast %cst_134 : f32 to vector<2x64xf32>
    %418 = vector.extract_strided_slice %31 {offsets = [0, 0], sizes = [1, 256], strides = [1, 1]} : vector<2x256xf32> to vector<1x256xf32>
    %419 = arith.truncf %295 : vector<1x64xf32> to vector<1x64xbf16>
    %c0_135 = arith.constant 0 : index
    %c0_136 = arith.constant 0 : index
    %c0_137 = arith.constant 0 : index
    %420 = vector.load %arg9[%c0_135, %c0_136, %c0_137] : memref<2x64x256xbf16, #tpu.memory_space<vmem>>, vector<1x64x256xbf16>
    %421 = vector.shape_cast %420 : vector<1x64x256xbf16> to vector<64x256xbf16>
    %cst_138 = arith.constant dense<0.000000e+00> : vector<1x256xf32>
    %422 = tpu.matmul %419, %421, %cst_138 {dimension_numbers = #tpu.dot_dimension_numbers<[1], [0], [0], [1], [0, 0, 1, 1], [], []>} : vector<1x64xbf16>, vector<64x256xbf16>, vector<1x256xf32> -> vector<1x256xf32>
    %423 = arith.addf %418, %422 : vector<1x256xf32>
    %424 = vector.extract_strided_slice %423 {offsets = [0, 0], sizes = [1, 64], strides = [1, 1]} : vector<1x256xf32> to vector<1x64xf32>
    %425 = arith.negf %424 : vector<1x64xf32>
    %426 = math.exp %425 : vector<1x64xf32>
    %cst_139 = arith.constant 1.000000e+00 : f32
    %427 = vector.broadcast %cst_139 : f32 to vector<1x64xf32>
    %428 = arith.addf %427, %426 : vector<1x64xf32>
    %429 = arith.divf %427, %428 : vector<1x64xf32>
    %430 = vector.extract_strided_slice %423 {offsets = [0, 64], sizes = [1, 64], strides = [1, 1]} : vector<1x256xf32> to vector<1x64xf32>
    %431 = arith.negf %430 : vector<1x64xf32>
    %432 = math.exp %431 : vector<1x64xf32>
    %cst_140 = arith.constant 1.000000e+00 : f32
    %433 = vector.broadcast %cst_140 : f32 to vector<1x64xf32>
    %434 = arith.addf %433, %432 : vector<1x64xf32>
    %435 = arith.divf %433, %434 : vector<1x64xf32>
    %436 = vector.extract_strided_slice %423 {offsets = [0, 128], sizes = [1, 64], strides = [1, 1]} : vector<1x256xf32> to vector<1x64xf32>
    %437 = math.tanh %436 : vector<1x64xf32>
    %438 = vector.extract_strided_slice %423 {offsets = [0, 192], sizes = [1, 64], strides = [1, 1]} : vector<1x256xf32> to vector<1x64xf32>
    %439 = arith.negf %438 : vector<1x64xf32>
    %440 = math.exp %439 : vector<1x64xf32>
    %cst_141 = arith.constant 1.000000e+00 : f32
    %441 = vector.broadcast %cst_141 : f32 to vector<1x64xf32>
    %442 = arith.addf %441, %440 : vector<1x64xf32>
    %443 = arith.divf %441, %442 : vector<1x64xf32>
    %444 = arith.mulf %435, %293 : vector<1x64xf32>
    %445 = arith.mulf %429, %437 : vector<1x64xf32>
    %446 = arith.addf %444, %445 : vector<1x64xf32>
    %447 = math.tanh %446 : vector<1x64xf32>
    %448 = arith.mulf %443, %447 : vector<1x64xf32>
    %c0_i32_142 = arith.constant 0 : i32
    %449 = vector.broadcast %c0_i32_142 : i32 to vector<2x64xi32>
    %450 = arith.cmpi eq, %37, %449 : vector<2x64xi32>
    %451 = vector.shape_cast %448 : vector<1x64xf32> to vector<1x64xf32>
    %452 = vector.broadcast %451 : vector<1x64xf32> to vector<2x64xf32>
    %453 = arith.select %450, %452, %417 : vector<2x64xi1>, vector<2x64xf32>
    %454 = vector.extract_strided_slice %31 {offsets = [1, 0], sizes = [1, 256], strides = [1, 1]} : vector<2x256xf32> to vector<1x256xf32>
    %455 = arith.truncf %448 : vector<1x64xf32> to vector<1x64xbf16>
    %c0_143 = arith.constant 0 : index
    %c0_144 = arith.constant 0 : index
    %c0_145 = arith.constant 0 : index
    %456 = vector.load %arg9[%c0_143, %c0_144, %c0_145] : memref<2x64x256xbf16, #tpu.memory_space<vmem>>, vector<1x64x256xbf16>
    %457 = vector.shape_cast %456 : vector<1x64x256xbf16> to vector<64x256xbf16>
    %cst_146 = arith.constant dense<0.000000e+00> : vector<1x256xf32>
    %458 = tpu.matmul %455, %457, %cst_146 {dimension_numbers = #tpu.dot_dimension_numbers<[1], [0], [0], [1], [0, 0, 1, 1], [], []>} : vector<1x64xbf16>, vector<64x256xbf16>, vector<1x256xf32> -> vector<1x256xf32>
    %459 = arith.addf %454, %458 : vector<1x256xf32>
    %460 = vector.extract_strided_slice %459 {offsets = [0, 0], sizes = [1, 64], strides = [1, 1]} : vector<1x256xf32> to vector<1x64xf32>
    %461 = arith.negf %460 : vector<1x64xf32>
    %462 = math.exp %461 : vector<1x64xf32>
    %cst_147 = arith.constant 1.000000e+00 : f32
    %463 = vector.broadcast %cst_147 : f32 to vector<1x64xf32>
    %464 = arith.addf %463, %462 : vector<1x64xf32>
    %465 = arith.divf %463, %464 : vector<1x64xf32>
    %466 = vector.extract_strided_slice %459 {offsets = [0, 64], sizes = [1, 64], strides = [1, 1]} : vector<1x256xf32> to vector<1x64xf32>
    %467 = arith.negf %466 : vector<1x64xf32>
    %468 = math.exp %467 : vector<1x64xf32>
    %cst_148 = arith.constant 1.000000e+00 : f32
    %469 = vector.broadcast %cst_148 : f32 to vector<1x64xf32>
    %470 = arith.addf %469, %468 : vector<1x64xf32>
    %471 = arith.divf %469, %470 : vector<1x64xf32>
    %472 = vector.extract_strided_slice %459 {offsets = [0, 128], sizes = [1, 64], strides = [1, 1]} : vector<1x256xf32> to vector<1x64xf32>
    %473 = math.tanh %472 : vector<1x64xf32>
    %474 = vector.extract_strided_slice %459 {offsets = [0, 192], sizes = [1, 64], strides = [1, 1]} : vector<1x256xf32> to vector<1x64xf32>
    %475 = arith.negf %474 : vector<1x64xf32>
    %476 = math.exp %475 : vector<1x64xf32>
    %cst_149 = arith.constant 1.000000e+00 : f32
    %477 = vector.broadcast %cst_149 : f32 to vector<1x64xf32>
    %478 = arith.addf %477, %476 : vector<1x64xf32>
    %479 = arith.divf %477, %478 : vector<1x64xf32>
    %480 = arith.mulf %471, %446 : vector<1x64xf32>
    %481 = arith.mulf %465, %473 : vector<1x64xf32>
    %482 = arith.addf %480, %481 : vector<1x64xf32>
    %483 = math.tanh %482 : vector<1x64xf32>
    %484 = arith.mulf %479, %483 : vector<1x64xf32>
    %c1_i32_150 = arith.constant 1 : i32
    %485 = vector.broadcast %c1_i32_150 : i32 to vector<2x64xi32>
    %486 = arith.cmpi eq, %37, %485 : vector<2x64xi32>
    %487 = vector.shape_cast %484 : vector<1x64xf32> to vector<1x64xf32>
    %488 = vector.broadcast %487 : vector<1x64xf32> to vector<2x64xf32>
    %489 = arith.select %486, %488, %453 : vector<2x64xi1>, vector<2x64xf32>
    %490 = arith.truncf %489 : vector<2x64xf32> to vector<2x64xbf16>
    %c1_151 = arith.constant 1 : index
    %c0_152 = arith.constant 0 : index
    %c0_153 = arith.constant 0 : index
    %491 = vector.load %arg8[%c1_151, %c0_152, %c0_153] : memref<2x64x256xbf16, #tpu.memory_space<vmem>>, vector<1x64x256xbf16>
    %492 = vector.shape_cast %491 : vector<1x64x256xbf16> to vector<64x256xbf16>
    %cst_154 = arith.constant dense<0.000000e+00> : vector<2x256xf32>
    %493 = tpu.matmul %490, %492, %cst_154 {dimension_numbers = #tpu.dot_dimension_numbers<[1], [0], [0], [1], [0, 0, 1, 1], [], []>} : vector<2x64xbf16>, vector<64x256xbf16>, vector<2x256xf32> -> vector<2x256xf32>
    %c1_155 = arith.constant 1 : index
    %c0_156 = arith.constant 0 : index
    %c0_157 = arith.constant 0 : index
    %494 = vector.load %arg10[%c1_155, %c0_156, %c0_157] : memref<2x1x256xf32, #tpu.memory_space<vmem>>, vector<1x1x256xf32>
    %495 = vector.shape_cast %494 : vector<1x1x256xf32> to vector<1x256xf32>
    %496 = vector.broadcast %495 : vector<1x256xf32> to vector<2x256xf32>
    %497 = arith.addf %493, %496 : vector<2x256xf32>
    %cst_158 = arith.constant 0.000000e+00 : f32
    %498 = vector.broadcast %cst_158 : f32 to vector<2x64xf32>
    %499 = vector.extract_strided_slice %497 {offsets = [0, 0], sizes = [1, 256], strides = [1, 1]} : vector<2x256xf32> to vector<1x256xf32>
    %500 = arith.truncf %376 : vector<1x64xf32> to vector<1x64xbf16>
    %c1_159 = arith.constant 1 : index
    %c0_160 = arith.constant 0 : index
    %c0_161 = arith.constant 0 : index
    %501 = vector.load %arg9[%c1_159, %c0_160, %c0_161] : memref<2x64x256xbf16, #tpu.memory_space<vmem>>, vector<1x64x256xbf16>
    %502 = vector.shape_cast %501 : vector<1x64x256xbf16> to vector<64x256xbf16>
    %cst_162 = arith.constant dense<0.000000e+00> : vector<1x256xf32>
    %503 = tpu.matmul %500, %502, %cst_162 {dimension_numbers = #tpu.dot_dimension_numbers<[1], [0], [0], [1], [0, 0, 1, 1], [], []>} : vector<1x64xbf16>, vector<64x256xbf16>, vector<1x256xf32> -> vector<1x256xf32>
    %504 = arith.addf %499, %503 : vector<1x256xf32>
    %505 = vector.extract_strided_slice %504 {offsets = [0, 0], sizes = [1, 64], strides = [1, 1]} : vector<1x256xf32> to vector<1x64xf32>
    %506 = arith.negf %505 : vector<1x64xf32>
    %507 = math.exp %506 : vector<1x64xf32>
    %cst_163 = arith.constant 1.000000e+00 : f32
    %508 = vector.broadcast %cst_163 : f32 to vector<1x64xf32>
    %509 = arith.addf %508, %507 : vector<1x64xf32>
    %510 = arith.divf %508, %509 : vector<1x64xf32>
    %511 = vector.extract_strided_slice %504 {offsets = [0, 64], sizes = [1, 64], strides = [1, 1]} : vector<1x256xf32> to vector<1x64xf32>
    %512 = arith.negf %511 : vector<1x64xf32>
    %513 = math.exp %512 : vector<1x64xf32>
    %cst_164 = arith.constant 1.000000e+00 : f32
    %514 = vector.broadcast %cst_164 : f32 to vector<1x64xf32>
    %515 = arith.addf %514, %513 : vector<1x64xf32>
    %516 = arith.divf %514, %515 : vector<1x64xf32>
    %517 = vector.extract_strided_slice %504 {offsets = [0, 128], sizes = [1, 64], strides = [1, 1]} : vector<1x256xf32> to vector<1x64xf32>
    %518 = math.tanh %517 : vector<1x64xf32>
    %519 = vector.extract_strided_slice %504 {offsets = [0, 192], sizes = [1, 64], strides = [1, 1]} : vector<1x256xf32> to vector<1x64xf32>
    %520 = arith.negf %519 : vector<1x64xf32>
    %521 = math.exp %520 : vector<1x64xf32>
    %cst_165 = arith.constant 1.000000e+00 : f32
    %522 = vector.broadcast %cst_165 : f32 to vector<1x64xf32>
    %523 = arith.addf %522, %521 : vector<1x64xf32>
    %524 = arith.divf %522, %523 : vector<1x64xf32>
    %525 = arith.mulf %516, %374 : vector<1x64xf32>
    %526 = arith.mulf %510, %518 : vector<1x64xf32>
    %527 = arith.addf %525, %526 : vector<1x64xf32>
    %528 = math.tanh %527 : vector<1x64xf32>
    %529 = arith.mulf %524, %528 : vector<1x64xf32>
    %c0_i32_166 = arith.constant 0 : i32
    %530 = vector.broadcast %c0_i32_166 : i32 to vector<2x64xi32>
    %531 = arith.cmpi eq, %37, %530 : vector<2x64xi32>
    %532 = vector.shape_cast %529 : vector<1x64xf32> to vector<1x64xf32>
    %533 = vector.broadcast %532 : vector<1x64xf32> to vector<2x64xf32>
    %534 = arith.select %531, %533, %498 : vector<2x64xi1>, vector<2x64xf32>
    %535 = vector.extract_strided_slice %497 {offsets = [1, 0], sizes = [1, 256], strides = [1, 1]} : vector<2x256xf32> to vector<1x256xf32>
    %536 = arith.truncf %529 : vector<1x64xf32> to vector<1x64xbf16>
    %c1_167 = arith.constant 1 : index
    %c0_168 = arith.constant 0 : index
    %c0_169 = arith.constant 0 : index
    %537 = vector.load %arg9[%c1_167, %c0_168, %c0_169] : memref<2x64x256xbf16, #tpu.memory_space<vmem>>, vector<1x64x256xbf16>
    %538 = vector.shape_cast %537 : vector<1x64x256xbf16> to vector<64x256xbf16>
    %cst_170 = arith.constant dense<0.000000e+00> : vector<1x256xf32>
    %539 = tpu.matmul %536, %538, %cst_170 {dimension_numbers = #tpu.dot_dimension_numbers<[1], [0], [0], [1], [0, 0, 1, 1], [], []>} : vector<1x64xbf16>, vector<64x256xbf16>, vector<1x256xf32> -> vector<1x256xf32>
    %540 = arith.addf %535, %539 : vector<1x256xf32>
    %541 = vector.extract_strided_slice %540 {offsets = [0, 0], sizes = [1, 64], strides = [1, 1]} : vector<1x256xf32> to vector<1x64xf32>
    %542 = arith.negf %541 : vector<1x64xf32>
    %543 = math.exp %542 : vector<1x64xf32>
    %cst_171 = arith.constant 1.000000e+00 : f32
    %544 = vector.broadcast %cst_171 : f32 to vector<1x64xf32>
    %545 = arith.addf %544, %543 : vector<1x64xf32>
    %546 = arith.divf %544, %545 : vector<1x64xf32>
    %547 = vector.extract_strided_slice %540 {offsets = [0, 64], sizes = [1, 64], strides = [1, 1]} : vector<1x256xf32> to vector<1x64xf32>
    %548 = arith.negf %547 : vector<1x64xf32>
    %549 = math.exp %548 : vector<1x64xf32>
    %cst_172 = arith.constant 1.000000e+00 : f32
    %550 = vector.broadcast %cst_172 : f32 to vector<1x64xf32>
    %551 = arith.addf %550, %549 : vector<1x64xf32>
    %552 = arith.divf %550, %551 : vector<1x64xf32>
    %553 = vector.extract_strided_slice %540 {offsets = [0, 128], sizes = [1, 64], strides = [1, 1]} : vector<1x256xf32> to vector<1x64xf32>
    %554 = math.tanh %553 : vector<1x64xf32>
    %555 = vector.extract_strided_slice %540 {offsets = [0, 192], sizes = [1, 64], strides = [1, 1]} : vector<1x256xf32> to vector<1x64xf32>
    %556 = arith.negf %555 : vector<1x64xf32>
    %557 = math.exp %556 : vector<1x64xf32>
    %cst_173 = arith.constant 1.000000e+00 : f32
    %558 = vector.broadcast %cst_173 : f32 to vector<1x64xf32>
    %559 = arith.addf %558, %557 : vector<1x64xf32>
    %560 = arith.divf %558, %559 : vector<1x64xf32>
    %561 = arith.mulf %552, %527 : vector<1x64xf32>
    %562 = arith.mulf %546, %554 : vector<1x64xf32>
    %563 = arith.addf %561, %562 : vector<1x64xf32>
    %564 = math.tanh %563 : vector<1x64xf32>
    %565 = arith.mulf %560, %564 : vector<1x64xf32>
    %c1_i32_174 = arith.constant 1 : i32
    %566 = vector.broadcast %c1_i32_174 : i32 to vector<2x64xi32>
    %567 = arith.cmpi eq, %37, %566 : vector<2x64xi32>
    %568 = vector.shape_cast %565 : vector<1x64xf32> to vector<1x64xf32>
    %569 = vector.broadcast %568 : vector<1x64xf32> to vector<2x64xf32>
    %570 = arith.select %567, %569, %534 : vector<2x64xi1>, vector<2x64xf32>
    %571 = arith.truncf %570 : vector<2x64xf32> to vector<2x64xbf16>
    %c0_175 = arith.constant 0 : index
    %c0_176 = arith.constant 0 : index
    %572 = vector.load %arg11[%c0_175, %c0_176] : memref<64x128xbf16, #tpu.memory_space<vmem>>, vector<64x128xbf16>
    %cst_177 = arith.constant dense<0.000000e+00> : vector<2x128xf32>
    %573 = tpu.matmul %571, %572, %cst_177 {dimension_numbers = #tpu.dot_dimension_numbers<[1], [0], [0], [1], [0, 0, 1, 1], [], []>} : vector<2x64xbf16>, vector<64x128xbf16>, vector<2x128xf32> -> vector<2x128xf32>
    %c0_178 = arith.constant 0 : index
    %c0_179 = arith.constant 0 : index
    %574 = vector.load %arg12[%c0_178, %c0_179] : memref<1x128xf32, #tpu.memory_space<vmem>>, vector<1x128xf32>
    %575 = vector.broadcast %574 : vector<1x128xf32> to vector<2x128xf32>
    %576 = arith.addf %573, %575 : vector<2x128xf32>
    %cst_180 = arith.constant dense<0xFF800000> : vector<2xf32>
    %577 = vector.multi_reduction <maximumf>, %576, %cst_180 [1] : vector<2x128xf32> to vector<2xf32>
    %578 = vector.shape_cast %577 : vector<2xf32> to vector<2x1xf32>
    %579 = tpu.iota {dimensions = array<i32: 1>} : vector<2x128xi32>
    %580 = vector.broadcast %578 : vector<2x1xf32> to vector<2x128xf32>
    %581 = arith.cmpf oeq, %576, %580 : vector<2x128xf32>
    %c128_i32_181 = arith.constant 128 : i32
    %582 = vector.broadcast %c128_i32_181 : i32 to vector<2x128xi32>
    %583 = arith.select %581, %579, %582 : vector<2x128xi1>, vector<2x128xi32>
    %cst_182 = arith.constant dense<2147483647> : vector<2xi32>
    %584 = vector.multi_reduction <minsi>, %583, %cst_182 [1] : vector<2x128xi32> to vector<2xi32>
    %585 = vector.shape_cast %584 : vector<2xi32> to vector<2x1xi32>
    %c0_i32_183 = arith.constant 0 : i32
    %586 = vector.broadcast %c0_i32_183 : i32 to vector<1x128xi32>
    %c0_i32_184 = arith.constant 0 : i32
    %587 = vector.broadcast %c0_i32_184 : i32 to vector<1x128xi32>
    %588 = arith.cmpi eq, %36, %587 : vector<1x128xi32>
    %589 = vector.extract_strided_slice %585 {offsets = [0, 0], sizes = [1, 1], strides = [1, 1]} : vector<2x1xi32> to vector<1x1xi32>
    %590 = vector.shape_cast %589 : vector<1x1xi32> to vector<1x1xi32>
    %591 = vector.broadcast %590 : vector<1x1xi32> to vector<1x128xi32>
    %592 = arith.select %588, %591, %586 : vector<1x128xi1>, vector<1x128xi32>
    %c1_i32_185 = arith.constant 1 : i32
    %593 = vector.broadcast %c1_i32_185 : i32 to vector<1x128xi32>
    %594 = arith.cmpi eq, %36, %593 : vector<1x128xi32>
    %595 = vector.extract_strided_slice %585 {offsets = [1, 0], sizes = [1, 1], strides = [1, 1]} : vector<2x1xi32> to vector<1x1xi32>
    %596 = vector.shape_cast %595 : vector<1x1xi32> to vector<1x1xi32>
    %597 = vector.broadcast %596 : vector<1x1xi32> to vector<1x128xi32>
    %598 = arith.select %594, %597, %592 : vector<1x128xi1>, vector<1x128xi32>
    %c0_i32_186 = arith.constant 0 : i32
    %599 = vector.broadcast %c0_i32_186 : i32 to vector<1x128xi32>
    %600 = arith.cmpi eq, %598, %599 : vector<1x128xi32>
    %c2_i32_187 = arith.constant 2 : i32
    %601 = vector.broadcast %c2_i32_187 : i32 to vector<1x128xi32>
    %602 = arith.cmpi slt, %36, %601 : vector<1x128xi32>
    %603 = arith.andi %600, %602 : vector<1x128xi1>
    %604 = arith.extui %603 : vector<1x128xi1> to vector<1x128xi32>
    %605 = arith.maxsi %416, %604 : vector<1x128xi32>
    %606 = tpu.iota {dimensions = array<i32: 0>} : vector<8x128xi32>
    %c0_i32_188 = arith.constant 0 : i32
    %607 = vector.broadcast %c0_i32_188 : i32 to vector<8x128xi32>
    %c0_i32_189 = arith.constant 0 : i32
    %608 = vector.broadcast %c0_i32_189 : i32 to vector<8x128xi32>
    %609 = arith.cmpi eq, %606, %608 : vector<8x128xi32>
    %610 = vector.shape_cast %220 : vector<1x128xi32> to vector<1x128xi32>
    %611 = vector.broadcast %610 : vector<1x128xi32> to vector<8x128xi32>
    %612 = arith.select %609, %611, %607 : vector<8x128xi1>, vector<8x128xi32>
    %c1_i32_190 = arith.constant 1 : i32
    %613 = vector.broadcast %c1_i32_190 : i32 to vector<8x128xi32>
    %614 = arith.cmpi eq, %606, %613 : vector<8x128xi32>
    %615 = vector.shape_cast %409 : vector<1x128xi32> to vector<1x128xi32>
    %616 = vector.broadcast %615 : vector<1x128xi32> to vector<8x128xi32>
    %617 = arith.select %614, %616, %612 : vector<8x128xi1>, vector<8x128xi32>
    %c2_i32_191 = arith.constant 2 : i32
    %618 = vector.broadcast %c2_i32_191 : i32 to vector<8x128xi32>
    %619 = arith.cmpi eq, %606, %618 : vector<8x128xi32>
    %620 = vector.shape_cast %598 : vector<1x128xi32> to vector<1x128xi32>
    %621 = vector.broadcast %620 : vector<1x128xi32> to vector<8x128xi32>
    %622 = arith.select %619, %621, %617 : vector<8x128xi1>, vector<8x128xi32>
    %c3_i32 = arith.constant 3 : i32
    %623 = vector.broadcast %c3_i32 : i32 to vector<8x128xi32>
    %624 = arith.cmpi eq, %606, %623 : vector<8x128xi32>
    %625 = vector.shape_cast %605 : vector<1x128xi32> to vector<1x128xi32>
    %626 = vector.broadcast %625 : vector<1x128xi32> to vector<8x128xi32>
    %627 = arith.select %624, %626, %622 : vector<8x128xi1>, vector<8x128xi32>
    %c0_192 = arith.constant 0 : index
    %c0_193 = arith.constant 0 : index
    %628 = vector.load %arg13[%c0_192, %c0_193] : memref<8x128xi32, #tpu.memory_space<vmem>>, vector<8x128xi32>
    tpu.vector_store %arg13[%c0_192, %c0_193], %627 {strides = array<i32>} : memref<8x128xi32, #tpu.memory_space<vmem>>, vector<8x128xi32>,
    %cst_194 = arith.constant 0.000000e+00 : f32
    %629 = vector.broadcast %cst_194 : f32 to vector<8x128xf32>
    %c0_195 = arith.constant 0 : index
    %c0_196 = arith.constant 0 : index
    %630 = vector.load %arg14[%c0_195, %c0_196] : memref<8x128xf32, #tpu.memory_space<vmem>>, vector<8x128xf32>
    tpu.vector_store %arg14[%c0_195, %c0_196], %629 {strides = array<i32>} : memref<8x128xf32, #tpu.memory_space<vmem>>, vector<8x128xf32>,
    %c0_197 = arith.constant 0 : index
    %c0_198 = arith.constant 0 : index
    %631 = vector.load %arg14[%c0_197, %c0_198] : memref<8x128xf32, #tpu.memory_space<vmem>>, vector<1x64xf32>
    tpu.vector_store %arg14[%c0_197, %c0_198], %484 {strides = array<i32>} : memref<8x128xf32, #tpu.memory_space<vmem>>, vector<1x64xf32>,
    %c2 = arith.constant 2 : index
    %c0_199 = arith.constant 0 : index
    %632 = vector.load %arg14[%c2, %c0_199] : memref<8x128xf32, #tpu.memory_space<vmem>>, vector<1x64xf32>
    tpu.vector_store %arg14[%c2, %c0_199], %482 {strides = array<i32>} : memref<8x128xf32, #tpu.memory_space<vmem>>, vector<1x64xf32>,
    %c1_200 = arith.constant 1 : index
    %c0_201 = arith.constant 0 : index
    %633 = vector.load %arg14[%c1_200, %c0_201] : memref<8x128xf32, #tpu.memory_space<vmem>>, vector<1x64xf32>
    tpu.vector_store %arg14[%c1_200, %c0_201], %565 {strides = array<i32>} : memref<8x128xf32, #tpu.memory_space<vmem>>, vector<1x64xf32>,
    %c3 = arith.constant 3 : index
    %c0_202 = arith.constant 0 : index
    %634 = vector.load %arg14[%c3, %c0_202] : memref<8x128xf32, #tpu.memory_space<vmem>>, vector<1x64xf32>
    tpu.vector_store %arg14[%c3, %c0_202], %563 {strides = array<i32>} : memref<8x128xf32, #tpu.memory_space<vmem>>, vector<1x64xf32>,
    return
  }
}

</mosaic_0001>

<bundles_post_ra>
// kernel: _forward_device.1
= control target key start
LH: loop header
LB: loop body
LE: loop exit
PB: predicated region body
PF: predicated region fallthrough
CT: control target
= control target key end

     0   :  { %20 = vsyncpa [#allocation3], 0  ;;  %s7209_s0 = inlined_call_operand.vmem [shape: bf16[2,768], index: 0, kind: input, shape index: {}]   ;;  %s7210_s1 = inlined_call_operand.vmem [shape: f32[2,64], index: 1, kind: input, shape index: {}]   ;;  %s7211_s2 = inlined_call_operand.hbm [shape: bf16[768,512], index: 2, kind: input, shape index: {}]   ;;  %s7212_s3 = inlined_call_operand.vmem [shape: f32[1,512], index: 3, kind: input, shape index: {}]   ;;  %s7213_s4 = inlined_call_operand.vmem [shape: bf16[512,512], index: 4, kind: input, shape index: {}]   ;;  %s7214_s5 = inlined_call_operand.vmem [shape: f32[1,512], index: 5, kind: input, shape index: {}]   ;;  %s7215_s6 = inlined_call_operand.vmem [shape: bf16[512,64], index: 6, kind: input, shape index: {}]   ;;  %s7216_s7 = inlined_call_operand.vmem [shape: f32[1,64], index: 7, kind: input, shape index: {}]   ;;  %s7217_s8 = inlined_call_operand.hbm [shape: bf16[2,64,256], index: 8, kind: input, shape index: {}]   ;;  %s7218_s9 = inlined_call_operand.hbm [shape: bf16[2,64,256], index: 9, kind: input, shape index: {}]   ;;  %s7219_s10 = inlined_call_operand.vmem [shape: f32[2,1,256], index: 10, kind: input, shape index: {}]   ;;  %s7220_s11 = inlined_call_operand.hbm [shape: bf16[64,128], index: 11, kind: input, shape index: {}]   ;;  %s7221_s12 = inlined_call_operand.hbm [shape: f32[1,128], index: 12, kind: input, shape index: {}]   ;;  %s7222_s13 = inlined_call_operand.hbm [shape: s32[8,128], index: 13, kind: output, shape index: {0}]   ;;  %s7223_s14 = inlined_call_operand.hbm [shape: f32[8,128], index: 14, kind: output, shape index: {1}]  }
   0x1   :  { %21 = vsyncpa [#allocation6], 0 }
   0x2   :  { %22 = vsyncpa [#allocation9], 0 }
   0x3   :  { %23 = vsyncpa [#allocation4], 0 }
   0x4   :  { %24 = vsyncpa [#allocation13], 0  ;;  %s6060_s29 = smov [#allocation5]  }
   0x5   :  { %s56_s30 = sshll.u32 %s6060_s29, 4  ;;  %s57_s30 = int_to_ptr.vmem [resolvable:$true] %s56_s30 }
   0x6   :  { %s5918_s15 = scalar_lea.vmem %s57_s30, 2048  ;;  %p5923_p1 = scmp.lt.s32.totalorder %s57_s30, %s57_s30 }
   0x7   :  { %p5919_p0 = scmp.ne.s32.totalorder %s57_s30, %s5918_s15  ;;  %p5924_p2 = scmp.lt.s32.totalorder %s5918_s15, %s5918_s15 }
   0x9   :  { %p5925_p3 = por %p5924_p2, %p5923_p1 }
   0xb   :  { %p5926_p4 = pnand %p5925_p3, %p5919_p0 }
   0xd   :  { %5929 = shalt.err (!%p5926_p4)
}
   0xe   :  { %s6061_s16 = smov 128   ;;  %s6062_s17 = smov 8  }
   0xf   :  { %62 = dma.hbm_to_vmem [thread:$0]  %s7217_s8, 2048, %s57_s30, [#allocation6], %s6061_s16, %s6061_s16, %s6062_s17  }
  0x10   :  { %s6063_s20 = smov [#allocation8]  }
  0x11   :  { %s82_s21 = sshll.u32 %s6063_s20, 4  ;;  %s83_s21 = int_to_ptr.vmem [resolvable:$true] %s82_s21 }
  0x12   :  { %s5938_s22 = scalar_lea.vmem %s83_s21, 512  ;;  %p5943_p6 = scmp.lt.s32.totalorder %s83_s21, %s83_s21 }
  0x13   :  { %p5939_p5 = scmp.ne.s32.totalorder %s83_s21, %s5938_s22  ;;  %p5944_p7 = scmp.lt.s32.totalorder %s5938_s22, %s5938_s22 }
  0x15   :  { %p5945_p8 = por %p5944_p7, %p5943_p6 }
  0x17   :  { %p5946_p9 = pnand %p5945_p8, %p5939_p5 }
  0x19   :  { %5949 = shalt.err (!%p5946_p9)
}
  0x1a   :  { %s6064_s23 = smov 64   ;;  %s6065_s24 = smov 4  }
  0x1b   :  { %88 = dma.hbm_to_vmem [thread:$0]  %s7220_s11, 512, %s83_s21, [#allocation9], %s6064_s23, %s6064_s23, %s6065_s24  }
  0x1c   :  { %s6066_s27 = smov [#allocation2]  }
  0x1d   :  { %s34_s8 = sshll.u32 %s6066_s27, 4  ;;  %s35_s8 = int_to_ptr.vmem [resolvable:$true] %s34_s8 }
  0x1e   :  { %s5958_s28 = scalar_lea.vmem %s35_s8, 24576  ;;  %p5963_p11 = scmp.lt.s32.totalorder %s35_s8, %s35_s8 }
  0x1f   :  { %p5959_p10 = scmp.ne.s32.totalorder %s35_s8, %s5958_s28  ;;  %p5964_p12 = scmp.lt.s32.totalorder %s5958_s28, %s5958_s28 }
  0x21   :  { %p5965_p13 = por %p5964_p12, %p5963_p11 }
  0x23   :  { %p5966_p0 = pnand %p5965_p13, %p5959_p10 }
  0x25   :  { %5969 = shalt.err (!%p5966_p0)
}
  0x26   :  { %s6067_s29 = smov 256   ;;  %s6068_s30 = smov 16  }
  0x27   :  { %40 = dma.hbm_to_vmem [thread:$0]  %s7211_s2, 24576, %s35_s8, [#allocation3], %s6067_s29, %s6067_s29, %s6068_s30  }
  0x28   :  { %s6069_s19 = smov [#allocation7]   ;;  %s6070_s11 = smov [#allocation10]  }
  0x29   :  { %s68_s20 = sshll.u32 %s6069_s19, 4  ;;  %s95_s21 = sshll.u32 %s6070_s11, 4  ;;  %s69_s20 = int_to_ptr.vmem [resolvable:$true] %s68_s20  ;;  %s96_s21 = int_to_ptr.vmem [resolvable:$true] %s95_s21 }
  0x2a   :  { %s5978_s22 = scalar_lea.vmem %s69_s20, 2048  ;;  %p5983_p2 = scmp.lt.s32.totalorder %s69_s20, %s69_s20 }
  0x2b   :  { %p5979_p1 = scmp.ne.s32.totalorder %s69_s20, %s5978_s22  ;;  %p5984_p3 = scmp.lt.s32.totalorder %s5978_s22, %s5978_s22 }
  0x2d   :  { %p5985_p4 = por %p5984_p3, %p5983_p2 }
  0x2f   :  { %p5986_p5 = pnand %p5985_p4, %p5979_p1 }
  0x31   :  { %5989 = shalt.err (!%p5986_p5)
}
  0x32   :  { %74 = dma.hbm_to_vmem [thread:$0]  %s7218_s9, 2048, %s69_s20, [#allocation6], %s6061_s16, %s6061_s16, %s6062_s17  }
  0x33   :  { %s5998_s2 = scalar_lea.vmem %s96_s21, 16  ;;  %s6002_s26 = scalar_lea.vmem %s96_s21, 32 }
  0x34   :  { %p5999_p6 = scmp.ne.s32.totalorder %s96_s21, %s5998_s2  ;;  %p6003_p7 = scmp.lt.s32.totalorder %s96_s21, %s96_s21 }
  0x35   :  { %p6004_p8 = scmp.lt.s32.totalorder %s6002_s26, %s5998_s2 }
  0x37   :  { %p6005_p9 = por %p6004_p8, %p6003_p7 }
  0x39   :  { %p6006_p10 = pnand %p6005_p9, %p5999_p6 }
  0x3b   :  { %6009 = shalt.err (!%p6006_p10)
}
  0x3c   :  { %98 = dma.hbm_to_vmem [thread:$0]  %s7221_s12, 16, %s96_s21, [#allocation9]  }
  0x3d   :  { %6050 = dma.done.wait [#allocation3], 24576  }
  0x3e   :  { %6051 = vsyncadd [#allocation3], 4294942720 }
  0x3f   :  { %6052 = dma.done.wait [#allocation6], 4096  }
  0x40   :  { %6053 = vsyncadd [#allocation6], 4294963200 }
  0x41   :  { %6054 = dma.done.wait [#allocation9], 528  }
  0x42   :  { %6055 = vsyncadd [#allocation9], 4294966768  ;;  %v5194_v0 = vld [vmem:[#allocation2 + $0xe4] ss:$16 sps:$4 sm:$0xff]   ;;  %v5198_v2 = vld [vmem:[#allocation2 + $0xe0] ss:$16 sps:$4 sm:$0xff]   ;;  %v310_v36 = vlaneseq }
  0x43   :  { %v5196_v1 = vld [vmem:[#allocation2 + $0x2e4] ss:$16 sps:$4 sm:$0xff]   ;;  %1344 = vmatprep.subr.bf16.mxu0 %v5194_v0  ;;  %v5199_v3 = vld [vmem:[#allocation2 + $0x2e0] ss:$16 sps:$4 sm:$0xff]   ;;  %v6071_v37 = vmov 1966171168  }
  0x44   :  { %1385 = vmatprep.subr.bf16.mxu1 %v5196_v1  ;;  %v5200_v4 = vld [vmem:[#allocation2 + $0xc4] ss:$16 sps:$4 sm:$0xff]   ;;  %1345 = vmatpush1.bf16.msra.mxu0 %v5198_v2  ;;  %v5204_v6 = vld [vmem:[#allocation2 + $0xc0] ss:$16 sps:$4 sm:$0xff]   ;;  %v333_v38 = vunpack.c.l.s4 %v6071_v37  ;;  %v6176_v42 = vshrl.u32 %v310_v36, 7  ;;  %vm2966_vm0 = vcmask 523264  }
  0x45   :  { %1386 = vmatpush1.bf16.msra.mxu1 %v5199_v3  ;;  %v5202_v5 = vld [vmem:[#allocation2 + $0x2c4] ss:$16 sps:$4 sm:$0xff]   ;;  %1346 = vmatprep.subr.bf16.mxu0 %v5200_v4  ;;  %v5205_v7 = vld [vmem:[#allocation2 + $0x2c0] ss:$16 sps:$4 sm:$0xff]   ;;  %vm6074_vm3 = vmmov 0   ;;  %vm3625_vm4 = vcmask 1041408  }
  0x46   :  { %1387 = vmatprep.subr.bf16.mxu1 %v5202_v5  ;;  %v5206_v8 = vld [vmem:[#allocation2 + $0xa4] ss:$16 sps:$4 sm:$0xff]   ;;  %v5210_v10 = vld [vmem:[#allocation2 + $0xa0] ss:$16 sps:$4 sm:$0xff]   ;;  %v334_v43 = vunpack.c.0.s8 %v333_v38  ;;  %v5317_v38 = vld [vmem:[#allocation2 + $0x68] ss:$16 sps:$4 sm:$0xff]  }
  0x47   :  { %v5208_v9 = vld [vmem:[#allocation2 + $0x2a4] ss:$16 sps:$4 sm:$0xff]   ;;  %v5211_v11 = vld [vmem:[#allocation2 + $0x2a0] ss:$16 sps:$4 sm:$0xff]   ;;  %vm3131_vm1 = vcmp.eq.s32.totalorder %v6176_v42, 0  ;;  %vm3218_vm2 = vcmp.eq.s32.totalorder %v6176_v42, 1 }
  0x48   :  { %1347 = vmatpush1.bf16.msra.mxu0 %v5204_v6  ;;  %v5212_v12 = vld [vmem:[#allocation2 + $0x84] ss:$16 sps:$4 sm:$0xff]   ;;  %v5216_v14 = vld [vmem:[#allocation2 + $0x80] ss:$16 sps:$4 sm:$0xff]   ;;  %v6179_v49 = vsub.s32 %v334_v43, %v6176_v42  ;;  %v5323_v43 = vld [vmem:[#allocation2 + $0x48] ss:$16 sps:$4 sm:$0xff]  }
  0x49   :  { %1388 = vmatpush1.bf16.msra.mxu1 %v5205_v7  ;;  %1348 = vmatprep.subr.bf16.mxu0 %v5206_v8  ;;  %v5214_v13 = vld [vmem:[#allocation2 + $0x284] ss:$16 sps:$4 sm:$0xff]   ;;  %v5217_v15 = vld [vmem:[#allocation2 + $0x280] ss:$16 sps:$4 sm:$0xff]   ;;  %vm4602_vm11 = vcmask 517121  }
  0x4a   :  { %1389 = vmatprep.subr.bf16.mxu1 %v5208_v9  ;;  %v5218_v16 = vld [vmem:[#allocation2 + $0x64] ss:$16 sps:$4 sm:$0xff]   ;;  %v5222_v18 = vld [vmem:[#allocation2 + $0x60] ss:$16 sps:$4 sm:$0xff]  }
  0x4b   :  { %v5220_v17 = vld [vmem:[#allocation2 + $0x264] ss:$16 sps:$4 sm:$0xff]   ;;  %v5223_v19 = vld [vmem:[#allocation2 + $0x260] ss:$16 sps:$4 sm:$0xff]  }
  0x4c   :  { %1349 = vmatpush1.bf16.msra.mxu0 %v5210_v10  ;;  %v5224_v20 = vld [vmem:[#allocation2 + $0x44] ss:$16 sps:$4 sm:$0xff]   ;;  %v5228_v22 = vld [vmem:[#allocation2 + $0x40] ss:$16 sps:$4 sm:$0xff]  }
  0x4d   :  { %1390 = vmatpush1.bf16.msra.mxu1 %v5211_v11  ;;  %1350 = vmatprep.subr.bf16.mxu0 %v5212_v12  ;;  %v5226_v21 = vld [vmem:[#allocation2 + $0x244] ss:$16 sps:$4 sm:$0xff]   ;;  %v5229_v23 = vld [vmem:[#allocation2 + $0x240] ss:$16 sps:$4 sm:$0xff]  }
  0x4e   :  { %1391 = vmatprep.subr.bf16.mxu1 %v5214_v13  ;;  %v5230_v24 = vld [vmem:[#allocation2 + $0x24] ss:$16 sps:$4 sm:$0xff]   ;;  %v5234_v26 = vld [vmem:[#allocation2 + $0x20] ss:$16 sps:$4 sm:$0xff]  }
  0x4f   :  { %v5232_v25 = vld [vmem:[#allocation2 + $0x224] ss:$16 sps:$4 sm:$0xff]   ;;  %v5235_v27 = vld [vmem:[#allocation2 + $0x220] ss:$16 sps:$4 sm:$0xff]  }
  0x50   :  { %1351 = vmatpush1.bf16.msra.mxu0 %v5216_v14  ;;  %v5236_v28 = vld [vmem:[#allocation2 + $0x4] ss:$16 sps:$4 sm:$0xff]   ;;  %v5240_v30 = vld [vmem:[#allocation2] ss:$16 sps:$4 sm:$0xff]  }
  0x51   :  { %1392 = vmatpush1.bf16.msra.mxu1 %v5217_v15  ;;  %1352 = vmatprep.subr.bf16.mxu0 %v5218_v16  ;;  %v5238_v29 = vld [vmem:[#allocation2 + $0x204] ss:$16 sps:$4 sm:$0xff]   ;;  %v5241_v31 = vld [vmem:[#allocation2 + $0x200] ss:$16 sps:$4 sm:$0xff]   ;;  %v5295_v16 = vld [vmem:[#allocation2 + $0xec] ss:$16 sps:$4 sm:$0xff]  }
  0x52   :  { %1393 = vmatprep.subr.bf16.mxu1 %v5220_v17  ;;  %v5242_v32 = vld [vmem:[#allocation2 + $0x1e4] ss:$16 sps:$4 sm:$0xff]   ;;  %v5246_v34 = vld [vmem:[#allocation2 + $0x1e0] ss:$16 sps:$4 sm:$0xff]  }
  0x53   :  { %v5244_v33 = vld [vmem:[#allocation2 + $0x3e4] ss:$16 sps:$4 sm:$0xff]   ;;  %v5247_v35 = vld [vmem:[#allocation2 + $0x3e0] ss:$16 sps:$4 sm:$0xff]  }
  0x54   :  { %1353 = vmatpush1.bf16.msra.mxu0 %v5222_v18  ;;  %v5248_v39 = vld [vmem:[#allocation2 + $0x1c4] ss:$16 sps:$4 sm:$0xff]   ;;  %v5252_v41 = vld [vmem:[#allocation2 + $0x1c0] ss:$16 sps:$4 sm:$0xff]  }
  0x55   :  { %1394 = vmatpush1.bf16.msra.mxu1 %v5223_v19  ;;  %1354 = vmatprep.subr.bf16.mxu0 %v5224_v20  ;;  %v5250_v40 = vld [vmem:[#allocation2 + $0x3c4] ss:$16 sps:$4 sm:$0xff]   ;;  %v5253_v44 = vld [vmem:[#allocation2 + $0x3c0] ss:$16 sps:$4 sm:$0xff]   ;;  %v5293_v20 = vld [vmem:[#allocation2 + $0xe8] ss:$16 sps:$4 sm:$0xff]  }
  0x56   :  { %1395 = vmatprep.subr.bf16.mxu1 %v5226_v21  ;;  %v5254_v45 = vld [vmem:[#allocation2 + $0x1a4] ss:$16 sps:$4 sm:$0xff]   ;;  %v5258_v47 = vld [vmem:[#allocation2 + $0x1a0] ss:$16 sps:$4 sm:$0xff]  }
  0x57   :  { %v5256_v46 = vld [vmem:[#allocation2 + $0x3a4] ss:$16 sps:$4 sm:$0xff]   ;;  %v5259_v48 = vld [vmem:[#allocation2 + $0x3a0] ss:$16 sps:$4 sm:$0xff]  }
  0x58   :  { %1355 = vmatpush1.bf16.msra.mxu0 %v5228_v22  ;;  %v5260_v50 = vld [vmem:[#allocation2 + $0x184] ss:$16 sps:$4 sm:$0xff]   ;;  %v5264_v53 = vld [vmem:[#allocation2 + $0x180] ss:$16 sps:$4 sm:$0xff]   ;;  %v5301_v22 = vld [vmem:[#allocation2 + $0xcc] ss:$16 sps:$4 sm:$0xff]  }
  0x59   :  { %1396 = vmatpush1.bf16.msra.mxu1 %v5229_v23  ;;  %1356 = vmatprep.subr.bf16.mxu0 %v5230_v24  ;;  %v5262_v51 = vld [vmem:[#allocation2 + $0x384] ss:$16 sps:$4 sm:$0xff]   ;;  %v5265_v56 = vld [vmem:[#allocation2 + $0x380] ss:$16 sps:$4 sm:$0xff]  }
  0x5a   :  { %1397 = vmatprep.subr.bf16.mxu1 %v5232_v25  ;;  %v115_v52 = vld [vmem:[%s7209_s0] sm:$0x3f]  ;;  %v5299_v25 = vld [vmem:[#allocation2 + $0xc8] ss:$16 sps:$4 sm:$0xff]  }
  0x5b   :  { %v338_v54 = vrot.slane %v115_v52, %v6179_v49  ;;  %v331_v55 = vcombine.high %v115_v52, %v115_v52  ;;  %v5266_v57 = vld [vmem:[#allocation2 + $0x164] ss:$16 sps:$4 sm:$0xff]   ;;  %v5270_v61 = vld [vmem:[#allocation2 + $0x160] ss:$16 sps:$4 sm:$0xff]  }
  0x5c   :  { %1357 = vmatpush1.bf16.msra.mxu0 %v5234_v26  ;;  %v5268_v58 = vld [vmem:[#allocation2 + $0x364] ss:$16 sps:$4 sm:$0xff]   ;;  %v5271_v0 = vld [vmem:[#allocation2 + $0x360] ss:$16 sps:$4 sm:$0xff]  }
  0x5d   :  { %1398 = vmatpush1.bf16.msra.mxu1 %v5235_v27  ;;  %1358 = vmatprep.subr.bf16.mxu0 %v5236_v28  ;;  %v346_v59 = vcombine.high %v338_v54, %v338_v54  ;;  %v345_v60 = vrot.slane %v331_v55, %v6179_v49  ;;  %v5272_v1 = vld [vmem:[#allocation2 + $0x144] ss:$16 sps:$4 sm:$0xff]   ;;  %v5276_v4 = vld [vmem:[#allocation2 + $0x140] ss:$16 sps:$4 sm:$0xff]   ;;  %v6194_v13 = vrot.slane %v338_v54, %v6179_v49  ;;  %v5307_v27 = vld [vmem:[#allocation2 + $0xac] ss:$16 sps:$4 sm:$0xff]  }
  0x5e   :  { %1399 = vmatprep.subr.bf16.mxu1 %v5238_v29  ;;  %v5274_v2 = vld [vmem:[#allocation2 + $0x344] ss:$16 sps:$4 sm:$0xff]   ;;  %v5277_v5 = vld [vmem:[#allocation2 + $0x340] ss:$16 sps:$4 sm:$0xff]   ;;  %v5305_v29 = vld [vmem:[#allocation2 + $0xa8] ss:$16 sps:$4 sm:$0xff]  }
  0x5f   :  { %v368_v62 = vrot.slane %v346_v59, %v6179_v49  ;;  %v6188_v63 = vrot.slane %v345_v60, %v6179_v49  ;;  %v5278_v6 = vld [vmem:[#allocation2 + $0x124] ss:$16 sps:$4 sm:$0xff]   ;;  %v5282_v8 = vld [vmem:[#allocation2 + $0x120] ss:$16 sps:$4 sm:$0xff]   ;;  %v347_v17 = vcombine.high %v345_v60, %v345_v60  ;;  %v6198_v18 = vcombine.high %v6194_v13, %v6194_v13  ;;  %v5341_v55 = vld [vmem:[#allocation2 + $0x1e8] ss:$16 sps:$4 sm:$0xff]  }
  0x60   :  { %1359 = vmatpush1.bf16.msra.mxu0 %v5240_v30  ;;  %v5280_v7 = vld [vmem:[#allocation2 + $0x324] ss:$16 sps:$4 sm:$0xff]   ;;  %v5283_v9 = vld [vmem:[#allocation2 + $0x320] ss:$16 sps:$4 sm:$0xff]   ;;  %v5347_v59 = vld [vmem:[#allocation2 + $0x1c8] ss:$16 sps:$4 sm:$0xff]  }
  0x61   :  { %1400 = vmatpush1.bf16.msra.mxu1 %v5241_v31  ;;  %1360 = vmatprep.subr.bf16.mxu0 %v5242_v32  ;;  %v6190_v3 = vcombine.high %v368_v62, %v368_v62  ;;  %v5284_v10 = vld [vmem:[#allocation2 + $0x104] ss:$16 sps:$4 sm:$0xff]   ;;  %v5288_v12 = vld [vmem:[#allocation2 + $0x100] ss:$16 sps:$4 sm:$0xff]   ;;  %v6201_v23 = vrot.slane %v347_v17, %v6179_v49  ;;  %v5313_v31 = vld [vmem:[#allocation2 + $0x8c] ss:$16 sps:$4 sm:$0xff]  }
  0x62   :  { %1401 = vmatprep.subr.bf16.mxu1 %v5244_v33  ;;  %1376 = vmatprep.mubr.bf16.mxu0 %v368_v62  ;;  %v5286_v11 = vld [vmem:[#allocation2 + $0x304] ss:$16 sps:$4 sm:$0xff]   ;;  %v5289_v14 = vld [vmem:[#allocation2 + $0x300] ss:$16 sps:$4 sm:$0xff]   ;;  %v5311_v33 = vld [vmem:[#allocation2 + $0x88] ss:$16 sps:$4 sm:$0xff]  }
  0x63   :  { %1417 = vmatprep.mubr.bf16.mxu1 %v6190_v3  ;;  %v5292_v15 = vld [vmem:[#allocation2 + $0x4e4] ss:$16 sps:$4 sm:$0xff]   ;;  %v5290_v19 = vld [vmem:[#allocation2 + $0x4e0] ss:$16 sps:$4 sm:$0xff]   ;;  %v5337_v49 = vld [vmem:[#allocation2 + $0xc] ss:$16 sps:$4 sm:$0xff]  }
  0x64   :  { %1361 = vmatpush2.bf16.msra.mxu0 %v5246_v34  ;;  %v5298_v21 = vld [vmem:[#allocation2 + $0x4c4] ss:$16 sps:$4 sm:$0xff]   ;;  %v5296_v24 = vld [vmem:[#allocation2 + $0x4c0] ss:$16 sps:$4 sm:$0xff]  }
  0x65   :  { %1402 = vmatpush2.bf16.msra.mxu1 %v5247_v35  ;;  %1362 = vmatprep.subr.bf16.mxu0 %v5248_v39  ;;  %v5304_v26 = vld [vmem:[#allocation2 + $0x4a4] ss:$16 sps:$4 sm:$0xff]   ;;  %v5302_v28 = vld [vmem:[#allocation2 + $0x4a0] ss:$16 sps:$4 sm:$0xff]   ;;  %v5319_v35 = vld [vmem:[#allocation2 + $0x6c] ss:$16 sps:$4 sm:$0xff]  }
  0x66   :  { %1403 = vmatprep.subr.bf16.mxu1 %v5250_v40  ;;  %v5310_v30 = vld [vmem:[#allocation2 + $0x484] ss:$16 sps:$4 sm:$0xff]   ;;  %v5308_v32 = vld [vmem:[#allocation2 + $0x480] ss:$16 sps:$4 sm:$0xff]   ;;  %v5325_v40 = vld [vmem:[#allocation2 + $0x4c] ss:$16 sps:$4 sm:$0xff]  }
  0x67   :  { %v5316_v34 = vld [vmem:[#allocation2 + $0x464] ss:$16 sps:$4 sm:$0xff]   ;;  %v5314_v37 = vld [vmem:[#allocation2 + $0x460] ss:$16 sps:$4 sm:$0xff]  }
  0x68   :  { %1363 = vmatpush2.bf16.msra.mxu0 %v5252_v41  ;;  %v5322_v39 = vld [vmem:[#allocation2 + $0x444] ss:$16 sps:$4 sm:$0xff]   ;;  %v5320_v41 = vld [vmem:[#allocation2 + $0x440] ss:$16 sps:$4 sm:$0xff]  }
  0x69   :  { %1404 = vmatpush2.bf16.msra.mxu1 %v5253_v44  ;;  %1364 = vmatprep.subr.bf16.mxu0 %v5254_v45  ;;  %v5328_v44 = vld [vmem:[#allocation2 + $0x424] ss:$16 sps:$4 sm:$0xff]   ;;  %v5331_v45 = vld [vmem:[#allocation2 + $0x2c] ss:$16 sps:$4 sm:$0xff]   ;;  %v5338_v54 = vld [vmem:[#allocation2 + $0x5e0] ss:$16 sps:$4 sm:$0xff]  }
  0x6a   :  { %1405 = vmatprep.subr.bf16.mxu1 %v5256_v46  ;;  %v5326_v46 = vld [vmem:[#allocation2 + $0x420] ss:$16 sps:$4 sm:$0xff]   ;;  %v5340_v52 = vld [vmem:[#allocation2 + $0x5e4] ss:$16 sps:$4 sm:$0xff]  }
  0x6b   :  { %v5352_v60 = vld [vmem:[#allocation2 + $0x5a4] ss:$16 sps:$4 sm:$0xff]   ;;  %v5374_v17 = vld [vmem:[#allocation2 + $0x520] ss:$16 sps:$4 sm:$0xff]  }
  0x6c   :  { %1365 = vmatpush2.bf16.msra.mxu0 %v5258_v47  ;;  %v5329_v47 = vld [vmem:[#allocation2 + $0x28] ss:$16 sps:$4 sm:$0xff]  }
  0x6d   :  { %1406 = vmatpush2.bf16.msra.mxu1 %v5259_v48  ;;  %1366 = vmatprep.subr.bf16.mxu0 %v5260_v50  ;;  %v5334_v48 = vld [vmem:[#allocation2 + $0x404] ss:$16 sps:$4 sm:$0xff]   ;;  %v5332_v50 = vld [vmem:[#allocation2 + $0x400] ss:$16 sps:$4 sm:$0xff]  }
  0x6e   :  { %1407 = vmatprep.subr.bf16.mxu1 %v5262_v51  ;;  %v5335_v51 = vld [vmem:[#allocation2 + $0x8] ss:$16 sps:$4 sm:$0xff]  }
  0x70   :  { %1367 = vmatpush2.bf16.msra.mxu0 %v5264_v53  ;;  %v5343_v53 = vld [vmem:[#allocation2 + $0x1ec] ss:$16 sps:$4 sm:$0xff]  }
  0x71   :  { %1408 = vmatpush2.bf16.msra.mxu1 %v5265_v56  ;;  %1368 = vmatprep.subr.bf16.mxu0 %v5266_v57  ;;  %v5346_v56 = vld [vmem:[#allocation2 + $0x5c4] ss:$16 sps:$4 sm:$0xff]   ;;  %v5349_v57 = vld [vmem:[#allocation2 + $0x1cc] ss:$16 sps:$4 sm:$0xff]  }
  0x72   :  { %1409 = vmatprep.subr.bf16.mxu1 %v5268_v58  ;;  %v5344_v58 = vld [vmem:[#allocation2 + $0x5c0] ss:$16 sps:$4 sm:$0xff]  }
  0x74   :  { %1369 = vmatpush2.bf16.msra.mxu0 %v5270_v61  ;;  %v5355_v61 = vld [vmem:[#allocation2 + $0x1ac] ss:$16 sps:$4 sm:$0xff]  }
  0x75   :  { %1410 = vmatpush2.bf16.msra.mxu1 %v5271_v0  ;;  %1370 = vmatprep.subr.bf16.mxu0 %v5272_v1  ;;  %v5353_v0 = vld [vmem:[#allocation2 + $0x1a8] ss:$16 sps:$4 sm:$0xff]   ;;  %v5358_v1 = vld [vmem:[#allocation2 + $0x584] ss:$16 sps:$4 sm:$0xff]  }
  0x76   :  { %1411 = vmatprep.subr.bf16.mxu1 %v5274_v2  ;;  %v5361_v2 = vld [vmem:[#allocation2 + $0x18c] ss:$16 sps:$4 sm:$0xff]  }
  0x78   :  { %1371 = vmatpush2.bf16.msra.mxu0 %v5276_v4  ;;  %v5356_v4 = vld [vmem:[#allocation2 + $0x580] ss:$16 sps:$4 sm:$0xff]  }
  0x79   :  { %1412 = vmatpush2.bf16.msra.mxu1 %v5277_v5  ;;  %1372 = vmatprep.subr.bf16.mxu0 %v5278_v6  ;;  %v5359_v5 = vld [vmem:[#allocation2 + $0x188] ss:$16 sps:$4 sm:$0xff]   ;;  %v5364_v6 = vld [vmem:[#allocation2 + $0x564] ss:$16 sps:$4 sm:$0xff]  }
  0x7a   :  { %1413 = vmatprep.subr.bf16.mxu1 %v5280_v7  ;;  %v5367_v7 = vld [vmem:[#allocation2 + $0x16c] ss:$16 sps:$4 sm:$0xff]  }
  0x7c   :  { %1373 = vmatpush2.bf16.msra.mxu0 %v5282_v8  ;;  %v5362_v8 = vld [vmem:[#allocation2 + $0x560] ss:$16 sps:$4 sm:$0xff]  }
  0x7d   :  { %1414 = vmatpush2.bf16.msra.mxu1 %v5283_v9  ;;  %1374 = vmatprep.subr.bf16.mxu0 %v5284_v10  ;;  %v5365_v9 = vld [vmem:[#allocation2 + $0x168] ss:$16 sps:$4 sm:$0xff]   ;;  %v5370_v10 = vld [vmem:[#allocation2 + $0x544] ss:$16 sps:$4 sm:$0xff]  }
  0x7e   :  { %1415 = vmatprep.subr.bf16.mxu1 %v5286_v11  ;;  %v5373_v11 = vld [vmem:[#allocation2 + $0x14c] ss:$16 sps:$4 sm:$0xff]  }
  0x80   :  { %1375 = vmatpush2.bf16.msra.mxu0 %v5288_v12  ;;  %v5368_v12 = vld [vmem:[#allocation2 + $0x540] ss:$16 sps:$4 sm:$0xff]  }
  0x81   :  { %1416 = vmatpush2.bf16.msra.mxu1 %v5289_v14  ;;  %1426 = vmatprep.subr.bf16.mxu0 %v5292_v15  ;;  %v5371_v14 = vld [vmem:[#allocation2 + $0x148] ss:$16 sps:$4 sm:$0xff]   ;;  %v5376_v15 = vld [vmem:[#allocation2 + $0x524] ss:$16 sps:$4 sm:$0xff]  }
  0x82   :  { %1467 = vmatprep.subr.bf16.mxu1 %v5295_v16  ;;  %v5379_v16 = vld [vmem:[#allocation2 + $0x12c] ss:$16 sps:$4 sm:$0xff]  }
  0x83   :  { %1377 = vmatmul.mubr.bf16.vlgmr.msra.gmra.mxu0 %v6194_v13 }
  0x84   :  { %1418 = vmatmul.mubr.bf16.vlgmr.msra.gmra.mxu1 %v6198_v18  ;;  %1427 = vmatpush1.bf16.msra.mxu0 %v5290_v19  ;;  %v5377_v19 = vld [vmem:[#allocation2 + $0x128] ss:$16 sps:$4 sm:$0xff]  }
  0x85   :  { %1468 = vmatpush1.bf16.msra.mxu1 %v5293_v20  ;;  %1428 = vmatprep.subr.bf16.mxu0 %v5298_v21  ;;  %v5382_v20 = vld [vmem:[#allocation2 + $0x504] ss:$16 sps:$4 sm:$0xff]   ;;  %v5385_v21 = vld [vmem:[#allocation2 + $0x10c] ss:$16 sps:$4 sm:$0xff]  }
  0x86   :  { %1469 = vmatprep.subr.bf16.mxu1 %v5301_v22  ;;  %1458 = vmatprep.mubr.bf16.mxu0 %v6201_v23  ;;  %v5380_v22 = vld [vmem:[#allocation2 + $0x500] ss:$16 sps:$4 sm:$0xff]  }
  0x87   :  { %1499 = vmatprep.mubr.bf16.mxu1 %v368_v62  ;;  %v5350_v62 = vld [vmem:[#allocation2 + $0x5a0] ss:$16 sps:$4 sm:$0xff]  }
  0x88   :  { %1429 = vmatpush1.bf16.msra.mxu0 %v5296_v24  ;;  %v5383_v24 = vld [vmem:[#allocation2 + $0x108] ss:$16 sps:$4 sm:$0xff]  }
  0x89   :  { %1470 = vmatpush1.bf16.msra.mxu1 %v5299_v25  ;;  %1430 = vmatprep.subr.bf16.mxu0 %v5304_v26  ;;  %v5389_v25 = vld [vmem:[#allocation2 + $0x2ec] ss:$16 sps:$4 sm:$0xff]  }
  0x8a   :  { %1471 = vmatprep.subr.bf16.mxu1 %v5307_v27  ;;  %v5392_v26 = vld [vmem:[#allocation2 + $0x4ec] ss:$16 sps:$4 sm:$0xff]   ;;  %v5387_v27 = vld [vmem:[#allocation2 + $0x2e8] ss:$16 sps:$4 sm:$0xff]  }
  0x8c   :  { %1431 = vmatpush1.bf16.msra.mxu0 %v5302_v28  ;;  %v5390_v28 = vld [vmem:[#allocation2 + $0x4e8] ss:$16 sps:$4 sm:$0xff]  }
  0x8d   :  { %1472 = vmatpush1.bf16.msra.mxu1 %v5305_v29  ;;  %1432 = vmatprep.subr.bf16.mxu0 %v5310_v30  ;;  %v5395_v29 = vld [vmem:[#allocation2 + $0x2cc] ss:$16 sps:$4 sm:$0xff]  }
  0x8e   :  { %1473 = vmatprep.subr.bf16.mxu1 %v5313_v31  ;;  %v5398_v30 = vld [vmem:[#allocation2 + $0x4cc] ss:$16 sps:$4 sm:$0xff]   ;;  %v5393_v31 = vld [vmem:[#allocation2 + $0x2c8] ss:$16 sps:$4 sm:$0xff]  }
  0x90   :  { %1433 = vmatpush1.bf16.msra.mxu0 %v5308_v32  ;;  %v5396_v32 = vld [vmem:[#allocation2 + $0x4c8] ss:$16 sps:$4 sm:$0xff]  }
  0x91   :  { %1474 = vmatpush1.bf16.msra.mxu1 %v5311_v33  ;;  %1434 = vmatprep.subr.bf16.mxu0 %v5316_v34  ;;  %v5401_v33 = vld [vmem:[#allocation2 + $0x2ac] ss:$16 sps:$4 sm:$0xff]  }
  0x92   :  { %1475 = vmatprep.subr.bf16.mxu1 %v5319_v35  ;;  %v5404_v34 = vld [vmem:[#allocation2 + $0x4ac] ss:$16 sps:$4 sm:$0xff]   ;;  %v5399_v35 = vld [vmem:[#allocation2 + $0x2a8] ss:$16 sps:$4 sm:$0xff]  }
  0x94   :  { %1435 = vmatpush1.bf16.msra.mxu0 %v5314_v37  ;;  %v5402_v37 = vld [vmem:[#allocation2 + $0x4a8] ss:$16 sps:$4 sm:$0xff]  }
  0x95   :  { %1476 = vmatpush1.bf16.msra.mxu1 %v5317_v38  ;;  %1436 = vmatprep.subr.bf16.mxu0 %v5322_v39  ;;  %v5407_v38 = vld [vmem:[#allocation2 + $0x28c] ss:$16 sps:$4 sm:$0xff]  }
  0x96   :  { %1477 = vmatprep.subr.bf16.mxu1 %v5325_v40  ;;  %v5410_v39 = vld [vmem:[#allocation2 + $0x48c] ss:$16 sps:$4 sm:$0xff]   ;;  %v5408_v40 = vld [vmem:[#allocation2 + $0x488] ss:$16 sps:$4 sm:$0xff]  }
  0x98   :  { %1437 = vmatpush1.bf16.msra.mxu0 %v5320_v41  ;;  %v5413_v41 = vld [vmem:[#allocation2 + $0x26c] ss:$16 sps:$4 sm:$0xff]  }
  0x99   :  { %1478 = vmatpush1.bf16.msra.mxu1 %v5323_v43  ;;  %1438 = vmatprep.subr.bf16.mxu0 %v5328_v44  ;;  %v5416_v43 = vld [vmem:[#allocation2 + $0x46c] ss:$16 sps:$4 sm:$0xff]   ;;  %v5411_v44 = vld [vmem:[#allocation2 + $0x268] ss:$16 sps:$4 sm:$0xff]  }
  0x9a   :  { %1479 = vmatprep.subr.bf16.mxu1 %v5331_v45  ;;  %v5422_v45 = vld [vmem:[#allocation2 + $0x44c] ss:$16 sps:$4 sm:$0xff]  }
  0x9c   :  { %1439 = vmatpush1.bf16.msra.mxu0 %v5326_v46  ;;  %v5417_v46 = vld [vmem:[#allocation2 + $0x248] ss:$16 sps:$4 sm:$0xff]  }
  0x9d   :  { %1480 = vmatpush1.bf16.msra.mxu1 %v5329_v47  ;;  %1440 = vmatprep.subr.bf16.mxu0 %v5334_v48  ;;  %v5420_v47 = vld [vmem:[#allocation2 + $0x448] ss:$16 sps:$4 sm:$0xff]   ;;  %v5425_v48 = vld [vmem:[#allocation2 + $0x22c] ss:$16 sps:$4 sm:$0xff]  }
  0x9e   :  { %1481 = vmatprep.subr.bf16.mxu1 %v5337_v49  ;;  %v5428_v49 = vld [vmem:[#allocation2 + $0x42c] ss:$16 sps:$4 sm:$0xff]  }
  0xa0   :  { %1441 = vmatpush1.bf16.msra.mxu0 %v5332_v50  ;;  %v5423_v50 = vld [vmem:[#allocation2 + $0x228] ss:$16 sps:$4 sm:$0xff]  }
  0xa1   :  { %1482 = vmatpush1.bf16.msra.mxu1 %v5335_v51  ;;  %1442 = vmatprep.subr.bf16.mxu0 %v5340_v52  ;;  %v5426_v51 = vld [vmem:[#allocation2 + $0x428] ss:$16 sps:$4 sm:$0xff]   ;;  %v5431_v52 = vld [vmem:[#allocation2 + $0x20c] ss:$16 sps:$4 sm:$0xff]  }
  0xa2   :  { %1483 = vmatprep.subr.bf16.mxu1 %v5343_v53  ;;  %v5434_v53 = vld [vmem:[#allocation2 + $0x40c] ss:$16 sps:$4 sm:$0xff]  }
  0xa4   :  { %1443 = vmatpush2.bf16.msra.mxu0 %v5338_v54  ;;  %v5429_v54 = vld [vmem:[#allocation2 + $0x208] ss:$16 sps:$4 sm:$0xff]  }
  0xa5   :  { %1484 = vmatpush2.bf16.msra.mxu1 %v5341_v55  ;;  %1444 = vmatprep.subr.bf16.mxu0 %v5346_v56  ;;  %v5432_v55 = vld [vmem:[#allocation2 + $0x408] ss:$16 sps:$4 sm:$0xff]   ;;  %v5437_v56 = vld [vmem:[#allocation2 + $0x3ec] ss:$16 sps:$4 sm:$0xff]  }
  0xa6   :  { %1485 = vmatprep.subr.bf16.mxu1 %v5349_v57  ;;  %v5440_v57 = vld [vmem:[#allocation2 + $0x5ec] ss:$16 sps:$4 sm:$0xff]  }
  0xa8   :  { %1445 = vmatpush2.bf16.msra.mxu0 %v5344_v58  ;;  %v5435_v58 = vld [vmem:[#allocation2 + $0x3e8] ss:$16 sps:$4 sm:$0xff]  }
  0xa9   :  { %1486 = vmatpush2.bf16.msra.mxu1 %v5347_v59  ;;  %1446 = vmatprep.subr.bf16.mxu0 %v5352_v60  ;;  %v5438_v59 = vld [vmem:[#allocation2 + $0x5e8] ss:$16 sps:$4 sm:$0xff]   ;;  %v5443_v60 = vld [vmem:[#allocation2 + $0x3cc] ss:$16 sps:$4 sm:$0xff]  }
  0xaa   :  { %1487 = vmatprep.subr.bf16.mxu1 %v5355_v61  ;;  %v5446_v61 = vld [vmem:[#allocation2 + $0x5cc] ss:$16 sps:$4 sm:$0xff]  }
  0xac   :  { %1447 = vmatpush2.bf16.msra.mxu0 %v5350_v62  ;;  %v5441_v62 = vld [vmem:[#allocation2 + $0x3c8] ss:$16 sps:$4 sm:$0xff]  }
  0xad   :  { %1488 = vmatpush2.bf16.msra.mxu1 %v5353_v0  ;;  %1448 = vmatprep.subr.bf16.mxu0 %v5358_v1  ;;  %v5444_v0 = vld [vmem:[#allocation2 + $0x5c8] ss:$16 sps:$4 sm:$0xff]   ;;  %v5449_v1 = vld [vmem:[#allocation2 + $0x3ac] ss:$16 sps:$4 sm:$0xff]  }
  0xae   :  { %1489 = vmatprep.subr.bf16.mxu1 %v5361_v2  ;;  %v5452_v2 = vld [vmem:[#allocation2 + $0x5ac] ss:$16 sps:$4 sm:$0xff]  }
  0xb0   :  { %1449 = vmatpush2.bf16.msra.mxu0 %v5356_v4  ;;  %v5447_v4 = vld [vmem:[#allocation2 + $0x3a8] ss:$16 sps:$4 sm:$0xff]  }
  0xb1   :  { %1490 = vmatpush2.bf16.msra.mxu1 %v5359_v5  ;;  %1450 = vmatprep.subr.bf16.mxu0 %v5364_v6  ;;  %v5450_v5 = vld [vmem:[#allocation2 + $0x5a8] ss:$16 sps:$4 sm:$0xff]   ;;  %v5455_v6 = vld [vmem:[#allocation2 + $0x38c] ss:$16 sps:$4 sm:$0xff]  }
  0xb2   :  { %1491 = vmatprep.subr.bf16.mxu1 %v5367_v7  ;;  %v5458_v7 = vld [vmem:[#allocation2 + $0x58c] ss:$16 sps:$4 sm:$0xff]  }
  0xb4   :  { %1451 = vmatpush2.bf16.msra.mxu0 %v5362_v8  ;;  %v5453_v8 = vld [vmem:[#allocation2 + $0x388] ss:$16 sps:$4 sm:$0xff]  }
  0xb5   :  { %1492 = vmatpush2.bf16.msra.mxu1 %v5365_v9  ;;  %1452 = vmatprep.subr.bf16.mxu0 %v5370_v10  ;;  %v5456_v9 = vld [vmem:[#allocation2 + $0x588] ss:$16 sps:$4 sm:$0xff]   ;;  %v5461_v10 = vld [vmem:[#allocation2 + $0x36c] ss:$16 sps:$4 sm:$0xff]  }
  0xb6   :  { %1493 = vmatprep.subr.bf16.mxu1 %v5373_v11  ;;  %v5464_v11 = vld [vmem:[#allocation2 + $0x56c] ss:$16 sps:$4 sm:$0xff]  }
  0xb8   :  { %1453 = vmatpush2.bf16.msra.mxu0 %v5368_v12  ;;  %v5459_v12 = vld [vmem:[#allocation2 + $0x368] ss:$16 sps:$4 sm:$0xff]  }
  0xb9   :  { %1494 = vmatpush2.bf16.msra.mxu1 %v5371_v14  ;;  %1454 = vmatprep.subr.bf16.mxu0 %v5376_v15  ;;  %v5462_v14 = vld [vmem:[#allocation2 + $0x568] ss:$16 sps:$4 sm:$0xff]   ;;  %v5467_v15 = vld [vmem:[#allocation2 + $0x34c] ss:$16 sps:$4 sm:$0xff]  }
  0xba   :  { %1495 = vmatprep.subr.bf16.mxu1 %v5379_v16  ;;  %v5470_v16 = vld [vmem:[#allocation2 + $0x54c] ss:$16 sps:$4 sm:$0xff]  }
  0xbc   :  { %1455 = vmatpush2.bf16.msra.mxu0 %v5374_v17  ;;  %v5465_v17 = vld [vmem:[#allocation2 + $0x348] ss:$16 sps:$4 sm:$0xff]  }
  0xbd   :  { %1496 = vmatpush2.bf16.msra.mxu1 %v5377_v19  ;;  %1456 = vmatprep.subr.bf16.mxu0 %v5382_v20  ;;  %v5468_v19 = vld [vmem:[#allocation2 + $0x548] ss:$16 sps:$4 sm:$0xff]   ;;  %v5473_v20 = vld [vmem:[#allocation2 + $0x32c] ss:$16 sps:$4 sm:$0xff]  }
  0xbe   :  { %1497 = vmatprep.subr.bf16.mxu1 %v5385_v21  ;;  %v5476_v21 = vld [vmem:[#allocation2 + $0x52c] ss:$16 sps:$4 sm:$0xff]  }
  0xc0   :  { %1457 = vmatpush2.bf16.msra.mxu0 %v5380_v22  ;;  %v5471_v22 = vld [vmem:[#allocation2 + $0x328] ss:$16 sps:$4 sm:$0xff]  }
  0xc1   :  { %1498 = vmatpush2.bf16.msra.mxu1 %v5383_v24  ;;  %1508 = vmatprep.subr.bf16.mxu0 %v5389_v25  ;;  %v5474_v24 = vld [vmem:[#allocation2 + $0x528] ss:$16 sps:$4 sm:$0xff]   ;;  %v5479_v25 = vld [vmem:[#allocation2 + $0x30c] ss:$16 sps:$4 sm:$0xff]  }
  0xc2   :  { %1549 = vmatprep.subr.bf16.mxu1 %v5392_v26  ;;  %v5482_v26 = vld [vmem:[#allocation2 + $0x50c] ss:$16 sps:$4 sm:$0xff]  }
  0xc3   :  { %1459 = vmatmul.mubr.bf16.vlgmr.msra.gmra.mxu0 %v6188_v63 }
  0xc4   :  { %1500 = vmatmul.mubr.bf16.vlgmr.msra.gmra.mxu1 %v6194_v13  ;;  %1509 = vmatpush1.bf16.msra.mxu0 %v5387_v27  ;;  %v5405_v13 = vld [vmem:[#allocation2 + $0x288] ss:$16 sps:$4 sm:$0xff]  }
  0xc5   :  { %1550 = vmatpush1.bf16.msra.mxu1 %v5390_v28  ;;  %1510 = vmatprep.subr.bf16.mxu0 %v5395_v29  ;;  %v5477_v27 = vld [vmem:[#allocation2 + $0x308] ss:$16 sps:$4 sm:$0xff]   ;;  %v5485_v29 = vld [vmem:[%s7213_s4 + $0xe4] ss:$16 sps:$4 sm:$0xff]  }
  0xc6   :  { %1551 = vmatprep.subr.bf16.mxu1 %v5398_v30  ;;  %1540 = vmatprep.mubr.bf16.mxu0 %v6190_v3  ;;  %v5414_v3 = vld [vmem:[#allocation2 + $0x468] ss:$16 sps:$4 sm:$0xff]   ;;  %v5483_v30 = vld [vmem:[%s7213_s4 + $0xe0] ss:$16 sps:$4 sm:$0xff]  }
  0xc7   :  { %1581 = vmatprep.mubr.bf16.mxu1 %v6201_v23  ;;  %v5419_v23 = vld [vmem:[#allocation2 + $0x24c] ss:$16 sps:$4 sm:$0xff]   ;;  %v5480_v28 = vld [vmem:[#allocation2 + $0x508] ss:$16 sps:$4 sm:$0xff]  }
  0xc8   :  { %1511 = vmatpush1.bf16.msra.mxu0 %v5393_v31  ;;  %v5488_v31 = vld [vmem:[%s7213_s4 + $0xc4] ss:$16 sps:$4 sm:$0xff]  }
  0xc9   :  { %1552 = vmatpush1.bf16.msra.mxu1 %v5396_v32  ;;  %1512 = vmatprep.subr.bf16.mxu0 %v5401_v33  ;;  %v5486_v32 = vld [vmem:[%s7213_s4 + $0xc0] ss:$16 sps:$4 sm:$0xff]   ;;  %v5491_v33 = vld [vmem:[%s7213_s4 + $0xa4] ss:$16 sps:$4 sm:$0xff]  }
  0xca   :  { %1553 = vmatprep.subr.bf16.mxu1 %v5404_v34  ;;  %v5489_v34 = vld [vmem:[%s7213_s4 + $0xa0] ss:$16 sps:$4 sm:$0xff]  }
  0xcc   :  { %1513 = vmatpush1.bf16.msra.mxu0 %v5399_v35  ;;  %v5497_v35 = vld [vmem:[%s7213_s4 + $0x64] ss:$16 sps:$4 sm:$0xff]  }
  0xcd   :  { %1554 = vmatpush1.bf16.msra.mxu1 %v5402_v37  ;;  %1514 = vmatprep.subr.bf16.mxu0 %v5407_v38  ;;  %v5536_v37 = vld [vmem:[%s7213_s4 + $0x2e4] ss:$16 sps:$4 sm:$0xff]   ;;  %v5495_v38 = vld [vmem:[%s7213_s4 + $0x60] ss:$16 sps:$4 sm:$0xff]  }
  0xce   :  { %1555 = vmatprep.subr.bf16.mxu1 %v5410_v39  ;;  %v5534_v39 = vld [vmem:[%s7213_s4 + $0x2e0] ss:$16 sps:$4 sm:$0xff]  }
  0xd0   :  { %1515 = vmatpush1.bf16.msra.mxu0 %v5405_v13  ;;  %v5500_v13 = vld [vmem:[%s7213_s4 + $0x44] ss:$16 sps:$4 sm:$0xff]  }
  0xd1   :  { %1556 = vmatpush1.bf16.msra.mxu1 %v5408_v40  ;;  %1516 = vmatprep.subr.bf16.mxu0 %v5413_v41  ;;  %v5542_v40 = vld [vmem:[%s7213_s4 + $0x2c4] ss:$16 sps:$4 sm:$0xff]   ;;  %v5498_v41 = vld [vmem:[%s7213_s4 + $0x40] ss:$16 sps:$4 sm:$0xff]  }
  0xd2   :  { %1557 = vmatprep.subr.bf16.mxu1 %v5416_v43  ;;  %v5540_v43 = vld [vmem:[%s7213_s4 + $0x2c0] ss:$16 sps:$4 sm:$0xff]  }
  0xd4   :  { %1517 = vmatpush1.bf16.msra.mxu0 %v5411_v44  ;;  %v5503_v44 = vld [vmem:[%s7213_s4 + $0x24] ss:$16 sps:$4 sm:$0xff]  }
  0xd5   :  { %1558 = vmatpush1.bf16.msra.mxu1 %v5414_v3  ;;  %1518 = vmatprep.subr.bf16.mxu0 %v5419_v23  ;;  %v5548_v3 = vld [vmem:[%s7213_s4 + $0x2a4] ss:$16 sps:$4 sm:$0xff]   ;;  %v5501_v23 = vld [vmem:[%s7213_s4 + $0x20] ss:$16 sps:$4 sm:$0xff]  }
  0xd6   :  { %1559 = vmatprep.subr.bf16.mxu1 %v5422_v45  ;;  %v5546_v45 = vld [vmem:[%s7213_s4 + $0x2a0] ss:$16 sps:$4 sm:$0xff]  }
  0xd8   :  { %1519 = vmatpush1.bf16.msra.mxu0 %v5417_v46  ;;  %v5506_v46 = vld [vmem:[%s7213_s4 + $0x4] ss:$16 sps:$4 sm:$0xff]  }
  0xd9   :  { %1560 = vmatpush1.bf16.msra.mxu1 %v5420_v47  ;;  %1520 = vmatprep.subr.bf16.mxu0 %v5425_v48  ;;  %v5554_v47 = vld [vmem:[%s7213_s4 + $0x284] ss:$16 sps:$4 sm:$0xff]   ;;  %v5504_v48 = vld [vmem:[%s7213_s4] ss:$16 sps:$4 sm:$0xff]  }
  0xda   :  { %1561 = vmatprep.subr.bf16.mxu1 %v5428_v49  ;;  %v5552_v49 = vld [vmem:[%s7213_s4 + $0x280] ss:$16 sps:$4 sm:$0xff]  }
  0xdc   :  { %1521 = vmatpush1.bf16.msra.mxu0 %v5423_v50  ;;  %v5509_v50 = vld [vmem:[%s7213_s4 + $0x1e4] ss:$16 sps:$4 sm:$0xff]  }
  0xdd   :  { %1562 = vmatpush1.bf16.msra.mxu1 %v5426_v51  ;;  %1522 = vmatprep.subr.bf16.mxu0 %v5431_v52  ;;  %v5560_v51 = vld [vmem:[%s7213_s4 + $0x264] ss:$16 sps:$4 sm:$0xff]   ;;  %v5558_v52 = vld [vmem:[%s7213_s4 + $0x260] ss:$16 sps:$4 sm:$0xff]  }
  0xde   :  { %1563 = vmatprep.subr.bf16.mxu1 %v5434_v53  ;;  %v5507_v53 = vld [vmem:[%s7213_s4 + $0x1e0] ss:$16 sps:$4 sm:$0xff]  }
  0xe0   :  { %1523 = vmatpush1.bf16.msra.mxu0 %v5429_v54  ;;  %v5512_v54 = vld [vmem:[%s7213_s4 + $0x1c4] ss:$16 sps:$4 sm:$0xff]  }
  0xe1   :  { %1564 = vmatpush1.bf16.msra.mxu1 %v5432_v55  ;;  %1524 = vmatprep.subr.bf16.mxu0 %v5437_v56  ;;  %v5566_v55 = vld [vmem:[%s7213_s4 + $0x244] ss:$16 sps:$4 sm:$0xff]   ;;  %v5564_v56 = vld [vmem:[%s7213_s4 + $0x240] ss:$16 sps:$4 sm:$0xff]  }
  0xe2   :  { %1565 = vmatprep.subr.bf16.mxu1 %v5440_v57  ;;  %v5510_v57 = vld [vmem:[%s7213_s4 + $0x1c0] ss:$16 sps:$4 sm:$0xff]  }
  0xe4   :  { %1525 = vmatpush2.bf16.msra.mxu0 %v5435_v58  ;;  %v5515_v58 = vld [vmem:[%s7213_s4 + $0x1a4] ss:$16 sps:$4 sm:$0xff]  }
  0xe5   :  { %1566 = vmatpush2.bf16.msra.mxu1 %v5438_v59  ;;  %1526 = vmatprep.subr.bf16.mxu0 %v5443_v60  ;;  %v5572_v59 = vld [vmem:[%s7213_s4 + $0x224] ss:$16 sps:$4 sm:$0xff]   ;;  %v5570_v60 = vld [vmem:[%s7213_s4 + $0x220] ss:$16 sps:$4 sm:$0xff]  }
  0xe6   :  { %1567 = vmatprep.subr.bf16.mxu1 %v5446_v61  ;;  %v5513_v61 = vld [vmem:[%s7213_s4 + $0x1a0] ss:$16 sps:$4 sm:$0xff]  }
  0xe8   :  { %1527 = vmatpush2.bf16.msra.mxu0 %v5441_v62  ;;  %v5518_v62 = vld [vmem:[%s7213_s4 + $0x184] ss:$16 sps:$4 sm:$0xff]  }
  0xe9   :  { %1568 = vmatpush2.bf16.msra.mxu1 %v5444_v0  ;;  %1528 = vmatprep.subr.bf16.mxu0 %v5449_v1  ;;  %v5578_v0 = vld [vmem:[%s7213_s4 + $0x204] ss:$16 sps:$4 sm:$0xff]   ;;  %v5576_v1 = vld [vmem:[%s7213_s4 + $0x200] ss:$16 sps:$4 sm:$0xff]  }
  0xea   :  { %1569 = vmatprep.subr.bf16.mxu1 %v5452_v2  ;;  %v5516_v2 = vld [vmem:[%s7213_s4 + $0x180] ss:$16 sps:$4 sm:$0xff]  }
  0xec   :  { %1529 = vmatpush2.bf16.msra.mxu0 %v5447_v4  ;;  %v5521_v4 = vld [vmem:[%s7213_s4 + $0x164] ss:$16 sps:$4 sm:$0xff]  }
  0xed   :  { %1570 = vmatpush2.bf16.msra.mxu1 %v5450_v5  ;;  %1530 = vmatprep.subr.bf16.mxu0 %v5455_v6  ;;  %v5584_v5 = vld [vmem:[%s7213_s4 + $0x3e4] ss:$16 sps:$4 sm:$0xff]   ;;  %v5582_v6 = vld [vmem:[%s7213_s4 + $0x3e0] ss:$16 sps:$4 sm:$0xff]  }
  0xee   :  { %1571 = vmatprep.subr.bf16.mxu1 %v5458_v7  ;;  %v5519_v7 = vld [vmem:[%s7213_s4 + $0x160] ss:$16 sps:$4 sm:$0xff]  }
  0xf0   :  { %1531 = vmatpush2.bf16.msra.mxu0 %v5453_v8  ;;  %v5524_v8 = vld [vmem:[%s7213_s4 + $0x144] ss:$16 sps:$4 sm:$0xff]  }
  0xf1   :  { %1572 = vmatpush2.bf16.msra.mxu1 %v5456_v9  ;;  %1532 = vmatprep.subr.bf16.mxu0 %v5461_v10  ;;  %v5590_v9 = vld [vmem:[%s7213_s4 + $0x3c4] ss:$16 sps:$4 sm:$0xff]   ;;  %v5588_v10 = vld [vmem:[%s7213_s4 + $0x3c0] ss:$16 sps:$4 sm:$0xff]  }
  0xf2   :  { %1573 = vmatprep.subr.bf16.mxu1 %v5464_v11  ;;  %v5522_v11 = vld [vmem:[%s7213_s4 + $0x140] ss:$16 sps:$4 sm:$0xff]  }
  0xf4   :  { %1533 = vmatpush2.bf16.msra.mxu0 %v5459_v12  ;;  %v5527_v12 = vld [vmem:[%s7213_s4 + $0x124] ss:$16 sps:$4 sm:$0xff]  }
  0xf5   :  { %1574 = vmatpush2.bf16.msra.mxu1 %v5462_v14  ;;  %1534 = vmatprep.subr.bf16.mxu0 %v5467_v15  ;;  %v5596_v14 = vld [vmem:[%s7213_s4 + $0x3a4] ss:$16 sps:$4 sm:$0xff]   ;;  %v5594_v15 = vld [vmem:[%s7213_s4 + $0x3a0] ss:$16 sps:$4 sm:$0xff]  }
  0xf6   :  { %1575 = vmatprep.subr.bf16.mxu1 %v5470_v16  ;;  %v5525_v16 = vld [vmem:[%s7213_s4 + $0x120] ss:$16 sps:$4 sm:$0xff]  }
  0xf8   :  { %1535 = vmatpush2.bf16.msra.mxu0 %v5465_v17  ;;  %v5530_v17 = vld [vmem:[%s7213_s4 + $0x104] ss:$16 sps:$4 sm:$0xff]  }
  0xf9   :  { %1576 = vmatpush2.bf16.msra.mxu1 %v5468_v19  ;;  %1536 = vmatprep.subr.bf16.mxu0 %v5473_v20  ;;  %v5602_v19 = vld [vmem:[%s7213_s4 + $0x384] ss:$16 sps:$4 sm:$0xff]   ;;  %v5600_v20 = vld [vmem:[%s7213_s4 + $0x380] ss:$16 sps:$4 sm:$0xff]  }
  0xfa   :  { %1577 = vmatprep.subr.bf16.mxu1 %v5476_v21  ;;  %v5528_v21 = vld [vmem:[%s7213_s4 + $0x100] ss:$16 sps:$4 sm:$0xff]  }
  0xfc   :  { %1537 = vmatpush2.bf16.msra.mxu0 %v5471_v22  ;;  %v5533_v22 = vld [vmem:[%s7213_s4 + $0xec] ss:$16 sps:$4 sm:$0xff]  }
  0xfd   :  { %1578 = vmatpush2.bf16.msra.mxu1 %v5474_v24  ;;  %1538 = vmatprep.subr.bf16.mxu0 %v5479_v25  ;;  %v5608_v24 = vld [vmem:[%s7213_s4 + $0x364] ss:$16 sps:$4 sm:$0xff]   ;;  %v5606_v25 = vld [vmem:[%s7213_s4 + $0x360] ss:$16 sps:$4 sm:$0xff]  }
  0xfe   :  { %1579 = vmatprep.subr.bf16.mxu1 %v5482_v26  ;;  %v5614_v26 = vld [vmem:[%s7213_s4 + $0x344] ss:$16 sps:$4 sm:$0xff]  }
 0x100   :  { %1539 = vmatpush2.bf16.msra.mxu0 %v5477_v27  ;;  %v5612_v27 = vld [vmem:[%s7213_s4 + $0x340] ss:$16 sps:$4 sm:$0xff]  }
 0x101   :  { %1580 = vmatpush2.bf16.msra.mxu1 %v5480_v28  ;;  %2388 = vmatprep.subr.bf16.mxu0 %v5485_v29 }
 0x102   :  { %2429 = vmatprep.subr.bf16.mxu1 %v5536_v37  ;;  %v5626_v37 = vld [vmem:[%s7213_s4 + $0x304] ss:$16 sps:$4 sm:$0xff]  }
 0x103   :  { %1541 = vmatmul.mubr.bf16.vlgmr.msra.gmra.mxu0 %v6198_v18  ;;  %v5494_v18 = vld [vmem:[%s7213_s4 + $0x84] ss:$16 sps:$4 sm:$0xff]  }
 0x104   :  { %1582 = vmatmul.mubr.bf16.vlgmr.msra.gmra.mxu1 %v6188_v63  ;;  %2389 = vmatpush1.bf16.msra.mxu0 %v5483_v30  ;;  %v5492_v63 = vld [vmem:[%s7213_s4 + $0x80] ss:$16 sps:$4 sm:$0xff]  }
 0x105   :  { %2390 = vmatprep.subr.bf16.mxu0 %v5488_v31  ;;  %2430 = vmatpush1.bf16.msra.mxu1 %v5534_v39  ;;  %v5629_v39 = vld [vmem:[%s7213_s4 + $0x2ec] ss:$16 sps:$4 sm:$0xff]  }
 0x106   :  { %2431 = vmatprep.subr.bf16.mxu1 %v5542_v40  ;;  %v6416_v40 = vld [vmem:[%s7212_s3] sm:$0xf] }
 0x108   :  { %2391 = vmatpush1.bf16.msra.mxu0 %v5486_v32  ;;  %v5620_v32 = vld [vmem:[%s7213_s4 + $0x324] ss:$16 sps:$4 sm:$0xff]  }
 0x109   :  { %2392 = vmatprep.subr.bf16.mxu0 %v5491_v33  ;;  %2432 = vmatpush1.bf16.msra.mxu1 %v5540_v43  ;;  %v5618_v33 = vld [vmem:[%s7213_s4 + $0x320] ss:$16 sps:$4 sm:$0xff]  }
 0x10a   :  { %2433 = vmatprep.subr.bf16.mxu1 %v5548_v3 }
 0x10c   :  { %2393 = vmatpush1.bf16.msra.mxu0 %v5489_v34 }
 0x10d   :  { %2394 = vmatprep.subr.bf16.mxu0 %v5494_v18  ;;  %2434 = vmatpush1.bf16.msra.mxu1 %v5546_v45 }
 0x10e   :  { %2435 = vmatprep.subr.bf16.mxu1 %v5554_v47 }
 0x110   :  { %2395 = vmatpush1.bf16.msra.mxu0 %v5492_v63 }
 0x111   :  { %2396 = vmatprep.subr.bf16.mxu0 %v5497_v35  ;;  %2436 = vmatpush1.bf16.msra.mxu1 %v5552_v49 }
 0x112   :  { %2437 = vmatprep.subr.bf16.mxu1 %v5560_v51 }
 0x114   :  { %2397 = vmatpush1.bf16.msra.mxu0 %v5495_v38  ;;  %v5624_v38 = vld [vmem:[%s7213_s4 + $0x300] ss:$16 sps:$4 sm:$0xff]  }
 0x115   :  { %2398 = vmatprep.subr.bf16.mxu0 %v5500_v13  ;;  %2438 = vmatpush1.bf16.msra.mxu1 %v5558_v52  ;;  %v6411_v13 = vsub.s32 0, %v6176_v42 }
 0x116   :  { %2439 = vmatprep.subr.bf16.mxu1 %v5566_v55 }
 0x117   :  { %v313_v43 = vrot.slane %v6416_v40, %v6411_v13 }
 0x118   :  { %2399 = vmatpush1.bf16.msra.mxu0 %v5498_v41  ;;  %v6419_v41 = vsub.s32 1, %v6176_v42 }
 0x119   :  { %2400 = vmatprep.subr.bf16.mxu0 %v5503_v44  ;;  %2440 = vmatpush1.bf16.msra.mxu1 %v5564_v56 }
 0x11a   :  { %2441 = vmatprep.subr.bf16.mxu1 %v5572_v59  ;;  %v317_v44 = vrot.slane %v6416_v40, %v6419_v41 }
 0x11c   :  { %2401 = vmatpush1.bf16.msra.mxu0 %v5501_v23 }
 0x11d   :  { %2402 = vmatprep.subr.bf16.mxu0 %v5506_v46  ;;  %2442 = vmatpush1.bf16.msra.mxu1 %v5570_v60  ;;  %v5531_v60 = vld [vmem:[%s7213_s4 + $0xe8] ss:$16 sps:$4 sm:$0xff]  }
 0x11e   :  { %2443 = vmatprep.subr.bf16.mxu1 %v5578_v0  ;;  %v5537_v0 = vld [vmem:[%s7213_s4 + $0xc8] ss:$16 sps:$4 sm:$0xff]  }
 0x120   :  { %2403 = vmatpush1.bf16.msra.mxu0 %v5504_v48 }
 0x121   :  { %2404 = vmatprep.subr.bf16.mxu0 %v5509_v50  ;;  %2444 = vmatpush1.bf16.msra.mxu1 %v5576_v1  ;;  %v5545_v1 = vld [vmem:[%s7213_s4 + $0xac] ss:$16 sps:$4 sm:$0xff]  }
 0x122   :  { %2445 = vmatprep.subr.bf16.mxu1 %v5584_v5  ;;  %v5549_v5 = vld [vmem:[%s7213_s4 + $0x88] ss:$16 sps:$4 sm:$0xff]  }
 0x124   :  { %2405 = vmatpush2.bf16.msra.mxu0 %v5507_v53 }
 0x125   :  { %2406 = vmatprep.subr.bf16.mxu0 %v5512_v54  ;;  %2446 = vmatpush2.bf16.msra.mxu1 %v5582_v6  ;;  %v5557_v6 = vld [vmem:[%s7213_s4 + $0x6c] ss:$16 sps:$4 sm:$0xff]  }
 0x126   :  { %2447 = vmatprep.subr.bf16.mxu1 %v5590_v9  ;;  %v5561_v9 = vld [vmem:[%s7213_s4 + $0x48] ss:$16 sps:$4 sm:$0xff]  }
 0x128   :  { %2407 = vmatpush2.bf16.msra.mxu0 %v5510_v57 }
 0x129   :  { %2408 = vmatprep.subr.bf16.mxu0 %v5515_v58  ;;  %2448 = vmatpush2.bf16.msra.mxu1 %v5588_v10  ;;  %v5569_v10 = vld [vmem:[%s7213_s4 + $0x2c] ss:$16 sps:$4 sm:$0xff]  }
 0x12a   :  { %2449 = vmatprep.subr.bf16.mxu1 %v5596_v14  ;;  %v5573_v14 = vld [vmem:[%s7213_s4 + $0x8] ss:$16 sps:$4 sm:$0xff]  }
 0x12c   :  { %2409 = vmatpush2.bf16.msra.mxu0 %v5513_v61 }
 0x12d   :  { %2410 = vmatprep.subr.bf16.mxu0 %v5518_v62  ;;  %2450 = vmatpush2.bf16.msra.mxu1 %v5594_v15  ;;  %v5539_v62 = vld [vmem:[%s7213_s4 + $0xcc] ss:$16 sps:$4 sm:$0xff]  }
 0x12e   :  { %2451 = vmatprep.subr.bf16.mxu1 %v5602_v19  ;;  %v5581_v15 = vld [vmem:[%s7213_s4 + $0x1ec] ss:$16 sps:$4 sm:$0xff]   ;;  %v5585_v19 = vld [vmem:[%s7213_s4 + $0x1c8] ss:$16 sps:$4 sm:$0xff]  }
 0x130   :  { %2411 = vmatpush2.bf16.msra.mxu0 %v5516_v2  ;;  %v5543_v2 = vld [vmem:[%s7213_s4 + $0xa8] ss:$16 sps:$4 sm:$0xff]  }
 0x131   :  { %2412 = vmatprep.subr.bf16.mxu0 %v5521_v4  ;;  %2452 = vmatpush2.bf16.msra.mxu1 %v5600_v20  ;;  %v5551_v4 = vld [vmem:[%s7213_s4 + $0x8c] ss:$16 sps:$4 sm:$0xff]  }
 0x132   :  { %2453 = vmatprep.subr.bf16.mxu1 %v5608_v24  ;;  %v5593_v20 = vld [vmem:[%s7213_s4 + $0x1ac] ss:$16 sps:$4 sm:$0xff]   ;;  %v5597_v24 = vld [vmem:[%s7213_s4 + $0x188] ss:$16 sps:$4 sm:$0xff]  }
 0x134   :  { %2413 = vmatpush2.bf16.msra.mxu0 %v5519_v7  ;;  %v5555_v7 = vld [vmem:[%s7213_s4 + $0x68] ss:$16 sps:$4 sm:$0xff]  }
 0x135   :  { %2414 = vmatprep.subr.bf16.mxu0 %v5524_v8  ;;  %2454 = vmatpush2.bf16.msra.mxu1 %v5606_v25  ;;  %v5563_v8 = vld [vmem:[%s7213_s4 + $0x4c] ss:$16 sps:$4 sm:$0xff]  }
 0x136   :  { %2455 = vmatprep.subr.bf16.mxu1 %v5614_v26  ;;  %v5605_v25 = vld [vmem:[%s7213_s4 + $0x16c] ss:$16 sps:$4 sm:$0xff]   ;;  %v320_v26 = vsub.s32 2, %v6176_v42 }
 0x138   :  { %2415 = vmatpush2.bf16.msra.mxu0 %v5522_v11  ;;  %v5567_v11 = vld [vmem:[%s7213_s4 + $0x28] ss:$16 sps:$4 sm:$0xff]  }
 0x139   :  { %2416 = vmatprep.subr.bf16.mxu0 %v5527_v12  ;;  %2456 = vmatpush2.bf16.msra.mxu1 %v5612_v27  ;;  %v5575_v12 = vld [vmem:[%s7213_s4 + $0xc] ss:$16 sps:$4 sm:$0xff]   ;;  %v5603_v27 = vld [vmem:[%s7213_s4 + $0x168] ss:$16 sps:$4 sm:$0xff]  }
 0x13a   :  { %2457 = vmatprep.subr.bf16.mxu1 %v5620_v32  ;;  %v5617_v32 = vld [vmem:[%s7213_s4 + $0x12c] ss:$16 sps:$4 sm:$0xff]  }
 0x13c   :  { %2417 = vmatpush2.bf16.msra.mxu0 %v5525_v16  ;;  %v5579_v16 = vld [vmem:[%s7213_s4 + $0x1e8] ss:$16 sps:$4 sm:$0xff]  }
 0x13d   :  { %2418 = vmatprep.subr.bf16.mxu0 %v5530_v17  ;;  %2458 = vmatpush2.bf16.msra.mxu1 %v5618_v33  ;;  %v5587_v17 = vld [vmem:[%s7213_s4 + $0x1cc] ss:$16 sps:$4 sm:$0xff]  }
 0x13e   :  { %2459 = vmatprep.subr.bf16.mxu1 %v5626_v37  ;;  %v5623_v37 = vld [vmem:[%s7213_s4 + $0x10c] ss:$16 sps:$4 sm:$0xff]  }
 0x140   :  { %2419 = vmatpush2.bf16.msra.mxu0 %v5528_v21  ;;  %v5591_v21 = vld [vmem:[%s7213_s4 + $0x1a8] ss:$16 sps:$4 sm:$0xff]  }
 0x141   :  { %2470 = vmatprep.subr.bf16.mxu0 %v5533_v22  ;;  %2460 = vmatpush2.bf16.msra.mxu1 %v5624_v38  ;;  %v5599_v22 = vld [vmem:[%s7213_s4 + $0x18c] ss:$16 sps:$4 sm:$0xff]  }
 0x142   :  { %2511 = vmatprep.subr.bf16.mxu1 %v5629_v39 }
 0x143   :  { %v1378_v28 = vpop.f32.mrf.mxu0 }
 0x144   :  { %v1419_v29 = vpop.f32.mrf.mxu1  ;;  %v1379_v3 = vadd.f32 %v1378_v28, %v313_v43  ;;  %v5611_v28 = vld [vmem:[%s7213_s4 + $0x14c] ss:$16 sps:$4 sm:$0xff]  }
 0x145   :  { %v1380_v30 = vpop.f32.mrf.mxu0 }
 0x146   :  { %v1421_v31 = vpop.f32.mrf.mxu1  ;;  %v1381_v23 = vadd.f32 %v1380_v30, %v317_v44  ;;  %v1420_v45 = vadd.f32 %v1419_v29, %v1379_v3  ;;  %v324_v29 = vsub.s32 3, %v6176_v42  ;;  %v321_v30 = vrot.slane %v6416_v40, %v320_v26 }
 0x147   :  { %v1382_v34 = vpop.f32.mrf.mxu0 }
 0x148   :  { %v1423_v18 = vpop.f32.mrf.mxu1  ;;  %v1422_v48 = vadd.f32 %v1421_v31, %v1381_v23  ;;  %v5609_v31 = vld [vmem:[%s7213_s4 + $0x148] ss:$16 sps:$4 sm:$0xff]   ;;  %v325_v33 = vrot.slane %v6416_v40, %v324_v29 }
 0x149   :  { %v1383_v63 = vpop.f32.mrf.mxu0  ;;  %v5615_v18 = vld [vmem:[%s7213_s4 + $0x128] ss:$16 sps:$4 sm:$0xff]  }
 0x14a   :  { %v1424_v35 = vpop.f32.mrf.mxu1  ;;  %v5621_v23 = vld [vmem:[%s7213_s4 + $0x108] ss:$16 sps:$4 sm:$0xff]  }
 0x183   :  { %v1460_v46 = vpop.f32.mrf.mxu0 }
 0x184   :  { %v6425_v47 = vpop.f32.mrf.mxu1  ;;  %v1461_v49 = vadd.f32 %v1460_v46, %v1420_v45 }
 0x185   :  { %v1462_v50 = vpop.f32.mrf.mxu0  ;;  %v1502_v34 = vadd.f32 %v6425_v47, %v321_v30  ;;  %v5665_v30 = vld [vmem:[%s7213_s4 + $0x36c] ss:$16 sps:$4 sm:$0xff]  }
 0x186   :  { %v6427_v51 = vpop.f32.mrf.mxu1  ;;  %v1463_v52 = vadd.f32 %v1462_v50, %v1422_v48  ;;  %v1590_v53 = vmax.f32 %v1461_v49, 0.0 }
 0x187   :  { %v1464_v54 = vpop.f32.mrf.mxu0  ;;  %v1504_v38 = vadd.f32 %v6427_v51, %v325_v33  ;;  %v5666_v33 = vld [vmem:[%s7213_s4 + $0x348] ss:$16 sps:$4 sm:$0xff]  }
 0x188   :  { %v1505_v55 = vpop.f32.mrf.mxu1  ;;  %v1591_v56 = vmax.f32 %v1463_v52, 0.0  ;;  %v6432_v61 = vpack.c.bf16 %v1590_v53, %v1590_v53  ;;  %v5627_v53 = vld [vmem:[%s7213_s4 + $0x2e8] ss:$16 sps:$4 sm:$0xff]  }
 0x189   :  { %v1465_v57 = vpop.f32.mrf.mxu0  ;;  %v5632_v55 = vld [vmem:[%s7213_s4 + $0x2cc] ss:$16 sps:$4 sm:$0xff]  }
 0x18a   :  { %v1506_v58 = vpop.f32.mrf.mxu1  ;;  %v1595_v59 = vpack.c.bf16 %v1591_v56, %v1591_v56  ;;  %v5630_v56 = vld [vmem:[%s7213_s4 + $0x2c8] ss:$16 sps:$4 sm:$0xff]   ;;  %v5635_v57 = vld [vmem:[%s7213_s4 + $0x2ac] ss:$16 sps:$4 sm:$0xff]  }
 0x18b   :  { %v5675_v58 = vld [vmem:[%s7215_s6 + $0x78] sm:$0xff]  }
 0x18c   :  { %2420 = vmatprep.mubr.bf16.mxu0 %v1595_v59 }
 0x18d   :  { %2421 = vmatmul.mubr.bf16.vlgmr.msra.gmra.mxu0 %v6432_v61 }
 0x18e   :  { %2471 = vmatpush1.bf16.msra.mxu0 %v5531_v60  ;;  %2502 = vmatprep.mubr.bf16.mxu0 %v1595_v59  ;;  %v5676_v59 = vld [vmem:[%s7215_s6 + $0x38] sm:$0xff]   ;;  %v5677_v60 = vld [vmem:[%s7215_s6 + $0x70] sm:$0xff]  }
 0x18f   :  { %2472 = vmatprep.subr.bf16.mxu0 %v5539_v62  ;;  %v5638_v62 = vld [vmem:[%s7213_s4 + $0x28c] ss:$16 sps:$4 sm:$0xff]  }
 0x192   :  { %2473 = vmatpush1.bf16.msra.mxu0 %v5537_v0  ;;  %v5678_v0 = vld [vmem:[%s7215_s6 + $0x30] sm:$0xff]  }
 0x193   :  { %2474 = vmatprep.subr.bf16.mxu0 %v5545_v1  ;;  %v5679_v1 = vld [vmem:[%s7215_s6 + $0x68] sm:$0xff]  }
 0x196   :  { %2475 = vmatpush1.bf16.msra.mxu0 %v5543_v2  ;;  %v5636_v2 = vld [vmem:[%s7213_s4 + $0x288] ss:$16 sps:$4 sm:$0xff]  }
 0x197   :  { %2476 = vmatprep.subr.bf16.mxu0 %v5551_v4  ;;  %v5641_v4 = vld [vmem:[%s7213_s4 + $0x26c] ss:$16 sps:$4 sm:$0xff]  }
 0x19a   :  { %2477 = vmatpush1.bf16.msra.mxu0 %v5549_v5  ;;  %v5680_v5 = vld [vmem:[%s7215_s6 + $0x28] sm:$0xff]  }
 0x19b   :  { %2478 = vmatprep.subr.bf16.mxu0 %v5557_v6  ;;  %v5681_v6 = vld [vmem:[%s7215_s6 + $0x60] sm:$0xff]  }
 0x19e   :  { %2479 = vmatpush1.bf16.msra.mxu0 %v5555_v7  ;;  %v5639_v7 = vld [vmem:[%s7213_s4 + $0x268] ss:$16 sps:$4 sm:$0xff]  }
 0x19f   :  { %2480 = vmatprep.subr.bf16.mxu0 %v5563_v8  ;;  %v5644_v8 = vld [vmem:[%s7213_s4 + $0x24c] ss:$16 sps:$4 sm:$0xff]  }
 0x1a2   :  { %2481 = vmatpush1.bf16.msra.mxu0 %v5561_v9  ;;  %v5682_v9 = vld [vmem:[%s7215_s6 + $0x20] sm:$0xff]  }
 0x1a3   :  { %2482 = vmatprep.subr.bf16.mxu0 %v5569_v10  ;;  %v5683_v10 = vld [vmem:[%s7215_s6 + $0x58] sm:$0xff]  }
 0x1a6   :  { %2483 = vmatpush1.bf16.msra.mxu0 %v5567_v11  ;;  %v5642_v11 = vld [vmem:[%s7213_s4 + $0x248] ss:$16 sps:$4 sm:$0xff]  }
 0x1a7   :  { %2484 = vmatprep.subr.bf16.mxu0 %v5575_v12  ;;  %v5647_v12 = vld [vmem:[%s7213_s4 + $0x22c] ss:$16 sps:$4 sm:$0xff]  }
 0x1aa   :  { %2485 = vmatpush1.bf16.msra.mxu0 %v5573_v14  ;;  %v5684_v14 = vld [vmem:[%s7215_s6 + $0x18] sm:$0xff]  }
 0x1ab   :  { %2486 = vmatprep.subr.bf16.mxu0 %v5581_v15  ;;  %v5645_v15 = vld [vmem:[%s7213_s4 + $0x228] ss:$16 sps:$4 sm:$0xff]  }
 0x1ae   :  { %2487 = vmatpush2.bf16.msra.mxu0 %v5579_v16  ;;  %v5650_v16 = vld [vmem:[%s7213_s4 + $0x20c] ss:$16 sps:$4 sm:$0xff]  }
 0x1af   :  { %2488 = vmatprep.subr.bf16.mxu0 %v5587_v17  ;;  %v5648_v17 = vld [vmem:[%s7213_s4 + $0x208] ss:$16 sps:$4 sm:$0xff]  }
 0x1b2   :  { %2489 = vmatpush2.bf16.msra.mxu0 %v5585_v19  ;;  %v5653_v19 = vld [vmem:[%s7213_s4 + $0x3ec] ss:$16 sps:$4 sm:$0xff]  }
 0x1b3   :  { %2490 = vmatprep.subr.bf16.mxu0 %v5593_v20  ;;  %v5651_v20 = vld [vmem:[%s7213_s4 + $0x3e8] ss:$16 sps:$4 sm:$0xff]  }
 0x1b6   :  { %2491 = vmatpush2.bf16.msra.mxu0 %v5591_v21  ;;  %v5656_v21 = vld [vmem:[%s7213_s4 + $0x3cc] ss:$16 sps:$4 sm:$0xff]  }
 0x1b7   :  { %2492 = vmatprep.subr.bf16.mxu0 %v5599_v22  ;;  %v5654_v22 = vld [vmem:[%s7213_s4 + $0x3c8] ss:$16 sps:$4 sm:$0xff]  }
 0x1ba   :  { %2493 = vmatpush2.bf16.msra.mxu0 %v5597_v24  ;;  %v5659_v24 = vld [vmem:[%s7213_s4 + $0x3ac] ss:$16 sps:$4 sm:$0xff]  }
 0x1bb   :  { %2494 = vmatprep.subr.bf16.mxu0 %v5605_v25  ;;  %v5657_v25 = vld [vmem:[%s7213_s4 + $0x3a8] ss:$16 sps:$4 sm:$0xff]  }
 0x1be   :  { %2495 = vmatpush2.bf16.msra.mxu0 %v5603_v27  ;;  %v5662_v27 = vld [vmem:[%s7213_s4 + $0x38c] ss:$16 sps:$4 sm:$0xff]  }
 0x1bf   :  { %2496 = vmatprep.subr.bf16.mxu0 %v5611_v28  ;;  %v5660_v28 = vld [vmem:[%s7213_s4 + $0x388] ss:$16 sps:$4 sm:$0xff]  }
 0x1c2   :  { %2497 = vmatpush2.bf16.msra.mxu0 %v5609_v31  ;;  %v5663_v31 = vld [vmem:[%s7213_s4 + $0x368] ss:$16 sps:$4 sm:$0xff]  }
 0x1c3   :  { %v1542_v63 = vpop.f32.mrf.mxu0  ;;  %2498 = vmatprep.subr.bf16.mxu0 %v5617_v32  ;;  %v5668_v32 = vld [vmem:[%s7213_s4 + $0x34c] ss:$16 sps:$4 sm:$0xff]  }
 0x1c4   :  { %v1583_v35 = vpop.f32.mrf.mxu1  ;;  %v1543_v39 = vadd.f32 %v1542_v63, %v1502_v34  ;;  %v5671_v34 = vld [vmem:[%s7213_s4 + $0x32c] ss:$16 sps:$4 sm:$0xff]  }
 0x1c5   :  { %v1544_v43 = vpop.f32.mrf.mxu0  ;;  %v5674_v63 = vld [vmem:[%s7213_s4 + $0x30c] ss:$16 sps:$4 sm:$0xff]  }
 0x1c6   :  { %v1585_v44 = vpop.f32.mrf.mxu1  ;;  %v1584_v40 = vadd.f32 %v1583_v35, %v1543_v39  ;;  %v1545_v3 = vadd.f32 %v1544_v43, %v1504_v38  ;;  %2499 = vmatpush2.bf16.msra.mxu0 %v5615_v18  ;;  %v5669_v18 = vld [vmem:[%s7213_s4 + $0x328] ss:$16 sps:$4 sm:$0xff]   ;;  %v5686_v38 = vld [vmem:[%s7215_s6 + $0x10] sm:$0xff]  }
 0x1c7   :  { %v1546_v45 = vpop.f32.mrf.mxu0  ;;  %2500 = vmatprep.subr.bf16.mxu0 %v5623_v37  ;;  %v5672_v35 = vld [vmem:[%s7213_s4 + $0x308] ss:$16 sps:$4 sm:$0xff]   ;;  %v5685_v37 = vld [vmem:[%s7215_s6 + $0x50] sm:$0xff]  }
 0x1c8   :  { %v1587_v46 = vpop.f32.mrf.mxu1  ;;  %v1586_v47 = vadd.f32 %v1585_v44, %v1545_v3  ;;  %v1592_v48 = vmax.f32 %v1584_v40, 0.0  ;;  %v5687_v39 = vld [vmem:[%s7215_s6 + $0x48] sm:$0xff]   ;;  %v5689_v44 = vld [vmem:[%s7215_s6 + $0x40] sm:$0xff]   ;;  %v5691_v3 = vld [vmem:[%s7215_s6 + $0xf8] sm:$0xff]  }
 0x1c9   :  { %v1547_v49 = vpop.f32.mrf.mxu0  ;;  %v5688_v43 = vld [vmem:[%s7215_s6 + $0x8] sm:$0xff]   ;;  %v5690_v40 = vld [vmem:[%s7215_s6] sm:$0xff]   ;;  %v5693_v45 = vld [vmem:[%s7215_s6 + $0xf0] sm:$0xff]  }
 0x1ca   :  { %v1588_v50 = vpop.f32.mrf.mxu1  ;;  %v1593_v52 = vmax.f32 %v1586_v47, 0.0  ;;  %2501 = vmatpush2.bf16.msra.mxu0 %v5621_v23  ;;  %v6538_v54 = vpack.c.bf16 %v1592_v48, %v1592_v48  ;;  %v5692_v23 = vld [vmem:[%s7215_s6 + $0xb8] sm:$0xff]   ;;  %v5694_v46 = vld [vmem:[%s7215_s6 + $0xb0] sm:$0xff]   ;;  %v5695_v47 = vld [vmem:[%s7215_s6 + $0xe8] sm:$0xff]  }
 0x1cb   :  { %5082 = vmatprep.subr.bf16.mxu0 %v5675_v58  ;;  %v5696_v48 = vld [vmem:[%s7215_s6 + $0xa8] sm:$0xff]   ;;  %v5697_v49 = vld [vmem:[%s7215_s6 + $0xe0] sm:$0xff]  }
 0x1cc   :  { %v1597_v51 = vpack.c.bf16 %v1593_v52, %v1593_v52  ;;  %v5698_v50 = vld [vmem:[%s7215_s6 + $0xa0] sm:$0xff]   ;;  %v5699_v52 = vld [vmem:[%s7215_s6 + $0xd8] sm:$0xff]   ;;  %v5704_v58 = vld [vmem:[%s7215_s6 + $0x88] sm:$0xff]  }
 0x1cd   :  { %2503 = vmatmul.mubr.bf16.vlgmr.msra.gmra.mxu0 %v6432_v61  ;;  %v5633_v61 = vld [vmem:[%s7213_s4 + $0x2a8] ss:$16 sps:$4 sm:$0xff]  }
 0x1ce   :  { %2461 = vmatprep.mubr.bf16.mxu1 %v1597_v51  ;;  %5083 = vmatpush3.bf16.msra.mxu0 %v5676_v59 }
 0x1cf   :  { %2462 = vmatmul.mubr.bf16.vlgmr.msra.gmra.mxu1 %v6538_v54  ;;  %5084 = vmatprep.subr.bf16.mxu0 %v5677_v60 }
 0x1d0   :  { %2512 = vmatpush1.bf16.msra.mxu1 %v5627_v53  ;;  %2543 = vmatprep.mubr.bf16.mxu1 %v1597_v51  ;;  %v5700_v51 = vld [vmem:[%s7215_s6 + $0x98] sm:$0xff]   ;;  %v5701_v53 = vld [vmem:[%s7215_s6 + $0xd0] sm:$0xff]  }
 0x1d1   :  { %2513 = vmatprep.subr.bf16.mxu1 %v5632_v55 }
 0x1d2   :  { %5085 = vmatpush3.bf16.msra.mxu0 %v5678_v0  ;;  %v1726_v0 = vld [vmem:[%s7214_s5] sm:$0xf] }
 0x1d3   :  { %5086 = vmatprep.subr.bf16.mxu0 %v5679_v1  ;;  %v1731_v1 = vrot.slane %v1726_v0, %v6411_v13 }
 0x1d4   :  { %2514 = vmatpush1.bf16.msra.mxu1 %v5630_v56 }
 0x1d5   :  { %2515 = vmatprep.subr.bf16.mxu1 %v5635_v57  ;;  %v5703_v57 = vld [vmem:[%s7215_s6 + $0xc8] sm:$0xff]  }
 0x1d6   :  { %5087 = vmatpush3.bf16.msra.mxu0 %v5680_v5 }
 0x1d7   :  { %5088 = vmatprep.subr.bf16.mxu0 %v5681_v6 }
 0x1d8   :  { %2516 = vmatpush1.bf16.msra.mxu1 %v5633_v61  ;;  %v5705_v61 = vld [vmem:[%s7215_s6 + $0xc0] sm:$0xff]  }
 0x1d9   :  { %2517 = vmatprep.subr.bf16.mxu1 %v5638_v62  ;;  %v5706_v62 = vld [vmem:[%s7215_s6 + $0x80] sm:$0xff]  }
 0x1da   :  { %5089 = vmatpush3.bf16.msra.mxu0 %v5682_v9 }
 0x1db   :  { %5090 = vmatprep.subr.bf16.mxu0 %v5683_v10 }
 0x1dc   :  { %2518 = vmatpush1.bf16.msra.mxu1 %v5636_v2  ;;  %v1735_v2 = vrot.slane %v1726_v0, %v6419_v41 }
 0x1dd   :  { %2519 = vmatprep.subr.bf16.mxu1 %v5641_v4 }
 0x1de   :  { %5091 = vmatpush3.bf16.msra.mxu0 %v5684_v14 }
 0x1df   :  { %5092 = vmatprep.subr.bf16.mxu0 %v5685_v37 }
 0x1e0   :  { %2520 = vmatpush1.bf16.msra.mxu1 %v5639_v7 }
 0x1e1   :  { %2521 = vmatprep.subr.bf16.mxu1 %v5644_v8 }
 0x1e2   :  { %5093 = vmatpush3.bf16.msra.mxu0 %v5686_v38  ;;  %v6738_v38 = vld [vmem:[#allocation7 + $0x34] ss:$8 sps:$4 sm:$0xff]  }
 0x1e3   :  { %5094 = vmatprep.subr.bf16.mxu0 %v5687_v39  ;;  %v5710_v39 = vld [vmem:[#allocation5 + $0x30] ss:$8 sps:$4 sm:$0xff]  }
 0x1e4   :  { %2522 = vmatpush1.bf16.msra.mxu1 %v5642_v11 }
 0x1e5   :  { %2523 = vmatprep.subr.bf16.mxu1 %v5647_v12 }
 0x1e6   :  { %5095 = vmatpush3.bf16.msra.mxu0 %v5688_v43  ;;  %v6742_v43 = vld [vmem:[#allocation7 + $0x24] ss:$8 sps:$4 sm:$0xff]  }
 0x1e7   :  { %5096 = vmatprep.subr.bf16.mxu0 %v5689_v44  ;;  %v5718_v44 = vld [vmem:[#allocation5 + $0x24] ss:$8 sps:$4 sm:$0xff]  }
 0x1e8   :  { %2524 = vmatpush1.bf16.msra.mxu1 %v5645_v15 }
 0x1e9   :  { %2525 = vmatprep.subr.bf16.mxu1 %v5650_v16 }
 0x1ea   :  { %5097 = vmatpush3.bf16.msra.mxu0 %v5690_v40  ;;  %v6746_v40 = vld [vmem:[#allocation7 + $0x20] ss:$8 sps:$4 sm:$0xff]  }
 0x1ec   :  { %2526 = vmatpush1.bf16.msra.mxu1 %v5648_v17 }
 0x1ed   :  { %2527 = vmatprep.subr.bf16.mxu1 %v5653_v19 }
 0x1f0   :  { %2528 = vmatpush2.bf16.msra.mxu1 %v5651_v20 }
 0x1f1   :  { %2529 = vmatprep.subr.bf16.mxu1 %v5656_v21 }
 0x1f4   :  { %2530 = vmatpush2.bf16.msra.mxu1 %v5654_v22  ;;  %v1739_v22 = vrot.slane %v1726_v0, %v320_v26  ;;  %v6740_v26 = vld [vmem:[#allocation7 + $0x30] ss:$8 sps:$4 sm:$0xff]  }
 0x1f5   :  { %2531 = vmatprep.subr.bf16.mxu1 %v5659_v24  ;;  %v1743_v24 = vrot.slane %v1726_v0, %v324_v29  ;;  %v5712_v29 = vld [vmem:[#allocation5 + $0x34] ss:$8 sps:$4 sm:$0xff]   ;;  %v2903_v0 = vld [vmem:[%s7210_s1] sm:$0x3] }
 0x1f6   :  { %2978 = vmatprep.subr.bf16.mxu0 %v5712_v29 }
 0x1f8   :  { %2532 = vmatpush2.bf16.msra.mxu1 %v5657_v25 }
 0x1f9   :  { %2533 = vmatprep.subr.bf16.mxu1 %v5662_v27 }
 0x1fc   :  { %2534 = vmatpush2.bf16.msra.mxu1 %v5660_v28 }
 0x1fd   :  { %2535 = vmatprep.subr.bf16.mxu1 %v5665_v30 }
 0x200   :  { %2536 = vmatpush2.bf16.msra.mxu1 %v5663_v31 }
 0x201   :  { %2537 = vmatprep.subr.bf16.mxu1 %v5668_v32 }
 0x204   :  { %2538 = vmatpush2.bf16.msra.mxu1 %v5666_v33 }
 0x205   :  { %2539 = vmatprep.subr.bf16.mxu1 %v5671_v34 }
 0x208   :  { %2540 = vmatpush2.bf16.msra.mxu1 %v5669_v18 }
 0x209   :  { %2541 = vmatprep.subr.bf16.mxu1 %v5674_v63 }
 0x20c   :  { %2542 = vmatpush2.bf16.msra.mxu1 %v5672_v35 }
 0x20d   :  { %5104 = vmatprep.subr.bf16.mxu1 %v5691_v3  ;;  %v5716_v3 = vld [vmem:[#allocation5 + $0x20] ss:$8 sps:$4 sm:$0xff]  }
 0x20f   :  { %2544 = vmatmul.mubr.bf16.vlgmr.msra.gmra.mxu1 %v6538_v54  ;;  %v5702_v54 = vld [vmem:[%s7215_s6 + $0x90] sm:$0xff]  }
 0x210   :  { %5105 = vmatpush3.bf16.msra.mxu1 %v5692_v23  ;;  %v6749_v23 = vld [vmem:[#allocation7 + $0x14] ss:$8 sps:$4 sm:$0xff]  }
 0x211   :  { %5106 = vmatprep.subr.bf16.mxu1 %v5693_v45  ;;  %v6753_v45 = vld [vmem:[#allocation7 + $0x10] ss:$8 sps:$4 sm:$0xff]  }
 0x214   :  { %5107 = vmatpush3.bf16.msra.mxu1 %v5694_v46  ;;  %v5724_v46 = vld [vmem:[#allocation5 + $0x14] ss:$8 sps:$4 sm:$0xff]  }
 0x215   :  { %5108 = vmatprep.subr.bf16.mxu1 %v5695_v47  ;;  %v6756_v47 = vld [vmem:[#allocation7 + $0x4] ss:$8 sps:$4 sm:$0xff]  }
 0x218   :  { %5109 = vmatpush3.bf16.msra.mxu1 %v5696_v48  ;;  %v5722_v48 = vld [vmem:[#allocation5 + $0x10] ss:$8 sps:$4 sm:$0xff]  }
 0x219   :  { %5110 = vmatprep.subr.bf16.mxu1 %v5697_v49  ;;  %v6758_v49 = vld [vmem:[#allocation7] ss:$8 sps:$4 sm:$0xff]  }
 0x21c   :  { %5111 = vmatpush3.bf16.msra.mxu1 %v5698_v50  ;;  %v5730_v50 = vld [vmem:[#allocation5 + $0x4] ss:$8 sps:$4 sm:$0xff]  }
 0x21d   :  { %5112 = vmatprep.subr.bf16.mxu1 %v5699_v52  ;;  %v6072_v52 = vmov 0  }
 0x220   :  { %5113 = vmatpush3.bf16.msra.mxu1 %v5700_v51  ;;  %v5728_v51 = vld [vmem:[#allocation5] ss:$8 sps:$4 sm:$0xff]  }
 0x221   :  { %5114 = vmatprep.subr.bf16.mxu1 %v5701_v53 }
 0x224   :  { %5115 = vmatpush3.bf16.msra.mxu1 %v5702_v54 }
 0x225   :  { %5116 = vmatprep.subr.bf16.mxu1 %v5703_v57 }
 0x228   :  { %5117 = vmatpush3.bf16.msra.mxu1 %v5704_v58  ;;  %v4970_v58 = vld [vmem:[%s7216_s7] ss:$0 sm:$0xff] }
 0x229   :  { %5118 = vmatprep.subr.bf16.mxu1 %v5705_v61 }
 0x22c   :  { %5119 = vmatpush3.bf16.msra.mxu1 %v5706_v62 }
 0x22d   :  { %3074 = vmatprep.subr.bf16.mxu1 %v6738_v38 }
 0x24d   :  { %v2422_v55 = vpop.f32.mrf.mxu0 }
 0x24e   :  { %v2423_v5 = vadd.f32 %v2422_v55, %v1731_v1 }
 0x24f   :  { %v2424_v56 = vpop.f32.mrf.mxu0 }
 0x250   :  { %v2425_v8 = vadd.f32 %v2424_v56, %v1735_v2 }
 0x251   :  { %v2426_v59 = vpop.f32.mrf.mxu0 }
 0x253   :  { %v2427_v60 = vpop.f32.mrf.mxu0 }
 0x28d   :  { %v2504_v4 = vpop.f32.mrf.mxu0 }
 0x28e   :  { %v2505_v25 = vadd.f32 %v2504_v4, %v1739_v22 }
 0x28f   :  { %v2506_v6 = vpop.f32.mrf.mxu0  ;;  %v2463_v7 = vpop.f32.mrf.mxu1 }
 0x290   :  { %v2464_v9 = vadd.f32 %v2463_v7, %v2423_v5  ;;  %v2507_v28 = vadd.f32 %v2506_v6, %v1743_v24 }
 0x291   :  { %v2508_v10 = vpop.f32.mrf.mxu0  ;;  %v2465_v11 = vpop.f32.mrf.mxu1 }
 0x292   :  { %v2466_v12 = vadd.f32 %v2465_v11, %v2425_v8  ;;  %v2552_v14 = vmax.f32 %v2464_v9, 0.0  ;;  %v2914_v11 = vld [vmem:[%s7219_s10] sm:$0x3] }
 0x293   :  { %v2509_v15 = vpop.f32.mrf.mxu0  ;;  %v2467_v16 = vpop.f32.mrf.mxu1  ;;  %v2923_v22 = vrot.slane %v2914_v11, %v6419_v41 }
 0x294   :  { %v2553_v17 = vmax.f32 %v2466_v12, 0.0  ;;  %v2556_v21 = vpack.c.bf16 %v2552_v14, %v2552_v14  ;;  %v2919_v12 = vrot.slane %v2914_v11, %v6411_v13  ;;  %v6823_v11 = vld [vmem:[#allocation5 + $0x60] ss:$8 sps:$4 sm:$0xff]  }
 0x295   :  { %v2468_v19 = vpop.f32.mrf.mxu1 }
 0x296   :  { %v2557_v20 = vpack.c.bf16 %v2553_v17, %v2553_v17 }
 0x298   :  { %2855 = vmatprep.mubr.bf16.mxu0 %v2557_v20 }
 0x299   :  { %2856 = vmatmul.mubr.bf16.vlgmr.msra.gmra.mxu0 %v2556_v21 }
 0x29a   :  { %2979 = vmatpush1.bf16.msra.mxu0 %v5710_v39  ;;  %3002 = vmatprep.mubr.bf16.mxu0 %v6072_v52 }
 0x29b   :  { %2980 = vmatprep.subr.bf16.mxu0 %v5718_v44 }
 0x29e   :  { %2981 = vmatpush1.bf16.msra.mxu0 %v5716_v3 }
 0x29f   :  { %2982 = vmatprep.subr.bf16.mxu0 %v5724_v46 }
 0x2a2   :  { %2983 = vmatpush1.bf16.msra.mxu0 %v5722_v48 }
 0x2a3   :  { %2984 = vmatprep.subr.bf16.mxu0 %v5730_v50 }
 0x2a6   :  { %2985 = vmatpush1.bf16.msra.mxu0 %v5728_v51 }
 0x2a7   :  { %3152 = vmatprep.subr.bf16.mxu0 %v6738_v38 }
 0x2cf   :  { %v2545_v27 = vpop.f32.mrf.mxu1 }
 0x2d0   :  { %v2546_v30 = vadd.f32 %v2545_v27, %v2505_v25 }
 0x2d1   :  { %v2547_v31 = vpop.f32.mrf.mxu1 }
 0x2d2   :  { %v2548_v32 = vadd.f32 %v2547_v31, %v2507_v28  ;;  %v2554_v33 = vmax.f32 %v2546_v30, 0.0 }
 0x2d3   :  { %v2549_v34 = vpop.f32.mrf.mxu1 }
 0x2d4   :  { %v2555_v18 = vmax.f32 %v2548_v32, 0.0  ;;  %v2558_v37 = vpack.c.bf16 %v2554_v33, %v2554_v33 }
 0x2d5   :  { %v2550_v63 = vpop.f32.mrf.mxu1 }
 0x2d6   :  { %v2559_v35 = vpack.c.bf16 %v2555_v18, %v2555_v18 }
 0x2d8   :  { %2895 = vmatprep.mubr.bf16.mxu1 %v2559_v35 }
 0x2d9   :  { %2896 = vmatmul.mubr.bf16.vlgmr.msra.gmra.mxu1 %v2558_v37 }
 0x2da   :  { %3075 = vmatpush1.bf16.msra.mxu1 %v6740_v26  ;;  %3098 = vmatprep.mubr.bf16.mxu1 %v6072_v52 }
 0x2db   :  { %3076 = vmatprep.subr.bf16.mxu1 %v6742_v43 }
 0x2de   :  { %3077 = vmatpush1.bf16.msra.mxu1 %v6746_v40 }
 0x2df   :  { %3078 = vmatprep.subr.bf16.mxu1 %v6749_v23 }
 0x2e2   :  { %3079 = vmatpush1.bf16.msra.mxu1 %v6753_v45 }
 0x2e3   :  { %3080 = vmatprep.subr.bf16.mxu1 %v6756_v47 }
 0x2e6   :  { %3081 = vmatpush1.bf16.msra.mxu1 %v6758_v49 }
 0x2e9   :  { %3099 = vmatmul.mubr.bf16.vlgmr.msra.gmra.mxu1 %v6072_v52 }
 0x2ea   :  { %3325 = vmatprep.mubr.bf16.mxu1 %v6072_v52 }
 0x359   :  { %v5098_v53 = vpop.f32.mrf.mxu0 }
 0x35b   :  { %v5099_v54 = vpop.f32.mrf.mxu0 }
 0x35c   :  { %v5100_v57 = vadd.f32 %v5099_v54, %v5098_v53 }
 0x35d   :  { %v5101_v55 = vpop.f32.mrf.mxu0 }
 0x35e   :  { %v2858_v61 = vadd.f32 %v5100_v57, %v4970_v58 }
 0x35f   :  { %v5102_v56 = vpop.f32.mrf.mxu0 }
 0x399   :  { %v5120_v59 = vpop.f32.mrf.mxu1 }
 0x39b   :  { %v5121_v60 = vpop.f32.mrf.mxu1 }
 0x39c   :  { %v5122_v62 = vadd.f32 %v5121_v60, %v5120_v59 }
 0x39d   :  { %v5123_v1 = vpop.f32.mrf.mxu1 }
 0x39e   :  { %v2898_v2 = vadd.f32 %v5122_v62, %v2858_v61 }
 0x39f   :  { %v5124_v4 = vpop.f32.mrf.mxu1 }
 0x3a0   :  { %v2904_v5 = vadd.f32 %v2903_v0, %v2898_v2  ;;  %v6804_v4 = vld [vmem:[#allocation7 + $0x74] ss:$8 sps:$4 sm:$0xff]  }
 0x3a2   :  { %v2905_v6 = vpack.c.bf16 %v2904_v5, %v2904_v5  ;;  %v6806_v5 = vld [vmem:[#allocation7 + $0x70] ss:$8 sps:$4 sm:$0xff]  }
 0x3a4   :  { %5011 = vmatmul.mubr.msk.bf16.vlgmr.msra.gmra.mxu0 %vm2966_vm0, %v2905_v6  ;;  %v6808_v6 = vld [vmem:[#allocation5 + $0x70] ss:$8 sps:$4 sm:$0xff]  }
 0x3a5   :  { %3153 = vmatpush1.bf16.msra.mxu0 %v6740_v26  ;;  %3176 = vmatprep.mubr.bf16.mxu0 %v6072_v52 }
 0x3a6   :  { %3154 = vmatprep.subr.bf16.mxu0 %v6742_v43 }
 0x3a9   :  { %3155 = vmatpush1.bf16.msra.mxu0 %v6746_v40  ;;  %v3100_v7 = vpop.f32.mrf.mxu1 }
 0x3aa   :  { %3156 = vmatprep.subr.bf16.mxu0 %v6749_v23 }
 0x3ab   :  { %v3102_v8 = vpop.f32.mrf.mxu1 }
 0x3ad   :  { %3157 = vmatpush1.bf16.msra.mxu0 %v6753_v45  ;;  %v3104_v9 = vpop.f32.mrf.mxu1 }
 0x3ae   :  { %3158 = vmatprep.subr.bf16.mxu0 %v6756_v47  ;;  %v6815_v9 = vld [vmem:[#allocation5 + $0x64] ss:$8 sps:$4 sm:$0xff]  }
 0x3af   :  { %v3105_v10 = vpop.f32.mrf.mxu1 }
 0x3b0   :  { %v6819_v10 = vld [vmem:[#allocation7 + $0x60] ss:$8 sps:$4 sm:$0xff]  }
 0x3b1   :  { %3159 = vmatpush1.bf16.msra.mxu0 %v6758_v49 }
 0x3b2   :  { %3391 = vmatprep.subr.bf16.mxu0 %v6804_v4 }
 0x464   :  { %v3004_v14 = vpop.f32.mrf.mxu0 }
 0x465   :  { %v6786_v15 = vadd.f32 %v3004_v14, %v2919_v12  ;;  %v6825_v12 = vld [vmem:[#allocation7 + $0x54] ss:$8 sps:$4 sm:$0xff]  }
 0x466   :  { %v3006_v16 = vpop.f32.mrf.mxu0  ;;  %v6828_v14 = vld [vmem:[#allocation5 + $0x54] ss:$8 sps:$4 sm:$0xff]  }
 0x467   :  { %v3107_v17 = vadd.f32 %v3100_v7, %v6786_v15  ;;  %v6790_v24 = vadd.f32 %v3006_v16, %v2923_v22  ;;  %v6810_v7 = vld [vmem:[#allocation5 + $0x74] ss:$8 sps:$4 sm:$0xff]   ;;  %v6831_v16 = vld [vmem:[#allocation7 + $0x50] ss:$8 sps:$4 sm:$0xff]   ;;  %v6847_v22 = vld [vmem:[#allocation5 + $0x40] ss:$8 sps:$4 sm:$0xff]  }
 0x468   :  { %v3008_v19 = vpop.f32.mrf.mxu0  ;;  %3301 = vmatprep.subr.bf16.mxu1 %v6810_v7 }
 0x469   :  { %v5020_v20 = vmul.f32 -1.442695, %v3107_v17  ;;  %v3108_v25 = vadd.f32 %v3102_v8, %v6790_v24  ;;  %v6812_v8 = vld [vmem:[#allocation7 + $0x64] ss:$8 sps:$4 sm:$0xff]   ;;  %3302 = vmatpush1.bf16.msra.mxu1 %v6808_v6  ;;  %v6835_v17 = vld [vmem:[#allocation5 + $0x50] ss:$8 sps:$4 sm:$0xff]  }
 0x46a   :  { %v3009_v21 = vpop.f32.mrf.mxu0  ;;  %3303 = vmatprep.subr.bf16.mxu1 %v6815_v9  ;;  %v6837_v19 = vld [vmem:[#allocation7 + $0x44] ss:$8 sps:$4 sm:$0xff]  }
 0x46b   :  { %5759 = vpow2.f32 %v5020_v20  ;;  %v5021_v33 = vmul.f32 -1.442695, %v3108_v25  ;;  %v6840_v20 = vld [vmem:[#allocation5 + $0x44] ss:$8 sps:$4 sm:$0xff]   ;;  %v6843_v21 = vld [vmem:[#allocation7 + $0x40] ss:$8 sps:$4 sm:$0xff]  }
 0x46c   :  { %5761 = vtanh.f32 %v3108_v25 }
 0x46d   :  { %3304 = vmatpush1.bf16.msra.mxu1 %v6823_v11 }
 0x46e   :  { %3305 = vmatprep.subr.bf16.mxu1 %v6828_v14 }
 0x471   :  { %3306 = vmatpush1.bf16.msra.mxu1 %v6835_v17 }
 0x472   :  { %3307 = vmatprep.subr.bf16.mxu1 %v6840_v20 }
 0x475   :  { %3308 = vmatpush1.bf16.msra.mxu1 %v6847_v22 }
 0x476   :  { %3468 = vmatprep.subr.bf16.mxu1 %v6804_v4 }
 0x478   :  { %v5760_v27 = vpop.eup %5759 }
 0x479   :  { %v3112_v28 = vadd.f32 1.0, %v5760_v27  ;;  %v5762_v30 = vpop.eup %5761 }
 0x47b   :  { %5763 = vrcp.f32 %v3112_v28 }
 0x47c   :  { %5765 = vpow2.f32 %v5021_v33 }
 0x488   :  { %v5764_v31 = vpop.eup %5763 }
 0x489   :  { %v3123_v32 = vmul.f32 %v5764_v31, %v5762_v30  ;;  %v5766_v34 = vpop.eup %5765  ;;  %v3122_v63 = vmul.f32 0.0, %v5764_v31 }
 0x48a   :  { %v3119_v18 = vadd.f32 1.0, %v5766_v34 }
 0x48b   :  { %3125 = vrot.lane.b32.xlu0 %v3123_v32, %s6064_s23 }
 0x48c   :  { %5767 = vrcp.f32 %v3119_v18 }
 0x499   :  { %v5768_v39 = vpop.eup %5767 }
 0x4fd   :  { %v3126_v35 = vpop.permute.xlu0 %3125 }
 0x4fe   :  { %v3128_v37 = vadd.f32 %v3126_v35, %v3122_v63 }
 0x500   :  { %5769 = vtanh.f32 %v3128_v37  ;;  %v3207_v62 = vrot.slane %v3128_v37, 7 }
 0x50d   :  { %v5770_v29 = vpop.eup %5769 }
 0x50e   :  { %v6794_v44 = vmul.f32 %v5770_v29, %v5768_v39 }
 0x510   :  { %v3137_v3 = vpack.c.bf16 %v6794_v44, %v6794_v44  ;;  %v3135_v34 = vrot.slane %v6794_v44, %v6411_v13 }
 0x512   :  { %3139 = vrot.lane.b32.xlu0 %v3137_v3, %s6064_s23  ;;  %v3136_v35 = vsel %vm3131_vm1, %v3135_v34, 0.0 }
 0x584   :  { %v3140_v46 = vpop.permute.xlu0 %3139 }
 0x585   :  { %5022 = vmatmul.mubr.msk.bf16.vlgmr.msra.gmra.mxu0 %vm2966_vm0, %v3140_v46 }
 0x586   :  { %3415 = vmatprep.mubr.bf16.mxu0 %v6072_v52  ;;  %3392 = vmatpush1.bf16.msra.mxu0 %v6806_v5 }
 0x587   :  { %3393 = vmatprep.subr.bf16.mxu0 %v6812_v8 }
 0x58a   :  { %3394 = vmatpush1.bf16.msra.mxu0 %v6819_v10 }
 0x58b   :  { %3395 = vmatprep.subr.bf16.mxu0 %v6825_v12 }
 0x58e   :  { %3396 = vmatpush1.bf16.msra.mxu0 %v6831_v16 }
 0x58f   :  { %3397 = vmatprep.subr.bf16.mxu0 %v6837_v19 }
 0x592   :  { %3398 = vmatpush1.bf16.msra.mxu0 %v6843_v21 }
 0x595   :  { %3416 = vmatmul.mubr.bf16.vlgmr.msra.gmra.mxu0 %v6072_v52 }
 0x645   :  { %v3178_v48 = vpop.f32.mrf.mxu0 }
 0x646   :  { %v3187_v50 = vrot.slane %v3178_v48, 7 }
 0x647   :  { %v3180_v51 = vpop.f32.mrf.mxu0 }
 0x648   :  { %v3191_v53 = vadd.f32 %v3187_v50, %v6786_v15  ;;  %v3188_v57 = vrot.slane %v3180_v51, 7  ;;  %v5025_v50 = vld [vmem:[%s7219_s10 + $0x2] sm:$0x3]  ;;  %s6075_s10 = smov [#allocation12]  }
 0x649   :  { %v3182_v54 = vpop.f32.mrf.mxu0  ;;  %v6881_v51 = vrot.slane %v5025_v50, %v6411_v13  ;;  %s4635_s17 = sshll.u32 %s6075_s10, 4  ;;  %s4636_s17 = int_to_ptr.vmem [resolvable:$true] %s4635_s17 }
 0x64a   :  { %v5023_v55 = vmul.f32 -1.442695, %v3191_v53  ;;  %v3192_v58 = vadd.f32 %v3188_v57, %v6790_v24  ;;  %s6010_s28 = scalar_lea.vmem %s4636_s17, 128  ;;  %p6015_p12 = scmp.lt.s32.totalorder %s4636_s17, %s4636_s17 }
 0x64b   :  { %v3183_v56 = vpop.f32.mrf.mxu0  ;;  %p6011_p11 = scmp.ne.s32.totalorder %s4636_s17, %s6010_s28  ;;  %p6016_p13 = scmp.lt.s32.totalorder %s6010_s28, %s6010_s28 }
 0x64c   :  { %5771 = vpow2.f32 %v5023_v55  ;;  %v5024_v25 = vmul.f32 -1.442695, %v3192_v58 }
 0x64d   :  { %5773 = vtanh.f32 %v3192_v58  ;;  %p6017_p0 = por %p6016_p13, %p6015_p12 }
 0x64f   :  { %p6018_p1 = pnand %p6017_p0, %p6011_p11 }
 0x655   :  { %v3417_v29 = vpop.f32.mrf.mxu0 }
 0x657   :  { %v3419_v3 = vpop.f32.mrf.mxu0 }
 0x659   :  { %v5772_v59 = vpop.eup %5771  ;;  %v3421_v46 = vpop.f32.mrf.mxu0 }
 0x65a   :  { %v3196_v60 = vadd.f32 1.0, %v5772_v59  ;;  %v5774_v61 = vpop.eup %5773 }
 0x65b   :  { %v3422_v44 = vpop.f32.mrf.mxu0 }
 0x65c   :  { %5775 = vrcp.f32 %v3196_v60  ;;  %v6885_v60 = vrot.slane %v5025_v50, %v6419_v41 }
 0x65d   :  { %5777 = vpow2.f32 %v5024_v25 }
 0x669   :  { %v5776_v0 = vpop.eup %5775 }
 0x66a   :  { %v3210_v1 = vmul.f32 %v5776_v0, %v5774_v61  ;;  %v3209_v2 = vmul.f32 %v5776_v0, %v3207_v62  ;;  %v5778_v27 = vpop.eup %5777 }
 0x66b   :  { %v3203_v28 = vadd.f32 1.0, %v5778_v27 }
 0x66c   :  { %3212 = vrot.lane.b32.xlu1 %v3210_v1, %s6064_s23 }
 0x66d   :  { %5779 = vrcp.f32 %v3203_v28 }
 0x67a   :  { %v5780_v32 = vpop.eup %5779 }
 0x6de   :  { %v3213_v30 = vpop.permute.xlu1 %3212 }
 0x6df   :  { %v6854_v31 = vadd.f32 %v3213_v30, %v3209_v2 }
 0x6e1   :  { %5781 = vtanh.f32 %v6854_v31 }
 0x6ee   :  { %v5782_v33 = vpop.eup %5781 }
 0x6ef   :  { %v3217_v18 = vmul.f32 %v5782_v33, %v5780_v32 }
 0x6f1   :  { %v3222_v63 = vrot.slane %v3217_v18, %v6419_v41  ;;  %v3656_v28 = vpack.c.bf16 %v3217_v18, %v3217_v18 }
 0x6f3   :  { %v3223_v37 = vsel %vm3218_vm2, %v3222_v63, %v3136_v35  ;;  %v3658_v30 = vshrl.u32 %v3656_v28, 16 }
 0x6f4   :  { %v3224_v39 = vpack.c.bf16 %v3223_v37, %v3223_v37 }
 0x6f6   :  { %3248 = vrot.lane.b32.xlu1 %v3224_v39, %s6064_s23 }
 0x768   :  { %v3249_v48 = vpop.permute.xlu1 %3248 }
 0x769   :  { %5034 = vmatmul.mubr.msk.bf16.vlgmr.msra.gmra.mxu1 %vm2966_vm0, %v3249_v48 }
 0x76a   :  { %3469 = vmatpush1.bf16.msra.mxu1 %v6806_v5  ;;  %3492 = vmatprep.mubr.bf16.mxu1 %v6072_v52 }
 0x76b   :  { %3470 = vmatprep.subr.bf16.mxu1 %v6812_v8 }
 0x76e   :  { %3471 = vmatpush1.bf16.msra.mxu1 %v6819_v10 }
 0x76f   :  { %3472 = vmatprep.subr.bf16.mxu1 %v6825_v12 }
 0x772   :  { %3473 = vmatpush1.bf16.msra.mxu1 %v6831_v16 }
 0x773   :  { %3474 = vmatprep.subr.bf16.mxu1 %v6837_v19 }
 0x776   :  { %3475 = vmatpush1.bf16.msra.mxu1 %v6843_v21 }
 0x777   :  { %3673 = vmatprep.subr.bf16.mxu1 %v6738_v38 }
 0x829   :  { %v3327_v53 = vpop.f32.mrf.mxu1 }
 0x82a   :  { %v3328_v54 = vadd.f32 %v3327_v53, %v6881_v51 }
 0x82b   :  { %v3329_v55 = vpop.f32.mrf.mxu1 }
 0x82c   :  { %v3424_v56 = vadd.f32 %v3417_v29, %v3328_v54  ;;  %v3330_v61 = vadd.f32 %v3329_v55, %v6885_v60 }
 0x82d   :  { %v3331_v57 = vpop.f32.mrf.mxu1 }
 0x82e   :  { %v5043_v58 = vmul.f32 -1.442695, %v3424_v56  ;;  %v3425_v62 = vadd.f32 %v3419_v3, %v3330_v61 }
 0x82f   :  { %v3332_v59 = vpop.f32.mrf.mxu1 }
 0x830   :  { %5783 = vpow2.f32 %v5043_v58  ;;  %v5044_v32 = vmul.f32 -1.442695, %v3425_v62 }
 0x831   :  { %5785 = vtanh.f32 %v3425_v62 }
 0x83d   :  { %v5784_v0 = vpop.eup %5783 }
 0x83e   :  { %v3429_v1 = vadd.f32 1.0, %v5784_v0  ;;  %v5786_v2 = vpop.eup %5785 }
 0x840   :  { %5787 = vrcp.f32 %v3429_v1 }
 0x841   :  { %5789 = vpow2.f32 %v5044_v32 }
 0x84d   :  { %v5788_v25 = vpop.eup %5787 }
 0x84e   :  { %v3440_v27 = vmul.f32 %v5788_v25, %v5786_v2  ;;  %v5790_v33 = vpop.eup %5789  ;;  %v3439_v63 = vmul.f32 0.0, %v5788_v25 }
 0x84f   :  { %v3436_v34 = vadd.f32 1.0, %v5790_v33 }
 0x850   :  { %3442 = vrot.lane.b32.xlu0 %v3440_v27, %s6064_s23 }
 0x851   :  { %5791 = vrcp.f32 %v3436_v34 }
 0x854   :  { %3660 = vrot.lane.b32.xlu0 %v3658_v30, %s6064_s23 }
 0x85e   :  { %v5792_v39 = vpop.eup %5791 }
 0x8c2   :  { %v3443_v35 = vpop.permute.xlu0 %3442 }
 0x8c3   :  { %v3445_v37 = vadd.f32 %v3443_v35, %v3439_v63 }
 0x8c5   :  { %5793 = vtanh.f32 %v3445_v37  ;;  %v3523_v63 = vrot.slane %v3445_v37, 7  ;;  %v6927_v37 = vld [vmem:[#allocation8 + $0x10] sm:$0xff]  }
 0x8c6   :  { %v3661_v44 = vpop.permute.xlu0 %3660 }
 0x8d2   :  { %v5794_v29 = vpop.eup %5793 }
 0x8d3   :  { %v6890_v3 = vmul.f32 %v5794_v29, %v5792_v39 }
 0x8d5   :  { %v3453_v18 = vpack.c.bf16 %v6890_v3, %v6890_v3 }
 0x8d7   :  { %3455 = vrot.lane.b32.xlu1 %v3453_v18, %s6064_s23 }
 0x949   :  { %v3456_v46 = vpop.permute.xlu1 %3455 }
 0x94a   :  { %5045 = vmatmul.mubr.msk.bf16.vlgmr.msra.gmra.mxu1 %vm2966_vm0, %v3456_v46  ;;  %v3722_v46 = vrot.slane %v6854_v31, 1  ;;  %v6931_v31 = vld [vmem:[#allocation8 + $0x8] sm:$0xff]  }
 0x94b   :  { %3674 = vmatpush1.bf16.msra.mxu1 %v6740_v26  ;;  %3697 = vmatprep.mubr.bf16.mxu1 %v6072_v52 }
 0x94c   :  { %3675 = vmatprep.subr.bf16.mxu1 %v6742_v43 }
 0x94f   :  { %3676 = vmatpush1.bf16.msra.mxu1 %v6746_v40 }
 0x950   :  { %3677 = vmatprep.subr.bf16.mxu1 %v6749_v23 }
 0x953   :  { %3678 = vmatpush1.bf16.msra.mxu1 %v6753_v45 }
 0x954   :  { %3679 = vmatprep.subr.bf16.mxu1 %v6756_v47 }
 0x957   :  { %3680 = vmatpush1.bf16.msra.mxu1 %v6758_v49 }
 0x958   :  { %3839 = vmatprep.subr.bf16.mxu1 %v6810_v7 }
 0x95a   :  { %5054 = vmatmul.mubr.msk.bf16.vlgmr.msra.gmra.mxu1 %vm2966_vm0, %v3661_v44 }
 0x95b   :  { %3840 = vmatpush1.bf16.msra.mxu1 %v6808_v6  ;;  %3863 = vmatprep.mubr.bf16.mxu1 %v6072_v52 }
 0x95c   :  { %3841 = vmatprep.subr.bf16.mxu1 %v6815_v9 }
 0x95f   :  { %3842 = vmatpush1.bf16.msra.mxu1 %v6823_v11 }
 0x960   :  { %3843 = vmatprep.subr.bf16.mxu1 %v6828_v14 }
 0x963   :  { %3844 = vmatpush1.bf16.msra.mxu1 %v6835_v17 }
 0x964   :  { %3845 = vmatprep.subr.bf16.mxu1 %v6840_v20 }
 0x967   :  { %3846 = vmatpush1.bf16.msra.mxu1 %v6847_v22 }
 0x968   :  { %3969 = vmatprep.subr.bf16.mxu1 %v6804_v4 }
 0xa0a   :  { %v3494_v48 = vpop.f32.mrf.mxu1 }
 0xa0b   :  { %v3503_v50 = vrot.slane %v3494_v48, 7 }
 0xa0c   :  { %v3496_v53 = vpop.f32.mrf.mxu1 }
 0xa0d   :  { %v3507_v55 = vadd.f32 %v3503_v50, %v3328_v54  ;;  %v3504_v59 = vrot.slane %v3496_v53, 7  ;;  %v6920_v53 = vld [vmem:[#allocation8 + $0x18] sm:$0xff]  }
 0xa0e   :  { %v3498_v56 = vpop.f32.mrf.mxu1 }
 0xa0f   :  { %v5046_v57 = vmul.f32 -1.442695, %v3507_v55  ;;  %v3508_v1 = vadd.f32 %v3504_v59, %v3330_v61  ;;  %v6073_v55 = vmov 0.0   ;;  %v6935_v56 = vld [vmem:[#allocation8] sm:$0xff]  }
 0xa10   :  { %v3499_v58 = vpop.f32.mrf.mxu1  ;;  %5141 = vmatprep.subr.bf16.mxu0 %v6073_v55  ;;  %4597 = vst [vmem:[#allocation12] sm:$0xff] %v6073_v55  ;;  %5149 = vmatprep.mubr.msk.bf16.mxu0 %vm6074_vm3, %v6073_v55 }
 0xa11   :  { %5795 = vpow2.f32 %v5046_v57  ;;  %5142 = vmatpush3.bf16.msra.mxu0 %v6920_v53  ;;  %v5047_v57 = vmul.f32 -1.442695, %v3508_v1 }
 0xa12   :  { %5143 = vmatprep.subr.bf16.mxu0 %v6073_v55 }
 0xa15   :  { %5144 = vmatpush3.bf16.msra.mxu0 %v6927_v37 }
 0xa16   :  { %5145 = vmatprep.subr.bf16.mxu0 %v6073_v55 }
 0xa19   :  { %5146 = vmatpush3.bf16.msra.mxu0 %v6931_v31 }
 0xa1a   :  { %v3699_v62 = vpop.f32.mrf.mxu1  ;;  %5147 = vmatprep.subr.bf16.mxu0 %v6073_v55 }
 0xa1b   :  { %v3706_v0 = vadd.f32 %v3699_v62, %v6786_v15 }
 0xa1c   :  { %v3701_v2 = vpop.f32.mrf.mxu1 }
 0xa1d   :  { %v5055_v25 = vmul.f32 -1.442695, %v3706_v0  ;;  %v3707_v54 = vadd.f32 %v3701_v2, %v6790_v24  ;;  %5148 = vmatpush3.bf16.msra.mxu0 %v6935_v56 }
 0xa1e   :  { %v5796_v27 = vpop.eup %5795  ;;  %v3703_v28 = vpop.f32.mrf.mxu1  ;;  %3753 = vmatprep.subr.bf16.mxu0 %v6738_v38 }
 0xa1f   :  { %v3512_v30 = vadd.f32 1.0, %v5796_v27  ;;  %5797 = vpow2.f32 %v5055_v25  ;;  %v5056_v58 = vmul.f32 -1.442695, %v3707_v54 }
 0xa20   :  { %5799 = vtanh.f32 %v3508_v1  ;;  %v3704_v32 = vpop.f32.mrf.mxu1  ;;  %v3451_v1 = vrot.slane %v6890_v3, %v6411_v13 }
 0xa21   :  { %5801 = vrcp.f32 %v3512_v30 }
 0xa22   :  { %5803 = vtanh.f32 %v3707_v54 }
 0xa2c   :  { %v5798_v33 = vpop.eup %5797 }
 0xa2d   :  { %v5800_v34 = vpop.eup %5799  ;;  %v3711_v35 = vadd.f32 1.0, %v5798_v33 }
 0xa2e   :  { %v5802_v39 = vpop.eup %5801 }
 0xa2f   :  { %5805 = vrcp.f32 %v3711_v35  ;;  %v3526_v29 = vmul.f32 %v5802_v39, %v5800_v34  ;;  %v3525_v61 = vmul.f32 %v5802_v39, %v3523_v63  ;;  %v5804_v18 = vpop.eup %5803  ;;  %v3452_v63 = vsel %vm3131_vm1, %v3451_v1, 0.0 }
 0xa30   :  { %5807 = vpow2.f32 %v5047_v57 }
 0xa31   :  { %3528 = vrot.lane.b32.xlu1 %v3526_v29, %s6064_s23  ;;  %5809 = vpow2.f32 %v5056_v58 }
 0xa3c   :  { %v5806_v44 = vpop.eup %5805 }
 0xa3d   :  { %v3725_v48 = vmul.f32 %v5806_v44, %v5804_v18  ;;  %v3724_v50 = vmul.f32 %v5806_v44, %v3722_v46  ;;  %v5808_v59 = vpop.eup %5807 }
 0xa3e   :  { %v3519_v62 = vadd.f32 1.0, %v5808_v59  ;;  %v5810_v25 = vpop.eup %5809 }
 0xa3f   :  { %3727 = vrot.lane.b32.xlu0 %v3725_v48, %s6064_s23  ;;  %v3718_v27 = vadd.f32 1.0, %v5810_v25 }
 0xa40   :  { %5811 = vrcp.f32 %v3519_v62 }
 0xa4d   :  { %v5812_v30 = vpop.eup %5811 }
 0xaa3   :  { %v3529_v0 = vpop.permute.xlu1 %3528 }
 0xaa4   :  { %v6940_v2 = vadd.f32 %v3529_v0, %v3525_v61 }
 0xaa6   :  { %5813 = vtanh.f32 %v6940_v2 }
 0xaa7   :  { %5815 = vrcp.f32 %v3718_v27 }
 0xab1   :  { %v3728_v28 = vpop.permute.xlu0 %3727 }
 0xab2   :  { %v3730_v32 = vadd.f32 %v3728_v28, %v3724_v50 }
 0xab3   :  { %v5814_v33 = vpop.eup %5813 }
 0xab4   :  { %5817 = vtanh.f32 %v3730_v32  ;;  %v3533_v54 = vmul.f32 %v5814_v33, %v5812_v30  ;;  %v5816_v29 = vpop.eup %5815 }
 0xab6   :  { %v3537_v34 = vrot.slane %v3533_v54, %v6419_v41 }
 0xab8   :  { %v3538_v35 = vsel %vm3218_vm2, %v3537_v34, %v3452_v63 }
 0xab9   :  { %v3539_v39 = vpack.c.bf16 %v3538_v35, %v3538_v35 }
 0xabb   :  { %3556 = vrot.lane.b32.xlu1 %v3539_v39, %s6064_s23  ;;  %v3808_v39 = vrot.slane %v3730_v32, 7 }
 0xac1   :  { %v5818_v61 = vpop.eup %5817 }
 0xac2   :  { %v6951_v18 = vmul.f32 %v5818_v61, %v5816_v29 }
 0xac4   :  { %v3738_v3 = vpack.c.bf16 %v6951_v18, %v6951_v18 }
 0xac6   :  { %3740 = vrot.lane.b32.xlu0 %v3738_v3, %s6064_s23  ;;  %v3872_v3 = vpack.c.bf16 %v3533_v54, %v3533_v54 }
 0xb2d   :  { %v3557_v46 = vpop.permute.xlu1 %3556 }
 0xb2e   :  { %5150 = vmatmul.mubr.msk.bf16.vlgmr.msra.gmra.mxu0 %vm2966_vm0, %v3557_v46 }
 0xb2f   :  { %3754 = vmatpush1.bf16.msra.mxu0 %v6740_v26  ;;  %3777 = vmatprep.mubr.bf16.mxu0 %v6072_v52 }
 0xb30   :  { %3755 = vmatprep.subr.bf16.mxu0 %v6742_v43 }
 0xb33   :  { %3756 = vmatpush1.bf16.msra.mxu0 %v6746_v40 }
 0xb34   :  { %3757 = vmatprep.subr.bf16.mxu0 %v6749_v23 }
 0xb37   :  { %3758 = vmatpush1.bf16.msra.mxu0 %v6753_v45 }
 0xb38   :  { %3759 = vmatprep.subr.bf16.mxu0 %v6756_v47  ;;  %v3741_v44 = vpop.permute.xlu0 %3740 }
 0xb3b   :  { %3760 = vmatpush1.bf16.msra.mxu0 %v6758_v49 }
 0xb3c   :  { %3889 = vmatprep.subr.bf16.mxu0 %v6804_v4 }
 0xb3e   :  { %5057 = vmatmul.mubr.msk.bf16.vlgmr.msra.gmra.mxu0 %vm2966_vm0, %v3741_v44  ;;  %v3874_v44 = vshrl.u32 %v3872_v3, 16 }
 0xb3f   :  { %3890 = vmatpush1.bf16.msra.mxu0 %v6806_v5  ;;  %3913 = vmatprep.mubr.bf16.mxu0 %v6072_v52 }
 0xb40   :  { %3891 = vmatprep.subr.bf16.mxu0 %v6812_v8 }
 0xb43   :  { %3892 = vmatpush1.bf16.msra.mxu0 %v6819_v10 }
 0xb44   :  { %3893 = vmatprep.subr.bf16.mxu0 %v6825_v12 }
 0xb47   :  { %3894 = vmatpush1.bf16.msra.mxu0 %v6831_v16 }
 0xb48   :  { %3895 = vmatprep.subr.bf16.mxu0 %v6837_v19 }
 0xb4b   :  { %3896 = vmatpush1.bf16.msra.mxu0 %v6843_v21 }
 0xb4c   :  { %5153 = vmatprep.subr.bf16.mxu0 %v6073_v55 }
 0xbee   :  { %v6976_v48 = vpop.f32.mrf.mxu0 }
 0xbf0   :  { %v5151_v50 = vpop.f32.mrf.mxu0 }
 0xbf2   :  { %v3622_v57 = vpop.f32.mrf.mxu0 }
 0xbf4   :  { %v5152_v58 = vpop.f32.mrf.mxu0 }
 0xbfe   :  { %v3779_v59 = vpop.f32.mrf.mxu0 }
 0xbff   :  { %v3788_v62 = vrot.slane %v3779_v59, 7 }
 0xc00   :  { %v3781_v0 = vpop.f32.mrf.mxu0 }
 0xc01   :  { %v3792_v25 = vadd.f32 %v3788_v62, %v6786_v15  ;;  %v3789_v33 = vrot.slane %v3781_v0, 7 }
 0xc02   :  { %v3783_v27 = vpop.f32.mrf.mxu0 }
 0xc03   :  { %v5058_v28 = vmul.f32 -1.442695, %v3792_v25  ;;  %v3793_v1 = vadd.f32 %v3789_v33, %v6790_v24  ;;  %v3736_v25 = vrot.slane %v6951_v18, %v6411_v13 }
 0xc04   :  { %v3784_v30 = vpop.f32.mrf.mxu0 }
 0xc05   :  { %5819 = vpow2.f32 %v5058_v28  ;;  %v5059_v50 = vmul.f32 -1.442695, %v3793_v1  ;;  %v3737_v30 = vsel %vm3131_vm1, %v3736_v25, 0.0 }
 0xc06   :  { %5821 = vtanh.f32 %v3793_v1 }
 0xc12   :  { %v5820_v34 = vpop.eup %5819 }
 0xc13   :  { %v3797_v63 = vadd.f32 1.0, %v5820_v34  ;;  %v5822_v35 = vpop.eup %5821 }
 0xc15   :  { %5823 = vrcp.f32 %v3797_v63 }
 0xc16   :  { %5825 = vpow2.f32 %v5059_v50 }
 0xc22   :  { %v5824_v29 = vpop.eup %5823 }
 0xc23   :  { %v3811_v61 = vmul.f32 %v5824_v29, %v5822_v35  ;;  %v3810_v46 = vmul.f32 %v5824_v29, %v3808_v39  ;;  %v5826_v57 = vpop.eup %5825 }
 0xc24   :  { %v3804_v58 = vadd.f32 1.0, %v5826_v57 }
 0xc25   :  { %3813 = vrot.lane.b32.xlu1 %v3811_v61, %s6064_s23 }
 0xc26   :  { %5827 = vrcp.f32 %v3804_v58 }
 0xc29   :  { %3876 = vrot.lane.b32.xlu1 %v3874_v44, %s6064_s23 }
 0xc33   :  { %v5828_v54 = vpop.eup %5827 }
 0xc97   :  { %v3814_v59 = vpop.permute.xlu1 %3813 }
 0xc98   :  { %v6982_v62 = vadd.f32 %v3814_v59, %v3810_v46 }
 0xc9a   :  { %5829 = vtanh.f32 %v6982_v62 }
 0xc9b   :  { %v3877_v32 = vpop.permute.xlu1 %3876 }
 0xc9c   :  { %5061 = vmatmul.mubr.msk.bf16.vlgmr.msra.gmra.mxu0 %vm2966_vm0, %v3877_v32 }
 0xc9d   :  { %5154 = vmatpush3.bf16.msra.mxu0 %v6920_v53  ;;  %5161 = vmatprep.mubr.msk.bf16.mxu0 %vm6074_vm3, %v6073_v55 }
 0xc9e   :  { %5155 = vmatprep.subr.bf16.mxu0 %v6073_v55 }
 0xca1   :  { %5156 = vmatpush3.bf16.msra.mxu0 %v6927_v37 }
 0xca2   :  { %5157 = vmatprep.subr.bf16.mxu0 %v6073_v55 }
 0xca5   :  { %5158 = vmatpush3.bf16.msra.mxu0 %v6931_v31 }
 0xca6   :  { %5159 = vmatprep.subr.bf16.mxu0 %v6073_v55 }
 0xca7   :  { %v5830_v0 = vpop.eup %5829 }
 0xca8   :  { %v3818_v27 = vmul.f32 %v5830_v0, %v5828_v54  ;;  %v3938_v0 = vrot.slane %v6940_v2, 1 }
 0xca9   :  { %5160 = vmatpush3.bf16.msra.mxu0 %v6935_v56 }
 0xcaa   :  { %v3822_v28 = vrot.slane %v3818_v27, %v6419_v41  ;;  %4212 = vmatprep.subr.bf16.mxu0 %v6738_v38 }
 0xcac   :  { %v3823_v33 = vsel %vm3218_vm2, %v3822_v28, %v3737_v30  ;;  %v4115_v30 = vpack.c.bf16 %v3818_v27, %v3818_v27 }
 0xcad   :  { %v3824_v1 = vpack.c.bf16 %v3823_v33, %v3823_v33 }
 0xcaf   :  { %3826 = vrot.lane.b32.xlu0 %v3824_v1, %s6064_s23  ;;  %v4117_v1 = vshrl.u32 %v4115_v30, 16  ;;  %v4181_v30 = vrot.slane %v6982_v62, 1 }
 0xd21   :  { %v3827_v34 = vpop.permute.xlu0 %3826 }
 0xd22   :  { %5060 = vmatmul.mubr.msk.bf16.vlgmr.msra.gmra.mxu1 %vm2966_vm0, %v3827_v34 }
 0xd23   :  { %3970 = vmatpush1.bf16.msra.mxu1 %v6806_v5  ;;  %3993 = vmatprep.mubr.bf16.mxu1 %v6072_v52 }
 0xd24   :  { %3971 = vmatprep.subr.bf16.mxu1 %v6812_v8 }
 0xd27   :  { %3972 = vmatpush1.bf16.msra.mxu1 %v6819_v10 }
 0xd28   :  { %3973 = vmatprep.subr.bf16.mxu1 %v6825_v12 }
 0xd2b   :  { %3974 = vmatpush1.bf16.msra.mxu1 %v6831_v16 }
 0xd2c   :  { %3975 = vmatprep.subr.bf16.mxu1 %v6837_v19 }
 0xd2f   :  { %3976 = vmatpush1.bf16.msra.mxu1 %v6843_v21 }
 0xd30   :  { %4132 = vmatprep.subr.bf16.mxu1 %v6738_v38 }
 0xd5c   :  { %v3915_v18 = vpop.f32.mrf.mxu0 }
 0xd5e   :  { %v3917_v63 = vpop.f32.mrf.mxu0 }
 0xd60   :  { %v3919_v35 = vpop.f32.mrf.mxu0 }
 0xd62   :  { %v3920_v39 = vpop.f32.mrf.mxu0 }
 0xde2   :  { %v3865_v29 = vpop.f32.mrf.mxu1 }
 0xde3   :  { %v3866_v61 = vadd.f32 %v3865_v29, %v6881_v51 }
 0xde4   :  { %v3867_v3 = vpop.f32.mrf.mxu1 }
 0xde5   :  { %v3922_v46 = vadd.f32 %v3915_v18, %v3866_v61  ;;  %v3868_v58 = vadd.f32 %v3867_v3, %v6885_v60 }
 0xde6   :  { %v3869_v44 = vpop.f32.mrf.mxu1 }
 0xde7   :  { %v5062_v50 = vmul.f32 -1.442695, %v3922_v46  ;;  %v3923_v59 = vadd.f32 %v3917_v63, %v3868_v58 }
 0xde8   :  { %v3870_v57 = vpop.f32.mrf.mxu1 }
 0xde9   :  { %5831 = vpow2.f32 %v5062_v50  ;;  %v5063_v34 = vmul.f32 -1.442695, %v3923_v59 }
 0xdea   :  { %5833 = vtanh.f32 %v3923_v59 }
 0xdf6   :  { %v5832_v32 = vpop.eup %5831 }
 0xdf7   :  { %v3927_v54 = vadd.f32 1.0, %v5832_v32  ;;  %v5834_v38 = vpop.eup %5833 }
 0xdf9   :  { %5835 = vrcp.f32 %v3927_v54 }
 0xdfa   :  { %5837 = vpow2.f32 %v5063_v34 }
 0xe06   :  { %v5836_v25 = vpop.eup %5835 }
 0xe07   :  { %v3941_v28 = vmul.f32 %v5836_v25, %v5834_v38  ;;  %v3940_v33 = vmul.f32 %v5836_v25, %v3938_v0  ;;  %v5838_v18 = vpop.eup %5837 }
 0xe08   :  { %v3934_v63 = vadd.f32 1.0, %v5838_v18 }
 0xe09   :  { %3943 = vrot.lane.b32.xlu0 %v3941_v28, %s6064_s23 }
 0xe0a   :  { %5839 = vrcp.f32 %v3934_v63 }
 0xe0d   :  { %4119 = vrot.lane.b32.xlu0 %v4117_v1, %s6064_s23 }
 0xe17   :  { %v5840_v29 = vpop.eup %5839 }
 0xe7b   :  { %v3944_v35 = vpop.permute.xlu0 %3943 }
 0xe7c   :  { %v3946_v39 = vadd.f32 %v3944_v35, %v3940_v33 }
 0xe7e   :  { %5841 = vtanh.f32 %v3946_v39  ;;  %v4024_v54 = vrot.slane %v3946_v39, 7 }
 0xe7f   :  { %v4120_v44 = vpop.permute.xlu0 %4119 }
 0xe8b   :  { %v5842_v3 = vpop.eup %5841 }
 0xe8c   :  { %v7019_v2 = vmul.f32 %v5842_v3, %v5840_v29 }
 0xe8e   :  { %v3954_v27 = vpack.c.bf16 %v7019_v2, %v7019_v2 }
 0xe90   :  { %3956 = vrot.lane.b32.xlu1 %v3954_v27, %s6064_s23 }
 0xf02   :  { %v3957_v46 = vpop.permute.xlu1 %3956 }
 0xf03   :  { %5064 = vmatmul.mubr.msk.bf16.vlgmr.msra.gmra.mxu1 %vm2966_vm0, %v3957_v46 }
 0xf04   :  { %4133 = vmatpush1.bf16.msra.mxu1 %v6740_v26  ;;  %4156 = vmatprep.mubr.bf16.mxu1 %v6072_v52 }
 0xf05   :  { %4134 = vmatprep.subr.bf16.mxu1 %v6742_v43 }
 0xf08   :  { %4135 = vmatpush1.bf16.msra.mxu1 %v6746_v40 }
 0xf09   :  { %4136 = vmatprep.subr.bf16.mxu1 %v6749_v23 }
 0xf0c   :  { %4137 = vmatpush1.bf16.msra.mxu1 %v6753_v45 }
 0xf0d   :  { %4138 = vmatprep.subr.bf16.mxu1 %v6756_v47 }
 0xf10   :  { %4139 = vmatpush1.bf16.msra.mxu1 %v6758_v49 }
 0xf11   :  { %4298 = vmatprep.subr.bf16.mxu1 %v6810_v7 }
 0xf13   :  { %5068 = vmatmul.mubr.msk.bf16.vlgmr.msra.gmra.mxu1 %vm2966_vm0, %v4120_v44 }
 0xf14   :  { %4299 = vmatpush1.bf16.msra.mxu1 %v6808_v6  ;;  %4322 = vmatprep.mubr.bf16.mxu1 %v6072_v52 }
 0xf15   :  { %4300 = vmatprep.subr.bf16.mxu1 %v6815_v9 }
 0xf18   :  { %4301 = vmatpush1.bf16.msra.mxu1 %v6823_v11 }
 0xf19   :  { %4302 = vmatprep.subr.bf16.mxu1 %v6828_v14 }
 0xf1c   :  { %4303 = vmatpush1.bf16.msra.mxu1 %v6835_v17 }
 0xf1d   :  { %4304 = vmatprep.subr.bf16.mxu1 %v6840_v20 }
 0xf20   :  { %4305 = vmatpush1.bf16.msra.mxu1 %v6847_v22 }
 0xf21   :  { %4428 = vmatprep.subr.bf16.mxu1 %v6804_v4 }
 0xfc3   :  { %v3995_v26 = vpop.f32.mrf.mxu1 }
 0xfc4   :  { %v4004_v43 = vrot.slane %v3995_v26, 7 }
 0xfc5   :  { %v3997_v40 = vpop.f32.mrf.mxu1 }
 0xfc6   :  { %v4008_v23 = vadd.f32 %v4004_v43, %v3866_v61  ;;  %v4005_v6 = vrot.slane %v3997_v40, 7  ;;  %v3952_v40 = vrot.slane %v7019_v2, %v6411_v13 }
 0xfc7   :  { %v3999_v45 = vpop.f32.mrf.mxu1 }
 0xfc8   :  { %v5065_v47 = vmul.f32 -1.442695, %v4008_v23  ;;  %v4009_v11 = vadd.f32 %v4005_v6, %v3868_v58 }
 0xfc9   :  { %v4000_v49 = vpop.f32.mrf.mxu1 }
 0xfca   :  { %5843 = vpow2.f32 %v5065_v47  ;;  %v5066_v18 = vmul.f32 -1.442695, %v4009_v11  ;;  %v3953_v47 = vsel %vm3131_vm1, %v3952_v40, 0.0 }
 0xfd3   :  { %v4158_v7 = vpop.f32.mrf.mxu1 }
 0xfd4   :  { %v4165_v9 = vadd.f32 %v4158_v7, %v6786_v15 }
 0xfd5   :  { %v4160_v14 = vpop.f32.mrf.mxu1 }
 0xfd6   :  { %v5069_v17 = vmul.f32 -1.442695, %v4165_v9  ;;  %v4166_v61 = vadd.f32 %v4160_v14, %v6790_v24 }
 0xfd7   :  { %v5844_v20 = vpop.eup %5843  ;;  %v4162_v50 = vpop.f32.mrf.mxu1 }
 0xfd8   :  { %v4013_v22 = vadd.f32 1.0, %v5844_v20  ;;  %5845 = vpow2.f32 %v5069_v17  ;;  %v5070_v63 = vmul.f32 -1.442695, %v4166_v61  ;;  %v5903_v17 = vld [vmem:[#allocation7 + $0x30] ss:$8 sps:$4 sm:$0xff]  }
 0xfd9   :  { %5847 = vtanh.f32 %v4009_v11  ;;  %v4163_v57 = vpop.f32.mrf.mxu1  ;;  %v5904_v20 = vld [vmem:[#allocation7 + $0x24] ss:$8 sps:$4 sm:$0xff]   ;;  %v5905_v50 = vld [vmem:[#allocation7 + $0x20] ss:$8 sps:$4 sm:$0xff]  }
 0xfda   :  { %5849 = vrcp.f32 %v4013_v22  ;;  %v5906_v22 = vld [vmem:[#allocation7 + $0x14] ss:$8 sps:$4 sm:$0xff]   ;;  %v5907_v57 = vld [vmem:[#allocation7 + $0x10] ss:$8 sps:$4 sm:$0xff]  }
 0xfdb   :  { %5851 = vtanh.f32 %v4166_v61  ;;  %v5908_v61 = vld [vmem:[#allocation7 + $0x4] ss:$8 sps:$4 sm:$0xff]  }
 0xfe5   :  { %v5846_v59 = vpop.eup %5845 }
 0xfe6   :  { %v5848_v32 = vpop.eup %5847  ;;  %v4170_v38 = vadd.f32 1.0, %v5846_v59  ;;  %v5909_v59 = vld [vmem:[#allocation7] ss:$8 sps:$4 sm:$0xff]  }
 0xfe7   :  { %v5850_v0 = vpop.eup %5849 }
 0xfe8   :  { %5853 = vrcp.f32 %v4170_v38  ;;  %v4027_v25 = vmul.f32 %v5850_v0, %v5848_v32  ;;  %v4026_v58 = vmul.f32 %v5850_v0, %v4024_v54  ;;  %v5852_v28 = vpop.eup %5851 }
 0xfe9   :  { %5855 = vpow2.f32 %v5066_v18 }
 0xfea   :  { %4029 = vrot.lane.b32.xlu1 %v4027_v25, %s6064_s23  ;;  %5857 = vpow2.f32 %v5070_v63 }
 0xff5   :  { %v5854_v33 = vpop.eup %5853 }
 0xff6   :  { %v4184_v1 = vmul.f32 %v5854_v33, %v5852_v28  ;;  %v4183_v34 = vmul.f32 %v5854_v33, %v4181_v30  ;;  %v5856_v35 = vpop.eup %5855 }
 0xff7   :  { %v4020_v39 = vadd.f32 1.0, %v5856_v35  ;;  %v5858_v27 = vpop.eup %5857 }
 0xff8   :  { %4186 = vrot.lane.b32.xlu0 %v4184_v1, %s6064_s23  ;;  %v4177_v46 = vadd.f32 1.0, %v5858_v27 }
 0xff9   :  { %5859 = vrcp.f32 %v4020_v39 }
0x1006   :  { %v5860_v44 = vpop.eup %5859 }
0x105c   :  { %v4030_v29 = vpop.permute.xlu1 %4029 }
0x105d   :  { %v7049_v3 = vadd.f32 %v4030_v29, %v4026_v58 }
0x105f   :  { %5861 = vtanh.f32 %v7049_v3 }
0x1060   :  { %5863 = vrcp.f32 %v4177_v46 }
0x106a   :  { %v4187_v62 = vpop.permute.xlu0 %4186 }
0x106b   :  { %v7052_v26 = vadd.f32 %v4187_v62, %v4183_v34 }
0x106c   :  { %v5862_v43 = vpop.eup %5861 }
0x106d   :  { %5865 = vtanh.f32 %v7052_v26  ;;  %v7057_v23 = vmul.f32 %v5862_v43, %v5860_v44  ;;  %v5864_v7 = vpop.eup %5863  ;;  %v4267_v27 = vrot.slane %v7052_v26, 7 }
0x106f   :  { %v4038_v45 = vrot.slane %v7057_v23, %v6419_v41  ;;  %v4331_v44 = vpack.c.bf16 %v7057_v23, %v7057_v23 }
0x1071   :  { %v4039_v49 = vsel %vm3218_vm2, %v4038_v45, %v3953_v47  ;;  %v4333_v43 = vshrl.u32 %v4331_v44, 16 }
0x1072   :  { %v4040_v6 = vpack.c.bf16 %v4039_v49, %v4039_v49 }
0x1074   :  { %4042 = vrot.lane.b32.xlu1 %v4040_v6, %s6064_s23 }
0x107a   :  { %v5866_v9 = vpop.eup %5865 }
0x107b   :  { %v7066_v2 = vmul.f32 %v5866_v9, %v5864_v7 }
0x107d   :  { %v4197_v11 = vpack.c.bf16 %v7066_v2, %v7066_v2  ;;  %v4195_v7 = vrot.slane %v7066_v2, %v6411_v13 }
0x107f   :  { %4199 = vrot.lane.b32.xlu0 %v4197_v11, %s6064_s23 }
0x10e6   :  { %v4043_v14 = vpop.permute.xlu1 %4042 }
0x10e7   :  { %5162 = vmatmul.mubr.msk.bf16.vlgmr.msra.gmra.mxu0 %vm2966_vm0, %v4043_v14 }
0x10e8   :  { %4213 = vmatpush1.bf16.msra.mxu0 %v5903_v17  ;;  %4236 = vmatprep.mubr.bf16.mxu0 %v6072_v52 }
0x10e9   :  { %4214 = vmatprep.subr.bf16.mxu0 %v5904_v20 }
0x10ec   :  { %4215 = vmatpush1.bf16.msra.mxu0 %v5905_v50 }
0x10ed   :  { %4216 = vmatprep.subr.bf16.mxu0 %v5906_v22 }
0x10f0   :  { %4217 = vmatpush1.bf16.msra.mxu0 %v5907_v57 }
0x10f1   :  { %4218 = vmatprep.subr.bf16.mxu0 %v5908_v61  ;;  %v4200_v32 = vpop.permute.xlu0 %4199 }
0x10f4   :  { %4219 = vmatpush1.bf16.msra.mxu0 %v5909_v59  ;;  %v4397_v59 = vrot.slane %v7049_v3, 1 }
0x10f5   :  { %4348 = vmatprep.subr.bf16.mxu0 %v6804_v4 }
0x10f7   :  { %5071 = vmatmul.mubr.msk.bf16.vlgmr.msra.gmra.mxu0 %vm2966_vm0, %v4200_v32 }
0x10f8   :  { %4349 = vmatpush1.bf16.msra.mxu0 %v6806_v5  ;;  %4372 = vmatprep.mubr.bf16.mxu0 %v6072_v52 }
0x10f9   :  { %4350 = vmatprep.subr.bf16.mxu0 %v6812_v8 }
0x10fc   :  { %4351 = vmatpush1.bf16.msra.mxu0 %v6819_v10 }
0x10fd   :  { %4352 = vmatprep.subr.bf16.mxu0 %v6825_v12 }
0x1100   :  { %4353 = vmatpush1.bf16.msra.mxu0 %v6831_v16 }
0x1101   :  { %4354 = vmatprep.subr.bf16.mxu0 %v6837_v19 }
0x1104   :  { %4355 = vmatpush1.bf16.msra.mxu0 %v6843_v21 }
0x1105   :  { %5165 = vmatprep.subr.bf16.mxu0 %v6073_v55 }
0x11a7   :  { %v7084_v4 = vpop.f32.mrf.mxu0 }
0x11a9   :  { %v5163_v54 = vpop.f32.mrf.mxu0 }
0x11ab   :  { %v4084_v38 = vpop.f32.mrf.mxu0 }
0x11ad   :  { %v5164_v0 = vpop.f32.mrf.mxu0 }
0x11b7   :  { %v4238_v25 = vpop.f32.mrf.mxu0 }
0x11b8   :  { %v4247_v58 = vrot.slane %v4238_v25, 7 }
0x11b9   :  { %v4240_v28 = vpop.f32.mrf.mxu0 }
0x11ba   :  { %v4251_v30 = vadd.f32 %v4247_v58, %v6786_v15  ;;  %v4248_v18 = vrot.slane %v4240_v28, 7 }
0x11bb   :  { %v4242_v33 = vpop.f32.mrf.mxu0 }
0x11bc   :  { %v5072_v1 = vmul.f32 -1.442695, %v4251_v30  ;;  %v4252_v63 = vadd.f32 %v4248_v18, %v6790_v24 }
0x11bd   :  { %v4243_v34 = vpop.f32.mrf.mxu0 }
0x11be   :  { %5867 = vpow2.f32 %v5072_v1  ;;  %v5073_v40 = vmul.f32 -1.442695, %v4252_v63 }
0x11bf   :  { %5869 = vtanh.f32 %v4252_v63 }
0x11cb   :  { %v5868_v35 = vpop.eup %5867 }
0x11cc   :  { %v4256_v39 = vadd.f32 1.0, %v5868_v35  ;;  %v5870_v29 = vpop.eup %5869 }
0x11ce   :  { %5871 = vrcp.f32 %v4256_v39 }
0x11cf   :  { %5873 = vpow2.f32 %v5073_v40 }
0x11db   :  { %v5872_v46 = vpop.eup %5871 }
0x11dc   :  { %v4270_v62 = vmul.f32 %v5872_v46, %v5870_v29  ;;  %v4269_v15 = vmul.f32 %v5872_v46, %v4267_v27  ;;  %v5874_v24 = vpop.eup %5873 }
0x11dd   :  { %v4263_v45 = vadd.f32 1.0, %v5874_v24 }
0x11de   :  { %4272 = vrot.lane.b32.xlu1 %v4270_v62, %s6064_s23 }
0x11df   :  { %5875 = vrcp.f32 %v4263_v45 }
0x11e2   :  { %4335 = vrot.lane.b32.xlu1 %v4333_v43, %s6064_s23 }
0x11ec   :  { %v5876_v23 = vpop.eup %5875 }
0x1250   :  { %v4273_v47 = vpop.permute.xlu1 %4272 }
0x1251   :  { %v7093_v49 = vadd.f32 %v4273_v47, %v4269_v15 }
0x1253   :  { %5877 = vtanh.f32 %v7093_v49 }
0x1254   :  { %v4336_v26 = vpop.permute.xlu1 %4335 }
0x1255   :  { %5075 = vmatmul.mubr.msk.bf16.vlgmr.msra.gmra.mxu0 %vm2966_vm0, %v4336_v26  ;;  %v5048_v26 = vld [vmem:[#allocation10] ss:$0 sm:$0xff] }
0x1256   :  { %5166 = vmatpush3.bf16.msra.mxu0 %v6920_v53  ;;  %5173 = vmatprep.mubr.msk.bf16.mxu0 %vm6074_vm3, %v6073_v55 }
0x1257   :  { %5167 = vmatprep.subr.bf16.mxu0 %v6073_v55 }
0x125a   :  { %5168 = vmatpush3.bf16.msra.mxu0 %v6927_v37  ;;  %v4196_v37 = vsel %vm3131_vm1, %v4195_v7, 0.0 }
0x125b   :  { %5169 = vmatprep.subr.bf16.mxu0 %v6073_v55 }
0x125e   :  { %5170 = vmatpush3.bf16.msra.mxu0 %v6931_v31 }
0x125f   :  { %5171 = vmatprep.subr.bf16.mxu0 %v6073_v55 }
0x1260   :  { %v5878_v6 = vpop.eup %5877 }
0x1261   :  { %v7107_v9 = vmul.f32 %v5878_v6, %v5876_v23  ;;  %v3620_v23 = vadd.f32 %v5048_v26, %v6976_v48 }
0x1262   :  { %5172 = vmatpush3.bf16.msra.mxu0 %v6935_v56 }
0x1263   :  { %v4281_v53 = vrot.slane %v7107_v9, %v6419_v41  ;;  %v3626_v6 = vsel %vm3625_vm4, %v3620_v23, -inf }
0x1265   :  { %v4282_v31 = vsel %vm3218_vm2, %v4281_v53, %v4196_v37 }
0x1266   :  { %v4283_v11 = vpack.c.bf16 %v4282_v31, %v4282_v31 }
0x1268   :  { %4285 = vrot.lane.b32.xlu0 %v4283_v11, %s6064_s23 }
0x12da   :  { %v4286_v55 = vpop.permute.xlu0 %4285 }
0x12db   :  { %5074 = vmatmul.mubr.msk.bf16.vlgmr.msra.gmra.mxu1 %vm2966_vm0, %v4286_v55 }
0x12dc   :  { %4429 = vmatpush1.bf16.msra.mxu1 %v6806_v5  ;;  %4452 = vmatprep.mubr.bf16.mxu1 %v6072_v52 }
0x12dd   :  { %4430 = vmatprep.subr.bf16.mxu1 %v6812_v8 }
0x12e0   :  { %4431 = vmatpush1.bf16.msra.mxu1 %v6819_v10 }
0x12e1   :  { %4432 = vmatprep.subr.bf16.mxu1 %v6825_v12 }
0x12e4   :  { %4433 = vmatpush1.bf16.msra.mxu1 %v6831_v16 }
0x12e5   :  { %4434 = vmatprep.subr.bf16.mxu1 %v6837_v19 }
0x12e8   :  { %4435 = vmatpush1.bf16.msra.mxu1 %v6843_v21 }
0x1315   :  { %v4374_v56 = vpop.f32.mrf.mxu0 }
0x1317   :  { %v4376_v2 = vpop.f32.mrf.mxu0 }
0x1319   :  { %v4378_v14 = vpop.f32.mrf.mxu0 }
0x131b   :  { %v4379_v17 = vpop.f32.mrf.mxu0 }
0x139b   :  { %v4324_v20 = vpop.f32.mrf.mxu1 }
0x139c   :  { %v4325_v5 = vadd.f32 %v4324_v20, %v6881_v51 }
0x139d   :  { %v4326_v50 = vpop.f32.mrf.mxu1 }
0x139e   :  { %v4381_v22 = vadd.f32 %v4374_v56, %v4325_v5  ;;  %v4327_v12 = vadd.f32 %v4326_v50, %v6885_v60  ;;  %v4082_v50 = vadd.f32 %v5048_v26, %v7084_v4 }
0x139f   :  { %v4328_v8 = vpop.f32.mrf.mxu1 }
0x13a0   :  { %v5076_v57 = vmul.f32 -1.442695, %v4381_v22  ;;  %v4382_v16 = vadd.f32 %v4376_v2, %v4327_v12  ;;  %v4087_v22 = vsel %vm3625_vm4, %v4082_v50, -inf  ;;  %v7149_v8 = vand.u32 127, %v310_v36 }
0x13a1   :  { %v4329_v10 = vpop.f32.mrf.mxu1 }
0x13a2   :  { %5879 = vpow2.f32 %v5076_v57  ;;  %v5077_v51 = vmul.f32 -1.442695, %v4382_v16  ;;  %vm3646_vm10 = vcmp.eq.s32.totalorder %v7149_v8, 0  ;;  %vm3648_vm13 = vcmp.eq.s32.totalorder %v7149_v8, 1 }
0x13a3   :  { %5881 = vtanh.f32 %v4382_v16  ;;  %vm3652_vm14 = vcmp.lt.s32.totalorder %v7149_v8, 2 }
0x13af   :  { %v5880_v61 = vpop.eup %5879 }
0x13b0   :  { %v4386_v19 = vadd.f32 1.0, %v5880_v61  ;;  %v5882_v21 = vpop.eup %5881 }
0x13b2   :  { %5883 = vrcp.f32 %v4386_v19 }
0x13b3   :  { %5885 = vpow2.f32 %v5077_v51 }
0x13bf   :  { %v5884_v32 = vpop.eup %5883 }
0x13c0   :  { %v4400_v54 = vmul.f32 %v5884_v32, %v5882_v21  ;;  %v4399_v38 = vmul.f32 %v5884_v32, %v4397_v59  ;;  %v5886_v0 = vpop.eup %5885 }
0x13c1   :  { %v4393_v25 = vadd.f32 1.0, %v5886_v0 }
0x13c2   :  { %4402 = vrot.lane.b32.xlu0 %v4400_v54, %s6064_s23 }
0x13c3   :  { %5887 = vrcp.f32 %v4393_v25 }
0x13d0   :  { %v5888_v60 = vpop.eup %5887 }
0x1434   :  { %v4403_v58 = vpop.permute.xlu0 %4402 }
0x1435   :  { %v4405_v28 = vadd.f32 %v4403_v58, %v4399_v38 }
0x1437   :  { %5889 = vtanh.f32 %v4405_v28  ;;  %v4483_v40 = vrot.slane %v4405_v28, 7 }
0x1444   :  { %v5890_v30 = vpop.eup %5889 }
0x1445   :  { %v4407_v33 = vmul.f32 %v5890_v30, %v5888_v60 }
0x1447   :  { %v4413_v1 = vpack.c.bf16 %v4407_v33, %v4407_v33  ;;  %v4411_v2 = vrot.slane %v4407_v33, %v6411_v13 }
0x1449   :  { %4415 = vrot.lane.b32.xlu1 %v4413_v1, %s6064_s23  ;;  %v4412_v17 = vsel %vm3131_vm1, %v4411_v2, 0.0 }
0x14bb   :  { %v4416_v3 = vpop.permute.xlu1 %4415 }
0x14bc   :  { %5078 = vmatmul.mubr.msk.bf16.vlgmr.msra.gmra.mxu1 %vm2966_vm0, %v4416_v3 }
0x157c   :  { %v4454_v34 = vpop.f32.mrf.mxu1 }
0x157d   :  { %v4463_v18 = vrot.slane %v4454_v34, 7 }
0x157e   :  { %v4456_v63 = vpop.f32.mrf.mxu1 }
0x157f   :  { %v4467_v35 = vadd.f32 %v4463_v18, %v4325_v5  ;;  %v4464_v46 = vrot.slane %v4456_v63, 7 }
0x1580   :  { %v4458_v39 = vpop.f32.mrf.mxu1 }
0x1581   :  { %v5079_v29 = vmul.f32 -1.442695, %v4467_v35  ;;  %v4468_v62 = vadd.f32 %v4464_v46, %v4327_v12 }
0x1582   :  { %v4459_v27 = vpop.f32.mrf.mxu1 }
0x1583   :  { %5891 = vpow2.f32 %v5079_v29  ;;  %v5080_v7 = vmul.f32 -1.442695, %v4468_v62 }
0x1584   :  { %5893 = vtanh.f32 %v4468_v62 }
0x1590   :  { %v5892_v44 = vpop.eup %5891 }
0x1591   :  { %v4472_v15 = vadd.f32 1.0, %v5892_v44  ;;  %v5894_v43 = vpop.eup %5893 }
0x1593   :  { %5895 = vrcp.f32 %v4472_v15 }
0x1594   :  { %5897 = vpow2.f32 %v5080_v7 }
0x15a0   :  { %v5896_v24 = vpop.eup %5895 }
0x15a1   :  { %v4486_v45 = vmul.f32 %v5896_v24, %v5894_v43  ;;  %v4485_v47 = vmul.f32 %v5896_v24, %v4483_v40  ;;  %v5898_v53 = vpop.eup %5897 }
0x15a2   :  { %v4479_v37 = vadd.f32 1.0, %v5898_v53 }
0x15a3   :  { %4488 = vrot.lane.b32.xlu0 %v4486_v45, %s6064_s23 }
0x15a4   :  { %5899 = vrcp.f32 %v4479_v37 }
0x15b1   :  { %v5900_v55 = vpop.eup %5899 }
0x15c2   :  { %3627 = vmax.xlane.f32.xlu0 %v3626_v6 }
0x1615   :  { %v4489_v31 = vpop.permute.xlu0 %4488 }
0x1616   :  { %v4491_v11 = vadd.f32 %v4489_v31, %v4485_v47 }
0x1618   :  { %5901 = vtanh.f32 %v4491_v11 }
0x1625   :  { %v5902_v56 = vpop.eup %5901 }
0x1626   :  { %v7136_v14 = vmul.f32 %v5902_v56, %v5900_v55 }
0x1628   :  { %v4497_v48 = vrot.slane %v7136_v14, %v6419_v41 }
0x162a   :  { %v4498_v20 = vsel %vm3218_vm2, %v4497_v48, %v4412_v17 }
0x162b   :  { %v4499_v5 = vpack.c.bf16 %v4498_v20, %v4498_v20 }
0x162d   :  { %4501 = vrot.lane.b32.xlu1 %v4499_v5, %s6064_s23 }
0x164b   :  { %v3628_v19 = vpop.xlane.xlu0 %3627 }
0x164c   :  { %vm3629_vm6 = vcmp.eq.f32.partialorder %v3620_v23, %v3628_v19 }
0x164d   :  { %v3630_v4 = vsel %vm3629_vm6, %v7149_v8, 128 }
0x164e   :  { %v3631_v21 = vsel %vm3625_vm4, %v3630_v4, 2147483647 }
0x164f   :  { %v3633_v36 = vshra.s32 %v3631_v21, 16  ;;  %v3632_v28 = vand.u32 65535, %v3631_v21 }
0x1651   :  { %4088 = vmax.xlane.f32.xlu1 %v4087_v22  ;;  %v3635_v25 = vcvt.s32.f32 %v3633_v36  ;;  %v3634_v1 = vcvt.s32.f32 %v3632_v28 }
0x169f   :  { %v4502_v13 = vpop.permute.xlu1 %4501 }
0x16a0   :  { %5174 = vmatmul.mubr.msk.bf16.vlgmr.msra.gmra.mxu0 %vm2966_vm0, %v4502_v13 }
0x16da   :  { %v4089_v57 = vpop.xlane.xlu1 %4088 }
0x16db   :  { %vm4090_vm5 = vcmp.eq.f32.partialorder %v4082_v50, %v4089_v57 }
0x16dc   :  { %v4091_v10 = vsel %vm4090_vm5, %v7149_v8, 128 }
0x16dd   :  { %v4092_v12 = vsel %vm3625_vm4, %v4091_v10, 2147483647 }
0x16de   :  { %v4094_v16 = vshra.s32 %v4092_v12, 16  ;;  %v4093_v18 = vand.u32 65535, %v4092_v12 }
0x16e0   :  { %v4096_v61 = vcvt.s32.f32 %v4094_v16  ;;  %v4095_v39 = vcvt.s32.f32 %v4093_v18 }
0x16e2   :  { %4097 = vmin.xlane.f32.xlu1 %v4096_v61 }
0x1760   :  { %v4540_v59 = vpop.f32.mrf.mxu0 }
0x1761   :  { %v4541_v32 = vadd.f32 %v5048_v26, %v4540_v59 }
0x1762   :  { %v5175_v54 = vpop.f32.mrf.mxu0 }
0x1763   :  { %v4546_v38 = vsel %vm3625_vm4, %v4541_v32, -inf }
0x1764   :  { %4547 = vmax.xlane.f32.xlu0 %v4546_v38  ;;  %v4543_v51 = vpop.f32.mrf.mxu0 }
0x1766   :  { %v5176_v0 = vpop.f32.mrf.mxu0 }
0x1768   :  { %3636 = vmin.xlane.f32.xlu0 %v3635_v25 }
0x176b   :  { %v4098_v34 = vpop.xlane.xlu1 %4097 }
0x176c   :  { %vm4099_vm9 = vcmp.eq.f32.partialorder %v4096_v61, %v4098_v34  ;;  %v4104_v24 = vcvt.f32.s32 %v4098_v34 }
0x176d   :  { %v4100_v29 = vsel %vm4099_vm9, %v4095_v39, inf }
0x176e   :  { %v4105_v23 = vshll.u32 %v4104_v24, 16 }
0x17ed   :  { %v4548_v58 = vpop.xlane.xlu0 %4547 }
0x17ee   :  { %vm4549_vm7 = vcmp.eq.f32.partialorder %v4541_v32, %v4548_v58 }
0x17ef   :  { %v4550_v60 = vsel %vm4549_vm7, %v7149_v8, 128 }
0x17f0   :  { %v4551_v30 = vsel %vm3625_vm4, %v4550_v60, 2147483647 }
0x17f1   :  { %v3637_v33 = vpop.xlane.xlu0 %3636  ;;  %v4553_v3 = vshra.s32 %v4551_v30, 16  ;;  %v4552_v46 = vand.u32 65535, %v4551_v30 }
0x17f2   :  { %vm3638_vm8 = vcmp.eq.f32.partialorder %v3635_v25, %v3637_v33  ;;  %v3643_v27 = vcvt.f32.s32 %v3637_v33 }
0x17f3   :  { %v3639_v63 = vsel %vm3638_vm8, %v3634_v1, inf  ;;  %v4555_v35 = vcvt.s32.f32 %v4553_v3  ;;  %v4554_v40 = vcvt.s32.f32 %v4552_v46 }
0x17f4   :  { %3640 = vmin.xlane.f32.xlu1 %v3639_v63  ;;  %v3644_v44 = vshll.u32 %v3643_v27, 16 }
0x17f5   :  { %4556 = vmin.xlane.f32.xlu0 %v4555_v35 }
0x17f9   :  { %4101 = vmin.xlane.f32.xlu0 %v4100_v29 }
0x1805   :  { %4605 = vrot.lane.b32.xlu1 %v7093_v49, %s6064_s23 }
0x180f   :  { %4599 = vrot.lane.b32.xlu0 %v7107_v9, %s6064_s23 }
0x1813   :  { %4615 = vrot.lane.b32.xlu0 %v4491_v11, %s6064_s23 }
0x187d   :  { %v3641_v62 = vpop.xlane.xlu1 %3640 }
0x187e   :  { %v3642_v15 = vcvt.f32.s32 %v3641_v62  ;;  %v4557_v43 = vpop.xlane.xlu0 %4556 }
0x187f   :  { %vm4558_vm12 = vcmp.eq.f32.partialorder %v4555_v35, %v4557_v43  ;;  %v4563_v10 = vcvt.f32.s32 %v4557_v43 }
0x1880   :  { %v3645_v45 = vadd.s32 %v3644_v44, %v3642_v15  ;;  %v4559_v47 = vsel %vm4558_vm12, %v4554_v40, inf }
0x1881   :  { %v4606_v49 = vpop.permute.xlu1 %4605  ;;  %4560 = vmin.xlane.f32.xlu1 %v4559_v47  ;;  %v4564_v16 = vshll.u32 %v4563_v10, 16 }
0x1882   :  { %v3647_v9 = vsel %vm3646_vm10, %v3645_v45, 0  ;;  %4608 = vst.msk [vmem:[#allocation12 + $0x1] sm:$0x2] %vm4602_vm11, %v4606_v49  ;;  %v4102_v26 = vpop.xlane.xlu0 %4101 }
0x1883   :  { %v3649_v6 = vrot.slane %v3647_v9, 7  ;;  %v4103_v7 = vcvt.f32.s32 %v4102_v26 }
0x1885   :  { %v3650_v53 = vsel %vm3648_vm13, %v3645_v45, %v3649_v6  ;;  %v4106_v37 = vadd.s32 %v4105_v23, %v4103_v7 }
0x1886   :  { %vm3651_vm15 = vcmp.eq.s32.totalorder %v3650_v53, 0  ;;  %v4600_v31 = vpop.permute.xlu0 %4599  ;;  %v4577_v55 = vrot.slane %v3650_v53, %v6419_v41 }
0x1887   :  { %vm3653_vm0 = vmand %vm3651_vm15, %vm3652_vm14  ;;  %v4107_v11 = vsel %vm3646_vm10, %v4106_v37, 0  ;;  %4603 = vst.msk [vmem:[#allocation12 - $0x1] sm:$0x2] %vm4602_vm11, %v4600_v31 }
0x1888   :  { %v4108_v56 = vrot.slane %v4107_v11, 7  ;;  %v3654_v2 = vsel %vm3653_vm0, 1, %v6072_v52  ;;  %v4578_v5 = vsel %vm3131_vm1, %v4577_v55, 0 }
0x1889   :  { %v3655_v50 = vsel %vm3653_vm0, %v3654_v2, 0 }
0x188a   :  { %v4109_v48 = vsel %vm3648_vm13, %v4106_v37, %v4108_v56  ;;  %v4616_v17 = vpop.permute.xlu0 %4615 }
0x188b   :  { %vm4110_vm3 = vcmp.eq.s32.totalorder %v4109_v48, 0  ;;  %v4582_v20 = vrot.slane %v4109_v48, %v6419_v41  ;;  %4618 = vst.msk [vmem:[#allocation12 + $0x2] sm:$0x2] %vm4602_vm11, %v4616_v17 }
0x188c   :  { %vm4111_vm4 = vmand %vm4110_vm3, %vm3652_vm14 }
0x188d   :  { %v4112_v22 = vsel %vm4111_vm4, 1, %v6072_v52  ;;  %v4583_v13 = vsel %vm3218_vm2, %v4582_v20, %v4578_v5 }
0x188e   :  { %vm4113_vm5 = vcmp.gt.s32.totalorder %v3655_v50, %v4112_v22 }
0x188f   :  { %v4114_v57 = vsel %vm4113_vm5, %v3655_v50, %v4112_v22 }
0x1892   :  { %4610 = vrot.lane.b32.xlu1 %v7136_v14, %s6064_s23 }
0x190a   :  { %v4561_v12 = vpop.xlane.xlu1 %4560 }
0x190b   :  { %v4562_v61 = vcvt.f32.s32 %v4561_v12 }
0x190d   :  { %v4565_v19 = vadd.s32 %v4564_v16, %v4562_v61 }
0x190e   :  { %v4611_v4 = vpop.permute.xlu1 %4610 }
0x190f   :  { %v4566_v21 = vsel %vm3646_vm10, %v4565_v19, 0  ;;  %4613 = vst.msk [vmem:[#allocation12] sm:$0x2] %vm4602_vm11, %v4611_v4 }
0x1910   :  { %v4567_v59 = vrot.slane %v4566_v21, 7 }
0x1911   :  { %6021 = shalt.err (!%p6018_p1)
}
0x1912   :  { %4638 = dma.vmem_to_hbm [thread:$0]  %s4636_s17, 128, %s7223_s14, [#allocation13]   ;;  %v4568_v14 = vsel %vm3648_vm13, %v4565_v19, %v4567_v59  ;;  %vm4584_vm1 = vcmp.eq.s32.totalorder %v6176_v42, 2  ;;  %vm4590_vm8 = vcmp.eq.s32.totalorder %v6176_v42, 3 }
0x1913   :  { %vm4569_vm2 = vcmp.eq.s32.totalorder %v4568_v14, 0  ;;  %v4588_v32 = vrot.slane %v4568_v14, %v6419_v41  ;;  %s6076_s4 = smov [#allocation11]  }
0x1914   :  { %vm4570_vm6 = vmand %vm4569_vm2, %vm3652_vm14  ;;  %s4625_s30 = sshll.u32 %s6076_s4, 4  ;;  %s4626_s30 = int_to_ptr.vmem [resolvable:$true] %s4625_s30 }
0x1915   :  { %v4571_v54 = vsel %vm4570_vm6, 1, %v6072_v52  ;;  %v4589_v36 = vsel %vm4584_vm1, %v4588_v32, %v4583_v13  ;;  %s6030_s14 = scalar_lea.vmem %s4626_s30, 128  ;;  %p6035_p3 = scmp.lt.s32.totalorder %s4626_s30, %s4626_s30 }
0x1916   :  { %vm4572_vm7 = vcmp.gt.s32.totalorder %v4114_v57, %v4571_v54  ;;  %p6031_p2 = scmp.ne.s32.totalorder %s4626_s30, %s6030_s14  ;;  %p6036_p4 = scmp.lt.s32.totalorder %s6030_s14, %s6030_s14 }
0x1917   :  { %v4573_v38 = vsel %vm4572_vm7, %v4114_v57, %v4571_v54 }
0x1918   :  { %v4594_v51 = vrot.slane %v4573_v38, %v6419_v41  ;;  %p6037_p5 = por %p6036_p4, %p6035_p3 }
0x191a   :  { %v4595_v0 = vsel %vm4590_vm8, %v4594_v51, %v4589_v36  ;;  %p6038_p6 = pnand %p6037_p5, %p6031_p2 }
0x191b   :  { %4596 = vst [vmem:[#allocation11] sm:$0xff] %v4595_v0 }
0x191c   :  { %6041 = shalt.err (!%p6038_p6)
}
0x191d   :  { %4628 = dma.vmem_to_hbm [thread:$0]  %s4626_s30, 128, %s7222_s13, [#allocation4]  }
0x191e   :  { %6056 = dma.done.wait [#allocation4], 128  }
0x191f   :  { %6057 = vsyncadd [#allocation4], 4294967168 }
0x1920   :  { %6058 = dma.done.wait [#allocation13], 128  }
0x1921   :  { %6059 = vsyncadd [#allocation13], 4294967168 }
0x1922   :  { %4645 = vsyncpa [#allocation3], 1 }
0x1923   :  { %4646 = vsyncpa [#allocation6], 1 }
0x1924   :  { %4647 = vsyncpa [#allocation9], 1 }
0x1925   :  { %4648 = vsyncpa [#allocation4], 1 }
0x1926   :  { %4649 = vsyncpa [#allocation13], 1 }

</bundles_post_ra>
